<compile_context>
chip_gen: v7x
topology: tpu7x:2x2x1
jax: 0.10.0
libtpu: 0.0.40
codegen_flags: <defaults>
</compile_context>

<pallas_src>
import functools
import numpy as np
import jax
import jax.numpy as jnp
from jax.experimental import pallas as pl
from jax.experimental.pallas import tpu as pltpu


def _agg_kernel(xp_ref, w1_ref, w2_ref, out_ref, *,
                WC_BLK, CG, K1, K2, S, Wp, off1, off2, dil):
    """One (batch, wc-group block, head) grid cell.

    xp_ref : (1, WC_BLK, CG, Hp*Wp)    zero-padded input, flattened spatial
    w1_ref : (1, 1, WC_BLK, K1*K1, S)  kernel-1 weights (TW padded to Wp, flat)
    w2_ref : (1, 1, WC_BLK, K2*K2, S)  kernel-2 weights
    out_ref: (1, 2, 1, WC_BLK, CG, S)
    """
    # Union of tap offsets of both kernels -> each shifted x window loaded once.
    taps = {}
    for kh in range(K1):
        for kw in range(K1):
            taps.setdefault((kh * dil + off1, kw * dil + off1),
                            []).append((0, kh * K1 + kw))
    for kh in range(K2):
        for kw in range(K2):
            taps.setdefault((kh * dil + off2, kw * dil + off2),
                            []).append((1, kh * K2 + kw))

    w_refs = (w1_ref, w2_ref)
    for wc in range(WC_BLK):                      # small, bounded unroll (<= 8)
        acc = [jnp.zeros((CG, S), jnp.float32),
               jnp.zeros((CG, S), jnp.float32)]
        for (r, c), uses in taps.items():
            start = r * Wp + c                    # static flat offset
            # Lane-dense (CG, S) shifted window, cast once, reused for both
            # kernel branches and all CG channels of this wc group.
            xs = xp_ref[0, wc, :, pl.ds(start, S)].astype(jnp.float32)
            for which, t in uses:
                wv = w_refs[which][0, 0, wc, t:t + 1, :].astype(jnp.float32)  # (1, S)
                acc[which] = acc[which] + wv * xs
        # One contiguous lane-dense store per (kernel, wc) group.
        out_ref[0, 0, 0, wc, :, :] = acc[0].astype(out_ref.dtype)
        out_ref[0, 1, 0, wc, :, :] = acc[1].astype(out_ref.dtype)


def local_convolution_mix_merge(x, weight, head_num, w_channels,
                                kernel_size1=3, kernel_size2=5,
                                stride=1, padding1=0, padding2=0, dilation=1):
    N, C, H, W = x.shape
    WH, WC, K1, K2, dil = head_num, w_channels, kernel_size1, kernel_size2, dilation
    assert C % WC == 0
    CG = C // WC
    assert weight.shape[0] == N
    assert weight.shape[1] == WH * WC * (K1 * K1 + K2 * K2)
    # TODO(synk): stride > 1 breaks the contiguous flat-window trick; would need
    # strided lane slices inside the kernel.
    assert stride == 1

    TH = (H + 2 * padding1 - (dil * (K1 - 1) + 1)) // stride + 1
    TW = (W + 2 * padding1 - (dil * (K1 - 1) + 1)) // stride + 1
    assert weight.shape[2] * weight.shape[3] == TH * TW

    pad_max = max(padding1, padding2)
    off1 = pad_max - padding1
    off2 = pad_max - padding2
    max_rs = max(dil * (K1 - 1) + off1, dil * (K2 - 1) + off2)

    # Row pitch Wp chosen so every tap window is a contiguous flat slice of
    # length TH*Wp (columns w >= TW are garbage and cropped afterwards).
    Wp = max(TW + max_rs, W + pad_max)
    Wp = ((Wp + 7) // 8) * 8
    Hp = max(TH + max_rs + 1, H + pad_max)
    S = TH * Wp
    HWp = Hp * Wp

    # Single shared padded input, channels regrouped by wc = c % WC.
    xg = x.reshape(N, CG, WC, H, W).transpose(0, 2, 1, 3, 4)   # (N, WC, CG, H, W)
    xp = jnp.pad(xg, ((0, 0), (0, 0), (0, 0),
                      (pad_max, Hp - H - pad_max),
                      (pad_max, Wp - W - pad_max)))
    xp = xp.reshape(N, WC, CG, HWp)

    # Split weight into the two kernel blocks, pad TW -> Wp, flatten spatial.
    wt = weight.reshape(N, WH * WC * (K1 * K1 + K2 * K2), TH, TW)
    w1 = wt[:, :WH * WC * K1 * K1].reshape(N, WH, WC, K1 * K1, TH, TW)
    w2 = wt[:, WH * WC * K1 * K1:].reshape(N, WH, WC, K2 * K2, TH, TW)
    spad = ((0, 0),) * 5 + ((0, Wp - TW),)
    w1 = jnp.pad(w1, spad).reshape(N, WH, WC, K1 * K1, S)
    w2 = jnp.pad(w2, spad).reshape(N, WH, WC, K2 * K2, S)

    # wc-group block size: divisor of WC, bounded in-kernel unroll, and
    # double-buffered blocks <= ~40 MiB (fits v7x's 64 MiB VMEM with headroom).
    itemsize = jnp.dtype(x.dtype).itemsize

    def blk_bytes(blk):
        xb = blk * CG * HWp
        wb = blk * (K1 * K1 + K2 * K2) * S
        ob = 2 * blk * CG * S
        return 2 * (xb + wb + ob) * itemsize      # x2: double buffering

    WC_BLK = 1
    for d in range(min(WC, 8), 0, -1):
        if WC % d == 0 and blk_bytes(d) <= 40 * 2 ** 20:
            WC_BLK = d
            break

    kernel = functools.partial(_agg_kernel, WC_BLK=WC_BLK, CG=CG, K1=K1, K2=K2,
                               S=S, Wp=Wp, off1=off1, off2=off2, dil=dil)

    cost = pl.CostEstimate(
        flops=2 * N * WH * C * (K1 * K1 + K2 * K2) * TH * TW,
        transcendentals=0,
        bytes_accessed=int((x.size + weight.size + N * 2 * WH * C * TH * TW)
                           * itemsize))

    out6 = pl.pallas_call(
        kernel,
        out_shape=jax.ShapeDtypeStruct((N, 2, WH, WC, CG, S), x.dtype),
        grid_spec=pltpu.PrefetchScalarGridSpec(
            num_scalar_prefetch=0,
            # head innermost: xp block index is unchanged across heads -> reused.
            grid=(N, WC // WC_BLK, WH),
            in_specs=[
                pl.BlockSpec((1, WC_BLK, CG, HWp),
                             lambda n, b, h: (n, b, 0, 0)),
                pl.BlockSpec((1, 1, WC_BLK, K1 * K1, S),
                             lambda n, b, h: (n, h, b, 0, 0)),
                pl.BlockSpec((1, 1, WC_BLK, K2 * K2, S),
                             lambda n, b, h: (n, h, b, 0, 0)),
            ],
            out_specs=pl.BlockSpec((1, 2, 1, WC_BLK, CG, S),
                                   lambda n, b, h: (n, 0, h, b, 0, 0)),
        ),
        compiler_params=pltpu.CompilerParams(
            dimension_semantics=("parallel", "parallel", "parallel"),
            vmem_limit_bytes=64 * 2 ** 20),
        cost_estimate=cost,
    )(xp, w1, w2)

    # Crop garbage columns and restore the CUDA channel order (kidx, head, c)
    # with c = cg*WC + wc.
    out = out6.reshape(N, 2, WH, WC, CG, TH, Wp)[..., :TW]
    out = out.transpose(0, 1, 2, 4, 3, 5, 6)       # (N, 2, WH, CG, WC, TH, TW)
    return out.reshape(N, 2 * WH * C, TH, TW)


class LocalConvolutionMixMerge:
    """JAX/Pallas port of the PyTorch module (forward only; no parameters)."""

    def __init__(self, in_channels, out_channels, head_num, w_channels,
                 kernel_size1, kernel_size2, stride=1, padding1=0, padding2=0,
                 dilation=1, pad_mode=0):
        self.in_channels = in_channels
        self.out_channels = out_channels
        self.head_num = head_num
        self.w_channels = w_channels
        self.kernel_size1 = kernel_size1
        self.kernel_size2 = kernel_size2
        self.stride = stride
        self.padding1 = padding1
        self.padding2 = padding2
        self.dilation = dilation
        self.pad_mode = pad_mode

    def __call__(self, x, weight):
        return local_convolution_mix_merge(
            x, weight, self.head_num, self.w_channels,
            self.kernel_size1, self.kernel_size2, self.stride,
            self.padding1, self.padding2, self.dilation)


def _reference(x, weight, WH, WC, K1, K2, stride, pad1, pad2, dil):
    """Faithful numpy re-implementation of the CUDA forward kernel."""
    x = np.asarray(x, np.float32)
    wt = np.asarray(weight, np.float32)
    N, C, H, W = x.shape
    TH = (H + 2 * pad1 - (dil * (K1 - 1) + 1)) // stride + 1
    TW = (W + 2 * pad1 - (dil * (K1 - 1) + 1)) // stride + 1
    wt = wt.reshape(N, -1, TH, TW)
    out = np.zeros((N, 2, WH, C, TH, TW), np.float32)
    hs = np.arange(TH) * stride
    ws = np.arange(TW) * stride
    for kidx, (K, pad, base) in enumerate(
            [(K1, pad1, 0), (K2, pad2, WH * WC * K1 * K1)]):
        for kh in range(K):
            for kw in range(K):
                hi = hs + kh * dil - pad
                wi = ws + kw * dil - pad
                mask = ((hi >= 0) & (hi < H))[:, None] & ((wi >= 0) & (wi < W))[None, :]
                hc = np.clip(hi, 0, H - 1)
                wc_ = np.clip(wi, 0, W - 1)
                xs = x[:, :, hc][:, :, :, wc_] * mask  # (N, C, TH, TW)
                for head in range(WH):
                    for c in range(C):
                        wch = base + (head * WC + c % WC) * K * K + kh * K + kw
                        out[:, kidx, head, c] += wt[:, wch] * xs[:, c]
    return out.reshape(N, 2 * WH * C, TH, TW)


if __name__ == "__main__":
    key = jax.random.PRNGKey(0)
    N, C, H, W = 2, 4, 16, 16
    WH, WC = 2, 2          # head_num, w_channels
    K1, K2 = 3, 5
    pad1, pad2 = 1, 2
    stride, dil = 1, 1
    TH = (H + 2 * pad1 - (dil * (K1 - 1) + 1)) // stride + 1
    TW = (W + 2 * pad1 - (dil * (K1 - 1) + 1)) // stride + 1

    kx, kw = jax.random.split(key)
    x = jax.random.normal(kx, (N, C, H, W), jnp.float32)
    weight = jax.random.normal(
        kw, (N, WH * WC * (K1 * K1 + K2 * K2), TH, TW), jnp.float32)

    mod = LocalConvolutionMixMerge(
        in_channels=C, out_channels=2 * WH * C, head_num=WH, w_channels=WC,
        kernel_size1=K1, kernel_size2=K2, stride=stride,
        padding1=pad1, padding2=pad2, dilation=dil)

    out = jax.block_until_ready(mod(x, weight))

    ref = _reference(x, weight, WH, WC, K1, K2, stride, pad1, pad2, dil)
    assert out.shape == (N, 2 * WH * C, TH, TW), out.shape
    np.testing.assert_allclose(np.asarray(out), ref, rtol=1e-4, atol=1e-4)
    print("KERNEL_OK")
</pallas_src>

<mosaic_0001>
module attributes {stable_mosaic.version = 11 : i64} {
  func.func @_agg_kernel(%arg0: i32, %arg1: i32, %arg2: i32, %arg3: memref<1x2x2x504xf32, #tpu.memory_space<vmem>>, %arg4: memref<1x1x2x9x384xf32, #tpu.memory_space<vmem>>, %arg5: memref<1x1x2x25x384xf32, #tpu.memory_space<vmem>>, %arg6: memref<1x2x1x2x2x384xf32, #tpu.memory_space<vmem>>) attributes {dimension_semantics = [#tpu.dimension_semantics<parallel>, #tpu.dimension_semantics<parallel>, #tpu.dimension_semantics<parallel>], iteration_bounds = array<i64: 2, 1, 2>, scalar_prefetch = 0 : i64, scratch_operands = 0 : i64, tpu.core_type = #tpu.core_type<tc>, window_params = [{transform_indices = @transform_0, window_bounds = array<i64: 1, 2, 2, 504>}, {transform_indices = @transform_1, window_bounds = array<i64: 1, 1, 2, 9, 384>}, {transform_indices = @transform_2, window_bounds = array<i64: 1, 1, 2, 25, 384>}, {transform_indices = @transform_3, window_bounds = array<i64: 1, 2, 1, 2, 2, 384>}]} {
    %cst = arith.constant 0.000000e+00 : f32
    %0 = vector.broadcast %cst : f32 to vector<2x384xf32>
    %cst_0 = arith.constant 0.000000e+00 : f32
    %1 = vector.broadcast %cst_0 : f32 to vector<2x384xf32>
    %c0 = arith.constant 0 : index
    %c0_1 = arith.constant 0 : index
    %c0_2 = arith.constant 0 : index
    %c25 = arith.constant 25 : index
    %2 = vector.load %arg3[%c0, %c0_1, %c0_2, %c25] : memref<1x2x2x504xf32, #tpu.memory_space<vmem>>, vector<1x1x2x384xf32>
    %3 = vector.shape_cast %2 : vector<1x1x2x384xf32> to vector<2x384xf32>
    %c0_3 = arith.constant 0 : index
    %c0_4 = arith.constant 0 : index
    %c0_5 = arith.constant 0 : index
    %c0_6 = arith.constant 0 : index
    %c0_7 = arith.constant 0 : index
    %4 = vector.load %arg4[%c0_3, %c0_4, %c0_5, %c0_6, %c0_7] : memref<1x1x2x9x384xf32, #tpu.memory_space<vmem>>, vector<1x1x1x1x384xf32>
    %5 = vector.shape_cast %4 : vector<1x1x1x1x384xf32> to vector<1x384xf32>
    %6 = vector.broadcast %5 : vector<1x384xf32> to vector<2x384xf32>
    %7 = arith.mulf %6, %3 : vector<2x384xf32>
    %8 = arith.addf %0, %7 : vector<2x384xf32>
    %c0_8 = arith.constant 0 : index
    %c0_9 = arith.constant 0 : index
    %c0_10 = arith.constant 0 : index
    %c6 = arith.constant 6 : index
    %c0_11 = arith.constant 0 : index
    %9 = vector.load %arg5[%c0_8, %c0_9, %c0_10, %c6, %c0_11] : memref<1x1x2x25x384xf32, #tpu.memory_space<vmem>>, vector<1x1x1x1x384xf32>
    %10 = vector.shape_cast %9 : vector<1x1x1x1x384xf32> to vector<1x384xf32>
    %11 = vector.broadcast %10 : vector<1x384xf32> to vector<2x384xf32>
    %12 = arith.mulf %11, %3 : vector<2x384xf32>
    %13 = arith.addf %1, %12 : vector<2x384xf32>
    %c0_12 = arith.constant 0 : index
    %c0_13 = arith.constant 0 : index
    %c0_14 = arith.constant 0 : index
    %c26 = arith.constant 26 : index
    %14 = vector.load %arg3[%c0_12, %c0_13, %c0_14, %c26] : memref<1x2x2x504xf32, #tpu.memory_space<vmem>>, vector<1x1x2x384xf32>
    %15 = vector.shape_cast %14 : vector<1x1x2x384xf32> to vector<2x384xf32>
    %c0_15 = arith.constant 0 : index
    %c0_16 = arith.constant 0 : index
    %c0_17 = arith.constant 0 : index
    %c1 = arith.constant 1 : index
    %c0_18 = arith.constant 0 : index
    %16 = vector.load %arg4[%c0_15, %c0_16, %c0_17, %c1, %c0_18] : memref<1x1x2x9x384xf32, #tpu.memory_space<vmem>>, vector<1x1x1x1x384xf32>
    %17 = vector.shape_cast %16 : vector<1x1x1x1x384xf32> to vector<1x384xf32>
    %18 = vector.broadcast %17 : vector<1x384xf32> to vector<2x384xf32>
    %19 = arith.mulf %18, %15 : vector<2x384xf32>
    %20 = arith.addf %8, %19 : vector<2x384xf32>
    %c0_19 = arith.constant 0 : index
    %c0_20 = arith.constant 0 : index
    %c0_21 = arith.constant 0 : index
    %c7 = arith.constant 7 : index
    %c0_22 = arith.constant 0 : index
    %21 = vector.load %arg5[%c0_19, %c0_20, %c0_21, %c7, %c0_22] : memref<1x1x2x25x384xf32, #tpu.memory_space<vmem>>, vector<1x1x1x1x384xf32>
    %22 = vector.shape_cast %21 : vector<1x1x1x1x384xf32> to vector<1x384xf32>
    %23 = vector.broadcast %22 : vector<1x384xf32> to vector<2x384xf32>
    %24 = arith.mulf %23, %15 : vector<2x384xf32>
    %25 = arith.addf %13, %24 : vector<2x384xf32>
    %c0_23 = arith.constant 0 : index
    %c0_24 = arith.constant 0 : index
    %c0_25 = arith.constant 0 : index
    %c27 = arith.constant 27 : index
    %26 = vector.load %arg3[%c0_23, %c0_24, %c0_25, %c27] : memref<1x2x2x504xf32, #tpu.memory_space<vmem>>, vector<1x1x2x384xf32>
    %27 = vector.shape_cast %26 : vector<1x1x2x384xf32> to vector<2x384xf32>
    %c0_26 = arith.constant 0 : index
    %c0_27 = arith.constant 0 : index
    %c0_28 = arith.constant 0 : index
    %c2 = arith.constant 2 : index
    %c0_29 = arith.constant 0 : index
    %28 = vector.load %arg4[%c0_26, %c0_27, %c0_28, %c2, %c0_29] : memref<1x1x2x9x384xf32, #tpu.memory_space<vmem>>, vector<1x1x1x1x384xf32>
    %29 = vector.shape_cast %28 : vector<1x1x1x1x384xf32> to vector<1x384xf32>
    %30 = vector.broadcast %29 : vector<1x384xf32> to vector<2x384xf32>
    %31 = arith.mulf %30, %27 : vector<2x384xf32>
    %32 = arith.addf %20, %31 : vector<2x384xf32>
    %c0_30 = arith.constant 0 : index
    %c0_31 = arith.constant 0 : index
    %c0_32 = arith.constant 0 : index
    %c8 = arith.constant 8 : index
    %c0_33 = arith.constant 0 : index
    %33 = vector.load %arg5[%c0_30, %c0_31, %c0_32, %c8, %c0_33] : memref<1x1x2x25x384xf32, #tpu.memory_space<vmem>>, vector<1x1x1x1x384xf32>
    %34 = vector.shape_cast %33 : vector<1x1x1x1x384xf32> to vector<1x384xf32>
    %35 = vector.broadcast %34 : vector<1x384xf32> to vector<2x384xf32>
    %36 = arith.mulf %35, %27 : vector<2x384xf32>
    %37 = arith.addf %25, %36 : vector<2x384xf32>
    %c0_34 = arith.constant 0 : index
    %c0_35 = arith.constant 0 : index
    %c0_36 = arith.constant 0 : index
    %c49 = arith.constant 49 : index
    %38 = vector.load %arg3[%c0_34, %c0_35, %c0_36, %c49] : memref<1x2x2x504xf32, #tpu.memory_space<vmem>>, vector<1x1x2x384xf32>
    %39 = vector.shape_cast %38 : vector<1x1x2x384xf32> to vector<2x384xf32>
    %c0_37 = arith.constant 0 : index
    %c0_38 = arith.constant 0 : index
    %c0_39 = arith.constant 0 : index
    %c3 = arith.constant 3 : index
    %c0_40 = arith.constant 0 : index
    %40 = vector.load %arg4[%c0_37, %c0_38, %c0_39, %c3, %c0_40] : memref<1x1x2x9x384xf32, #tpu.memory_space<vmem>>, vector<1x1x1x1x384xf32>
    %41 = vector.shape_cast %40 : vector<1x1x1x1x384xf32> to vector<1x384xf32>
    %42 = vector.broadcast %41 : vector<1x384xf32> to vector<2x384xf32>
    %43 = arith.mulf %42, %39 : vector<2x384xf32>
    %44 = arith.addf %32, %43 : vector<2x384xf32>
    %c0_41 = arith.constant 0 : index
    %c0_42 = arith.constant 0 : index
    %c0_43 = arith.constant 0 : index
    %c11 = arith.constant 11 : index
    %c0_44 = arith.constant 0 : index
    %45 = vector.load %arg5[%c0_41, %c0_42, %c0_43, %c11, %c0_44] : memref<1x1x2x25x384xf32, #tpu.memory_space<vmem>>, vector<1x1x1x1x384xf32>
    %46 = vector.shape_cast %45 : vector<1x1x1x1x384xf32> to vector<1x384xf32>
    %47 = vector.broadcast %46 : vector<1x384xf32> to vector<2x384xf32>
    %48 = arith.mulf %47, %39 : vector<2x384xf32>
    %49 = arith.addf %37, %48 : vector<2x384xf32>
    %c0_45 = arith.constant 0 : index
    %c0_46 = arith.constant 0 : index
    %c0_47 = arith.constant 0 : index
    %c50 = arith.constant 50 : index
    %50 = vector.load %arg3[%c0_45, %c0_46, %c0_47, %c50] : memref<1x2x2x504xf32, #tpu.memory_space<vmem>>, vector<1x1x2x384xf32>
    %51 = vector.shape_cast %50 : vector<1x1x2x384xf32> to vector<2x384xf32>
    %c0_48 = arith.constant 0 : index
    %c0_49 = arith.constant 0 : index
    %c0_50 = arith.constant 0 : index
    %c4 = arith.constant 4 : index
    %c0_51 = arith.constant 0 : index
    %52 = vector.load %arg4[%c0_48, %c0_49, %c0_50, %c4, %c0_51] : memref<1x1x2x9x384xf32, #tpu.memory_space<vmem>>, vector<1x1x1x1x384xf32>
    %53 = vector.shape_cast %52 : vector<1x1x1x1x384xf32> to vector<1x384xf32>
    %54 = vector.broadcast %53 : vector<1x384xf32> to vector<2x384xf32>
    %55 = arith.mulf %54, %51 : vector<2x384xf32>
    %56 = arith.addf %44, %55 : vector<2x384xf32>
    %c0_52 = arith.constant 0 : index
    %c0_53 = arith.constant 0 : index
    %c0_54 = arith.constant 0 : index
    %c12 = arith.constant 12 : index
    %c0_55 = arith.constant 0 : index
    %57 = vector.load %arg5[%c0_52, %c0_53, %c0_54, %c12, %c0_55] : memref<1x1x2x25x384xf32, #tpu.memory_space<vmem>>, vector<1x1x1x1x384xf32>
    %58 = vector.shape_cast %57 : vector<1x1x1x1x384xf32> to vector<1x384xf32>
    %59 = vector.broadcast %58 : vector<1x384xf32> to vector<2x384xf32>
    %60 = arith.mulf %59, %51 : vector<2x384xf32>
    %61 = arith.addf %49, %60 : vector<2x384xf32>
    %c0_56 = arith.constant 0 : index
    %c0_57 = arith.constant 0 : index
    %c0_58 = arith.constant 0 : index
    %c51 = arith.constant 51 : index
    %62 = vector.load %arg3[%c0_56, %c0_57, %c0_58, %c51] : memref<1x2x2x504xf32, #tpu.memory_space<vmem>>, vector<1x1x2x384xf32>
    %63 = vector.shape_cast %62 : vector<1x1x2x384xf32> to vector<2x384xf32>
    %c0_59 = arith.constant 0 : index
    %c0_60 = arith.constant 0 : index
    %c0_61 = arith.constant 0 : index
    %c5 = arith.constant 5 : index
    %c0_62 = arith.constant 0 : index
    %64 = vector.load %arg4[%c0_59, %c0_60, %c0_61, %c5, %c0_62] : memref<1x1x2x9x384xf32, #tpu.memory_space<vmem>>, vector<1x1x1x1x384xf32>
    %65 = vector.shape_cast %64 : vector<1x1x1x1x384xf32> to vector<1x384xf32>
    %66 = vector.broadcast %65 : vector<1x384xf32> to vector<2x384xf32>
    %67 = arith.mulf %66, %63 : vector<2x384xf32>
    %68 = arith.addf %56, %67 : vector<2x384xf32>
    %c0_63 = arith.constant 0 : index
    %c0_64 = arith.constant 0 : index
    %c0_65 = arith.constant 0 : index
    %c13 = arith.constant 13 : index
    %c0_66 = arith.constant 0 : index
    %69 = vector.load %arg5[%c0_63, %c0_64, %c0_65, %c13, %c0_66] : memref<1x1x2x25x384xf32, #tpu.memory_space<vmem>>, vector<1x1x1x1x384xf32>
    %70 = vector.shape_cast %69 : vector<1x1x1x1x384xf32> to vector<1x384xf32>
    %71 = vector.broadcast %70 : vector<1x384xf32> to vector<2x384xf32>
    %72 = arith.mulf %71, %63 : vector<2x384xf32>
    %73 = arith.addf %61, %72 : vector<2x384xf32>
    %c0_67 = arith.constant 0 : index
    %c0_68 = arith.constant 0 : index
    %c0_69 = arith.constant 0 : index
    %c73 = arith.constant 73 : index
    %74 = vector.load %arg3[%c0_67, %c0_68, %c0_69, %c73] : memref<1x2x2x504xf32, #tpu.memory_space<vmem>>, vector<1x1x2x384xf32>
    %75 = vector.shape_cast %74 : vector<1x1x2x384xf32> to vector<2x384xf32>
    %c0_70 = arith.constant 0 : index
    %c0_71 = arith.constant 0 : index
    %c0_72 = arith.constant 0 : index
    %c6_73 = arith.constant 6 : index
    %c0_74 = arith.constant 0 : index
    %76 = vector.load %arg4[%c0_70, %c0_71, %c0_72, %c6_73, %c0_74] : memref<1x1x2x9x384xf32, #tpu.memory_space<vmem>>, vector<1x1x1x1x384xf32>
    %77 = vector.shape_cast %76 : vector<1x1x1x1x384xf32> to vector<1x384xf32>
    %78 = vector.broadcast %77 : vector<1x384xf32> to vector<2x384xf32>
    %79 = arith.mulf %78, %75 : vector<2x384xf32>
    %80 = arith.addf %68, %79 : vector<2x384xf32>
    %c0_75 = arith.constant 0 : index
    %c0_76 = arith.constant 0 : index
    %c0_77 = arith.constant 0 : index
    %c16 = arith.constant 16 : index
    %c0_78 = arith.constant 0 : index
    %81 = vector.load %arg5[%c0_75, %c0_76, %c0_77, %c16, %c0_78] : memref<1x1x2x25x384xf32, #tpu.memory_space<vmem>>, vector<1x1x1x1x384xf32>
    %82 = vector.shape_cast %81 : vector<1x1x1x1x384xf32> to vector<1x384xf32>
    %83 = vector.broadcast %82 : vector<1x384xf32> to vector<2x384xf32>
    %84 = arith.mulf %83, %75 : vector<2x384xf32>
    %85 = arith.addf %73, %84 : vector<2x384xf32>
    %c0_79 = arith.constant 0 : index
    %c0_80 = arith.constant 0 : index
    %c0_81 = arith.constant 0 : index
    %c74 = arith.constant 74 : index
    %86 = vector.load %arg3[%c0_79, %c0_80, %c0_81, %c74] : memref<1x2x2x504xf32, #tpu.memory_space<vmem>>, vector<1x1x2x384xf32>
    %87 = vector.shape_cast %86 : vector<1x1x2x384xf32> to vector<2x384xf32>
    %c0_82 = arith.constant 0 : index
    %c0_83 = arith.constant 0 : index
    %c0_84 = arith.constant 0 : index
    %c7_85 = arith.constant 7 : index
    %c0_86 = arith.constant 0 : index
    %88 = vector.load %arg4[%c0_82, %c0_83, %c0_84, %c7_85, %c0_86] : memref<1x1x2x9x384xf32, #tpu.memory_space<vmem>>, vector<1x1x1x1x384xf32>
    %89 = vector.shape_cast %88 : vector<1x1x1x1x384xf32> to vector<1x384xf32>
    %90 = vector.broadcast %89 : vector<1x384xf32> to vector<2x384xf32>
    %91 = arith.mulf %90, %87 : vector<2x384xf32>
    %92 = arith.addf %80, %91 : vector<2x384xf32>
    %c0_87 = arith.constant 0 : index
    %c0_88 = arith.constant 0 : index
    %c0_89 = arith.constant 0 : index
    %c17 = arith.constant 17 : index
    %c0_90 = arith.constant 0 : index
    %93 = vector.load %arg5[%c0_87, %c0_88, %c0_89, %c17, %c0_90] : memref<1x1x2x25x384xf32, #tpu.memory_space<vmem>>, vector<1x1x1x1x384xf32>
    %94 = vector.shape_cast %93 : vector<1x1x1x1x384xf32> to vector<1x384xf32>
    %95 = vector.broadcast %94 : vector<1x384xf32> to vector<2x384xf32>
    %96 = arith.mulf %95, %87 : vector<2x384xf32>
    %97 = arith.addf %85, %96 : vector<2x384xf32>
    %c0_91 = arith.constant 0 : index
    %c0_92 = arith.constant 0 : index
    %c0_93 = arith.constant 0 : index
    %c75 = arith.constant 75 : index
    %98 = vector.load %arg3[%c0_91, %c0_92, %c0_93, %c75] : memref<1x2x2x504xf32, #tpu.memory_space<vmem>>, vector<1x1x2x384xf32>
    %99 = vector.shape_cast %98 : vector<1x1x2x384xf32> to vector<2x384xf32>
    %c0_94 = arith.constant 0 : index
    %c0_95 = arith.constant 0 : index
    %c0_96 = arith.constant 0 : index
    %c8_97 = arith.constant 8 : index
    %c0_98 = arith.constant 0 : index
    %100 = vector.load %arg4[%c0_94, %c0_95, %c0_96, %c8_97, %c0_98] : memref<1x1x2x9x384xf32, #tpu.memory_space<vmem>>, vector<1x1x1x1x384xf32>
    %101 = vector.shape_cast %100 : vector<1x1x1x1x384xf32> to vector<1x384xf32>
    %102 = vector.broadcast %101 : vector<1x384xf32> to vector<2x384xf32>
    %103 = arith.mulf %102, %99 : vector<2x384xf32>
    %104 = arith.addf %92, %103 : vector<2x384xf32>
    %c0_99 = arith.constant 0 : index
    %c0_100 = arith.constant 0 : index
    %c0_101 = arith.constant 0 : index
    %c18 = arith.constant 18 : index
    %c0_102 = arith.constant 0 : index
    %105 = vector.load %arg5[%c0_99, %c0_100, %c0_101, %c18, %c0_102] : memref<1x1x2x25x384xf32, #tpu.memory_space<vmem>>, vector<1x1x1x1x384xf32>
    %106 = vector.shape_cast %105 : vector<1x1x1x1x384xf32> to vector<1x384xf32>
    %107 = vector.broadcast %106 : vector<1x384xf32> to vector<2x384xf32>
    %108 = arith.mulf %107, %99 : vector<2x384xf32>
    %109 = arith.addf %97, %108 : vector<2x384xf32>
    %c0_103 = arith.constant 0 : index
    %c0_104 = arith.constant 0 : index
    %c0_105 = arith.constant 0 : index
    %c0_106 = arith.constant 0 : index
    %110 = vector.load %arg3[%c0_103, %c0_104, %c0_105, %c0_106] : memref<1x2x2x504xf32, #tpu.memory_space<vmem>>, vector<1x1x2x384xf32>
    %111 = vector.shape_cast %110 : vector<1x1x2x384xf32> to vector<2x384xf32>
    %c0_107 = arith.constant 0 : index
    %c0_108 = arith.constant 0 : index
    %c0_109 = arith.constant 0 : index
    %c0_110 = arith.constant 0 : index
    %c0_111 = arith.constant 0 : index
    %112 = vector.load %arg5[%c0_107, %c0_108, %c0_109, %c0_110, %c0_111] : memref<1x1x2x25x384xf32, #tpu.memory_space<vmem>>, vector<1x1x1x1x384xf32>
    %113 = vector.shape_cast %112 : vector<1x1x1x1x384xf32> to vector<1x384xf32>
    %114 = vector.broadcast %113 : vector<1x384xf32> to vector<2x384xf32>
    %115 = arith.mulf %114, %111 : vector<2x384xf32>
    %116 = arith.addf %109, %115 : vector<2x384xf32>
    %c0_112 = arith.constant 0 : index
    %c0_113 = arith.constant 0 : index
    %c0_114 = arith.constant 0 : index
    %c1_115 = arith.constant 1 : index
    %117 = vector.load %arg3[%c0_112, %c0_113, %c0_114, %c1_115] : memref<1x2x2x504xf32, #tpu.memory_space<vmem>>, vector<1x1x2x384xf32>
    %118 = vector.shape_cast %117 : vector<1x1x2x384xf32> to vector<2x384xf32>
    %c0_116 = arith.constant 0 : index
    %c0_117 = arith.constant 0 : index
    %c0_118 = arith.constant 0 : index
    %c1_119 = arith.constant 1 : index
    %c0_120 = arith.constant 0 : index
    %119 = vector.load %arg5[%c0_116, %c0_117, %c0_118, %c1_119, %c0_120] : memref<1x1x2x25x384xf32, #tpu.memory_space<vmem>>, vector<1x1x1x1x384xf32>
    %120 = vector.shape_cast %119 : vector<1x1x1x1x384xf32> to vector<1x384xf32>
    %121 = vector.broadcast %120 : vector<1x384xf32> to vector<2x384xf32>
    %122 = arith.mulf %121, %118 : vector<2x384xf32>
    %123 = arith.addf %116, %122 : vector<2x384xf32>
    %c0_121 = arith.constant 0 : index
    %c0_122 = arith.constant 0 : index
    %c0_123 = arith.constant 0 : index
    %c2_124 = arith.constant 2 : index
    %124 = vector.load %arg3[%c0_121, %c0_122, %c0_123, %c2_124] : memref<1x2x2x504xf32, #tpu.memory_space<vmem>>, vector<1x1x2x384xf32>
    %125 = vector.shape_cast %124 : vector<1x1x2x384xf32> to vector<2x384xf32>
    %c0_125 = arith.constant 0 : index
    %c0_126 = arith.constant 0 : index
    %c0_127 = arith.constant 0 : index
    %c2_128 = arith.constant 2 : index
    %c0_129 = arith.constant 0 : index
    %126 = vector.load %arg5[%c0_125, %c0_126, %c0_127, %c2_128, %c0_129] : memref<1x1x2x25x384xf32, #tpu.memory_space<vmem>>, vector<1x1x1x1x384xf32>
    %127 = vector.shape_cast %126 : vector<1x1x1x1x384xf32> to vector<1x384xf32>
    %128 = vector.broadcast %127 : vector<1x384xf32> to vector<2x384xf32>
    %129 = arith.mulf %128, %125 : vector<2x384xf32>
    %130 = arith.addf %123, %129 : vector<2x384xf32>
    %c0_130 = arith.constant 0 : index
    %c0_131 = arith.constant 0 : index
    %c0_132 = arith.constant 0 : index
    %c3_133 = arith.constant 3 : index
    %131 = vector.load %arg3[%c0_130, %c0_131, %c0_132, %c3_133] : memref<1x2x2x504xf32, #tpu.memory_space<vmem>>, vector<1x1x2x384xf32>
    %132 = vector.shape_cast %131 : vector<1x1x2x384xf32> to vector<2x384xf32>
    %c0_134 = arith.constant 0 : index
    %c0_135 = arith.constant 0 : index
    %c0_136 = arith.constant 0 : index
    %c3_137 = arith.constant 3 : index
    %c0_138 = arith.constant 0 : index
    %133 = vector.load %arg5[%c0_134, %c0_135, %c0_136, %c3_137, %c0_138] : memref<1x1x2x25x384xf32, #tpu.memory_space<vmem>>, vector<1x1x1x1x384xf32>
    %134 = vector.shape_cast %133 : vector<1x1x1x1x384xf32> to vector<1x384xf32>
    %135 = vector.broadcast %134 : vector<1x384xf32> to vector<2x384xf32>
    %136 = arith.mulf %135, %132 : vector<2x384xf32>
    %137 = arith.addf %130, %136 : vector<2x384xf32>
    %c0_139 = arith.constant 0 : index
    %c0_140 = arith.constant 0 : index
    %c0_141 = arith.constant 0 : index
    %c4_142 = arith.constant 4 : index
    %138 = vector.load %arg3[%c0_139, %c0_140, %c0_141, %c4_142] : memref<1x2x2x504xf32, #tpu.memory_space<vmem>>, vector<1x1x2x384xf32>
    %139 = vector.shape_cast %138 : vector<1x1x2x384xf32> to vector<2x384xf32>
    %c0_143 = arith.constant 0 : index
    %c0_144 = arith.constant 0 : index
    %c0_145 = arith.constant 0 : index
    %c4_146 = arith.constant 4 : index
    %c0_147 = arith.constant 0 : index
    %140 = vector.load %arg5[%c0_143, %c0_144, %c0_145, %c4_146, %c0_147] : memref<1x1x2x25x384xf32, #tpu.memory_space<vmem>>, vector<1x1x1x1x384xf32>
    %141 = vector.shape_cast %140 : vector<1x1x1x1x384xf32> to vector<1x384xf32>
    %142 = vector.broadcast %141 : vector<1x384xf32> to vector<2x384xf32>
    %143 = arith.mulf %142, %139 : vector<2x384xf32>
    %144 = arith.addf %137, %143 : vector<2x384xf32>
    %c0_148 = arith.constant 0 : index
    %c0_149 = arith.constant 0 : index
    %c0_150 = arith.constant 0 : index
    %c24 = arith.constant 24 : index
    %145 = vector.load %arg3[%c0_148, %c0_149, %c0_150, %c24] : memref<1x2x2x504xf32, #tpu.memory_space<vmem>>, vector<1x1x2x384xf32>
    %146 = vector.shape_cast %145 : vector<1x1x2x384xf32> to vector<2x384xf32>
    %c0_151 = arith.constant 0 : index
    %c0_152 = arith.constant 0 : index
    %c0_153 = arith.constant 0 : index
    %c5_154 = arith.constant 5 : index
    %c0_155 = arith.constant 0 : index
    %147 = vector.load %arg5[%c0_151, %c0_152, %c0_153, %c5_154, %c0_155] : memref<1x1x2x25x384xf32, #tpu.memory_space<vmem>>, vector<1x1x1x1x384xf32>
    %148 = vector.shape_cast %147 : vector<1x1x1x1x384xf32> to vector<1x384xf32>
    %149 = vector.broadcast %148 : vector<1x384xf32> to vector<2x384xf32>
    %150 = arith.mulf %149, %146 : vector<2x384xf32>
    %151 = arith.addf %144, %150 : vector<2x384xf32>
    %c0_156 = arith.constant 0 : index
    %c0_157 = arith.constant 0 : index
    %c0_158 = arith.constant 0 : index
    %c28 = arith.constant 28 : index
    %152 = vector.load %arg3[%c0_156, %c0_157, %c0_158, %c28] : memref<1x2x2x504xf32, #tpu.memory_space<vmem>>, vector<1x1x2x384xf32>
    %153 = vector.shape_cast %152 : vector<1x1x2x384xf32> to vector<2x384xf32>
    %c0_159 = arith.constant 0 : index
    %c0_160 = arith.constant 0 : index
    %c0_161 = arith.constant 0 : index
    %c9 = arith.constant 9 : index
    %c0_162 = arith.constant 0 : index
    %154 = vector.load %arg5[%c0_159, %c0_160, %c0_161, %c9, %c0_162] : memref<1x1x2x25x384xf32, #tpu.memory_space<vmem>>, vector<1x1x1x1x384xf32>
    %155 = vector.shape_cast %154 : vector<1x1x1x1x384xf32> to vector<1x384xf32>
    %156 = vector.broadcast %155 : vector<1x384xf32> to vector<2x384xf32>
    %157 = arith.mulf %156, %153 : vector<2x384xf32>
    %158 = arith.addf %151, %157 : vector<2x384xf32>
    %c0_163 = arith.constant 0 : index
    %c0_164 = arith.constant 0 : index
    %c0_165 = arith.constant 0 : index
    %c48 = arith.constant 48 : index
    %159 = vector.load %arg3[%c0_163, %c0_164, %c0_165, %c48] : memref<1x2x2x504xf32, #tpu.memory_space<vmem>>, vector<1x1x2x384xf32>
    %160 = vector.shape_cast %159 : vector<1x1x2x384xf32> to vector<2x384xf32>
    %c0_166 = arith.constant 0 : index
    %c0_167 = arith.constant 0 : index
    %c0_168 = arith.constant 0 : index
    %c10 = arith.constant 10 : index
    %c0_169 = arith.constant 0 : index
    %161 = vector.load %arg5[%c0_166, %c0_167, %c0_168, %c10, %c0_169] : memref<1x1x2x25x384xf32, #tpu.memory_space<vmem>>, vector<1x1x1x1x384xf32>
    %162 = vector.shape_cast %161 : vector<1x1x1x1x384xf32> to vector<1x384xf32>
    %163 = vector.broadcast %162 : vector<1x384xf32> to vector<2x384xf32>
    %164 = arith.mulf %163, %160 : vector<2x384xf32>
    %165 = arith.addf %158, %164 : vector<2x384xf32>
    %c0_170 = arith.constant 0 : index
    %c0_171 = arith.constant 0 : index
    %c0_172 = arith.constant 0 : index
    %c52 = arith.constant 52 : index
    %166 = vector.load %arg3[%c0_170, %c0_171, %c0_172, %c52] : memref<1x2x2x504xf32, #tpu.memory_space<vmem>>, vector<1x1x2x384xf32>
    %167 = vector.shape_cast %166 : vector<1x1x2x384xf32> to vector<2x384xf32>
    %c0_173 = arith.constant 0 : index
    %c0_174 = arith.constant 0 : index
    %c0_175 = arith.constant 0 : index
    %c14 = arith.constant 14 : index
    %c0_176 = arith.constant 0 : index
    %168 = vector.load %arg5[%c0_173, %c0_174, %c0_175, %c14, %c0_176] : memref<1x1x2x25x384xf32, #tpu.memory_space<vmem>>, vector<1x1x1x1x384xf32>
    %169 = vector.shape_cast %168 : vector<1x1x1x1x384xf32> to vector<1x384xf32>
    %170 = vector.broadcast %169 : vector<1x384xf32> to vector<2x384xf32>
    %171 = arith.mulf %170, %167 : vector<2x384xf32>
    %172 = arith.addf %165, %171 : vector<2x384xf32>
    %c0_177 = arith.constant 0 : index
    %c0_178 = arith.constant 0 : index
    %c0_179 = arith.constant 0 : index
    %c72 = arith.constant 72 : index
    %173 = vector.load %arg3[%c0_177, %c0_178, %c0_179, %c72] : memref<1x2x2x504xf32, #tpu.memory_space<vmem>>, vector<1x1x2x384xf32>
    %174 = vector.shape_cast %173 : vector<1x1x2x384xf32> to vector<2x384xf32>
    %c0_180 = arith.constant 0 : index
    %c0_181 = arith.constant 0 : index
    %c0_182 = arith.constant 0 : index
    %c15 = arith.constant 15 : index
    %c0_183 = arith.constant 0 : index
    %175 = vector.load %arg5[%c0_180, %c0_181, %c0_182, %c15, %c0_183] : memref<1x1x2x25x384xf32, #tpu.memory_space<vmem>>, vector<1x1x1x1x384xf32>
    %176 = vector.shape_cast %175 : vector<1x1x1x1x384xf32> to vector<1x384xf32>
    %177 = vector.broadcast %176 : vector<1x384xf32> to vector<2x384xf32>
    %178 = arith.mulf %177, %174 : vector<2x384xf32>
    %179 = arith.addf %172, %178 : vector<2x384xf32>
    %c0_184 = arith.constant 0 : index
    %c0_185 = arith.constant 0 : index
    %c0_186 = arith.constant 0 : index
    %c76 = arith.constant 76 : index
    %180 = vector.load %arg3[%c0_184, %c0_185, %c0_186, %c76] : memref<1x2x2x504xf32, #tpu.memory_space<vmem>>, vector<1x1x2x384xf32>
    %181 = vector.shape_cast %180 : vector<1x1x2x384xf32> to vector<2x384xf32>
    %c0_187 = arith.constant 0 : index
    %c0_188 = arith.constant 0 : index
    %c0_189 = arith.constant 0 : index
    %c19 = arith.constant 19 : index
    %c0_190 = arith.constant 0 : index
    %182 = vector.load %arg5[%c0_187, %c0_188, %c0_189, %c19, %c0_190] : memref<1x1x2x25x384xf32, #tpu.memory_space<vmem>>, vector<1x1x1x1x384xf32>
    %183 = vector.shape_cast %182 : vector<1x1x1x1x384xf32> to vector<1x384xf32>
    %184 = vector.broadcast %183 : vector<1x384xf32> to vector<2x384xf32>
    %185 = arith.mulf %184, %181 : vector<2x384xf32>
    %186 = arith.addf %179, %185 : vector<2x384xf32>
    %c0_191 = arith.constant 0 : index
    %c0_192 = arith.constant 0 : index
    %c0_193 = arith.constant 0 : index
    %c96 = arith.constant 96 : index
    %187 = vector.load %arg3[%c0_191, %c0_192, %c0_193, %c96] : memref<1x2x2x504xf32, #tpu.memory_space<vmem>>, vector<1x1x2x384xf32>
    %188 = vector.shape_cast %187 : vector<1x1x2x384xf32> to vector<2x384xf32>
    %c0_194 = arith.constant 0 : index
    %c0_195 = arith.constant 0 : index
    %c0_196 = arith.constant 0 : index
    %c20 = arith.constant 20 : index
    %c0_197 = arith.constant 0 : index
    %189 = vector.load %arg5[%c0_194, %c0_195, %c0_196, %c20, %c0_197] : memref<1x1x2x25x384xf32, #tpu.memory_space<vmem>>, vector<1x1x1x1x384xf32>
    %190 = vector.shape_cast %189 : vector<1x1x1x1x384xf32> to vector<1x384xf32>
    %191 = vector.broadcast %190 : vector<1x384xf32> to vector<2x384xf32>
    %192 = arith.mulf %191, %188 : vector<2x384xf32>
    %193 = arith.addf %186, %192 : vector<2x384xf32>
    %c0_198 = arith.constant 0 : index
    %c0_199 = arith.constant 0 : index
    %c0_200 = arith.constant 0 : index
    %c97 = arith.constant 97 : index
    %194 = vector.load %arg3[%c0_198, %c0_199, %c0_200, %c97] : memref<1x2x2x504xf32, #tpu.memory_space<vmem>>, vector<1x1x2x384xf32>
    %195 = vector.shape_cast %194 : vector<1x1x2x384xf32> to vector<2x384xf32>
    %c0_201 = arith.constant 0 : index
    %c0_202 = arith.constant 0 : index
    %c0_203 = arith.constant 0 : index
    %c21 = arith.constant 21 : index
    %c0_204 = arith.constant 0 : index
    %196 = vector.load %arg5[%c0_201, %c0_202, %c0_203, %c21, %c0_204] : memref<1x1x2x25x384xf32, #tpu.memory_space<vmem>>, vector<1x1x1x1x384xf32>
    %197 = vector.shape_cast %196 : vector<1x1x1x1x384xf32> to vector<1x384xf32>
    %198 = vector.broadcast %197 : vector<1x384xf32> to vector<2x384xf32>
    %199 = arith.mulf %198, %195 : vector<2x384xf32>
    %200 = arith.addf %193, %199 : vector<2x384xf32>
    %c0_205 = arith.constant 0 : index
    %c0_206 = arith.constant 0 : index
    %c0_207 = arith.constant 0 : index
    %c98 = arith.constant 98 : index
    %201 = vector.load %arg3[%c0_205, %c0_206, %c0_207, %c98] : memref<1x2x2x504xf32, #tpu.memory_space<vmem>>, vector<1x1x2x384xf32>
    %202 = vector.shape_cast %201 : vector<1x1x2x384xf32> to vector<2x384xf32>
    %c0_208 = arith.constant 0 : index
    %c0_209 = arith.constant 0 : index
    %c0_210 = arith.constant 0 : index
    %c22 = arith.constant 22 : index
    %c0_211 = arith.constant 0 : index
    %203 = vector.load %arg5[%c0_208, %c0_209, %c0_210, %c22, %c0_211] : memref<1x1x2x25x384xf32, #tpu.memory_space<vmem>>, vector<1x1x1x1x384xf32>
    %204 = vector.shape_cast %203 : vector<1x1x1x1x384xf32> to vector<1x384xf32>
    %205 = vector.broadcast %204 : vector<1x384xf32> to vector<2x384xf32>
    %206 = arith.mulf %205, %202 : vector<2x384xf32>
    %207 = arith.addf %200, %206 : vector<2x384xf32>
    %c0_212 = arith.constant 0 : index
    %c0_213 = arith.constant 0 : index
    %c0_214 = arith.constant 0 : index
    %c99 = arith.constant 99 : index
    %208 = vector.load %arg3[%c0_212, %c0_213, %c0_214, %c99] : memref<1x2x2x504xf32, #tpu.memory_space<vmem>>, vector<1x1x2x384xf32>
    %209 = vector.shape_cast %208 : vector<1x1x2x384xf32> to vector<2x384xf32>
    %c0_215 = arith.constant 0 : index
    %c0_216 = arith.constant 0 : index
    %c0_217 = arith.constant 0 : index
    %c23 = arith.constant 23 : index
    %c0_218 = arith.constant 0 : index
    %210 = vector.load %arg5[%c0_215, %c0_216, %c0_217, %c23, %c0_218] : memref<1x1x2x25x384xf32, #tpu.memory_space<vmem>>, vector<1x1x1x1x384xf32>
    %211 = vector.shape_cast %210 : vector<1x1x1x1x384xf32> to vector<1x384xf32>
    %212 = vector.broadcast %211 : vector<1x384xf32> to vector<2x384xf32>
    %213 = arith.mulf %212, %209 : vector<2x384xf32>
    %214 = arith.addf %207, %213 : vector<2x384xf32>
    %c0_219 = arith.constant 0 : index
    %c0_220 = arith.constant 0 : index
    %c0_221 = arith.constant 0 : index
    %c100 = arith.constant 100 : index
    %215 = vector.load %arg3[%c0_219, %c0_220, %c0_221, %c100] : memref<1x2x2x504xf32, #tpu.memory_space<vmem>>, vector<1x1x2x384xf32>
    %216 = vector.shape_cast %215 : vector<1x1x2x384xf32> to vector<2x384xf32>
    %c0_222 = arith.constant 0 : index
    %c0_223 = arith.constant 0 : index
    %c0_224 = arith.constant 0 : index
    %c24_225 = arith.constant 24 : index
    %c0_226 = arith.constant 0 : index
    %217 = vector.load %arg5[%c0_222, %c0_223, %c0_224, %c24_225, %c0_226] : memref<1x1x2x25x384xf32, #tpu.memory_space<vmem>>, vector<1x1x1x1x384xf32>
    %218 = vector.shape_cast %217 : vector<1x1x1x1x384xf32> to vector<1x384xf32>
    %219 = vector.broadcast %218 : vector<1x384xf32> to vector<2x384xf32>
    %220 = arith.mulf %219, %216 : vector<2x384xf32>
    %221 = arith.addf %214, %220 : vector<2x384xf32>
    %c0_227 = arith.constant 0 : index
    %c0_228 = arith.constant 0 : index
    %c0_229 = arith.constant 0 : index
    %c0_230 = arith.constant 0 : index
    %c0_231 = arith.constant 0 : index
    %c0_232 = arith.constant 0 : index
    %222 = vector.load %arg6[%c0_227, %c0_228, %c0_229, %c0_230, %c0_231, %c0_232] : memref<1x2x1x2x2x384xf32, #tpu.memory_space<vmem>>, vector<1x1x1x1x2x384xf32>
    %223 = vector.shape_cast %222 : vector<1x1x1x1x2x384xf32> to vector<2x384xf32>
    %224 = vector.shape_cast %104 : vector<2x384xf32> to vector<1x1x1x1x2x384xf32>
    tpu.vector_store %arg6[%c0_227, %c0_228, %c0_229, %c0_230, %c0_231, %c0_232], %224 {strides = array<i32>} : memref<1x2x1x2x2x384xf32, #tpu.memory_space<vmem>>, vector<1x1x1x1x2x384xf32>,
    %c0_233 = arith.constant 0 : index
    %c1_234 = arith.constant 1 : index
    %c0_235 = arith.constant 0 : index
    %c0_236 = arith.constant 0 : index
    %c0_237 = arith.constant 0 : index
    %c0_238 = arith.constant 0 : index
    %225 = vector.load %arg6[%c0_233, %c1_234, %c0_235, %c0_236, %c0_237, %c0_238] : memref<1x2x1x2x2x384xf32, #tpu.memory_space<vmem>>, vector<1x1x1x1x2x384xf32>
    %226 = vector.shape_cast %225 : vector<1x1x1x1x2x384xf32> to vector<2x384xf32>
    %227 = vector.shape_cast %221 : vector<2x384xf32> to vector<1x1x1x1x2x384xf32>
    tpu.vector_store %arg6[%c0_233, %c1_234, %c0_235, %c0_236, %c0_237, %c0_238], %227 {strides = array<i32>} : memref<1x2x1x2x2x384xf32, #tpu.memory_space<vmem>>, vector<1x1x1x1x2x384xf32>,
    %cst_239 = arith.constant 0.000000e+00 : f32
    %228 = vector.broadcast %cst_239 : f32 to vector<2x384xf32>
    %cst_240 = arith.constant 0.000000e+00 : f32
    %229 = vector.broadcast %cst_240 : f32 to vector<2x384xf32>
    %c0_241 = arith.constant 0 : index
    %c1_242 = arith.constant 1 : index
    %c0_243 = arith.constant 0 : index
    %c25_244 = arith.constant 25 : index
    %230 = vector.load %arg3[%c0_241, %c1_242, %c0_243, %c25_244] : memref<1x2x2x504xf32, #tpu.memory_space<vmem>>, vector<1x1x2x384xf32>
    %231 = vector.shape_cast %230 : vector<1x1x2x384xf32> to vector<2x384xf32>
    %c0_245 = arith.constant 0 : index
    %c0_246 = arith.constant 0 : index
    %c1_247 = arith.constant 1 : index
    %c0_248 = arith.constant 0 : index
    %c0_249 = arith.constant 0 : index
    %232 = vector.load %arg4[%c0_245, %c0_246, %c1_247, %c0_248, %c0_249] : memref<1x1x2x9x384xf32, #tpu.memory_space<vmem>>, vector<1x1x1x1x384xf32>
    %233 = vector.shape_cast %232 : vector<1x1x1x1x384xf32> to vector<1x384xf32>
    %234 = vector.broadcast %233 : vector<1x384xf32> to vector<2x384xf32>
    %235 = arith.mulf %234, %231 : vector<2x384xf32>
    %236 = arith.addf %228, %235 : vector<2x384xf32>
    %c0_250 = arith.constant 0 : index
    %c0_251 = arith.constant 0 : index
    %c1_252 = arith.constant 1 : index
    %c6_253 = arith.constant 6 : index
    %c0_254 = arith.constant 0 : index
    %237 = vector.load %arg5[%c0_250, %c0_251, %c1_252, %c6_253, %c0_254] : memref<1x1x2x25x384xf32, #tpu.memory_space<vmem>>, vector<1x1x1x1x384xf32>
    %238 = vector.shape_cast %237 : vector<1x1x1x1x384xf32> to vector<1x384xf32>
    %239 = vector.broadcast %238 : vector<1x384xf32> to vector<2x384xf32>
    %240 = arith.mulf %239, %231 : vector<2x384xf32>
    %241 = arith.addf %229, %240 : vector<2x384xf32>
    %c0_255 = arith.constant 0 : index
    %c1_256 = arith.constant 1 : index
    %c0_257 = arith.constant 0 : index
    %c26_258 = arith.constant 26 : index
    %242 = vector.load %arg3[%c0_255, %c1_256, %c0_257, %c26_258] : memref<1x2x2x504xf32, #tpu.memory_space<vmem>>, vector<1x1x2x384xf32>
    %243 = vector.shape_cast %242 : vector<1x1x2x384xf32> to vector<2x384xf32>
    %c0_259 = arith.constant 0 : index
    %c0_260 = arith.constant 0 : index
    %c1_261 = arith.constant 1 : index
    %c1_262 = arith.constant 1 : index
    %c0_263 = arith.constant 0 : index
    %244 = vector.load %arg4[%c0_259, %c0_260, %c1_261, %c1_262, %c0_263] : memref<1x1x2x9x384xf32, #tpu.memory_space<vmem>>, vector<1x1x1x1x384xf32>
    %245 = vector.shape_cast %244 : vector<1x1x1x1x384xf32> to vector<1x384xf32>
    %246 = vector.broadcast %245 : vector<1x384xf32> to vector<2x384xf32>
    %247 = arith.mulf %246, %243 : vector<2x384xf32>
    %248 = arith.addf %236, %247 : vector<2x384xf32>
    %c0_264 = arith.constant 0 : index
    %c0_265 = arith.constant 0 : index
    %c1_266 = arith.constant 1 : index
    %c7_267 = arith.constant 7 : index
    %c0_268 = arith.constant 0 : index
    %249 = vector.load %arg5[%c0_264, %c0_265, %c1_266, %c7_267, %c0_268] : memref<1x1x2x25x384xf32, #tpu.memory_space<vmem>>, vector<1x1x1x1x384xf32>
    %250 = vector.shape_cast %249 : vector<1x1x1x1x384xf32> to vector<1x384xf32>
    %251 = vector.broadcast %250 : vector<1x384xf32> to vector<2x384xf32>
    %252 = arith.mulf %251, %243 : vector<2x384xf32>
    %253 = arith.addf %241, %252 : vector<2x384xf32>
    %c0_269 = arith.constant 0 : index
    %c1_270 = arith.constant 1 : index
    %c0_271 = arith.constant 0 : index
    %c27_272 = arith.constant 27 : index
    %254 = vector.load %arg3[%c0_269, %c1_270, %c0_271, %c27_272] : memref<1x2x2x504xf32, #tpu.memory_space<vmem>>, vector<1x1x2x384xf32>
    %255 = vector.shape_cast %254 : vector<1x1x2x384xf32> to vector<2x384xf32>
    %c0_273 = arith.constant 0 : index
    %c0_274 = arith.constant 0 : index
    %c1_275 = arith.constant 1 : index
    %c2_276 = arith.constant 2 : index
    %c0_277 = arith.constant 0 : index
    %256 = vector.load %arg4[%c0_273, %c0_274, %c1_275, %c2_276, %c0_277] : memref<1x1x2x9x384xf32, #tpu.memory_space<vmem>>, vector<1x1x1x1x384xf32>
    %257 = vector.shape_cast %256 : vector<1x1x1x1x384xf32> to vector<1x384xf32>
    %258 = vector.broadcast %257 : vector<1x384xf32> to vector<2x384xf32>
    %259 = arith.mulf %258, %255 : vector<2x384xf32>
    %260 = arith.addf %248, %259 : vector<2x384xf32>
    %c0_278 = arith.constant 0 : index
    %c0_279 = arith.constant 0 : index
    %c1_280 = arith.constant 1 : index
    %c8_281 = arith.constant 8 : index
    %c0_282 = arith.constant 0 : index
    %261 = vector.load %arg5[%c0_278, %c0_279, %c1_280, %c8_281, %c0_282] : memref<1x1x2x25x384xf32, #tpu.memory_space<vmem>>, vector<1x1x1x1x384xf32>
    %262 = vector.shape_cast %261 : vector<1x1x1x1x384xf32> to vector<1x384xf32>
    %263 = vector.broadcast %262 : vector<1x384xf32> to vector<2x384xf32>
    %264 = arith.mulf %263, %255 : vector<2x384xf32>
    %265 = arith.addf %253, %264 : vector<2x384xf32>
    %c0_283 = arith.constant 0 : index
    %c1_284 = arith.constant 1 : index
    %c0_285 = arith.constant 0 : index
    %c49_286 = arith.constant 49 : index
    %266 = vector.load %arg3[%c0_283, %c1_284, %c0_285, %c49_286] : memref<1x2x2x504xf32, #tpu.memory_space<vmem>>, vector<1x1x2x384xf32>
    %267 = vector.shape_cast %266 : vector<1x1x2x384xf32> to vector<2x384xf32>
    %c0_287 = arith.constant 0 : index
    %c0_288 = arith.constant 0 : index
    %c1_289 = arith.constant 1 : index
    %c3_290 = arith.constant 3 : index
    %c0_291 = arith.constant 0 : index
    %268 = vector.load %arg4[%c0_287, %c0_288, %c1_289, %c3_290, %c0_291] : memref<1x1x2x9x384xf32, #tpu.memory_space<vmem>>, vector<1x1x1x1x384xf32>
    %269 = vector.shape_cast %268 : vector<1x1x1x1x384xf32> to vector<1x384xf32>
    %270 = vector.broadcast %269 : vector<1x384xf32> to vector<2x384xf32>
    %271 = arith.mulf %270, %267 : vector<2x384xf32>
    %272 = arith.addf %260, %271 : vector<2x384xf32>
    %c0_292 = arith.constant 0 : index
    %c0_293 = arith.constant 0 : index
    %c1_294 = arith.constant 1 : index
    %c11_295 = arith.constant 11 : index
    %c0_296 = arith.constant 0 : index
    %273 = vector.load %arg5[%c0_292, %c0_293, %c1_294, %c11_295, %c0_296] : memref<1x1x2x25x384xf32, #tpu.memory_space<vmem>>, vector<1x1x1x1x384xf32>
    %274 = vector.shape_cast %273 : vector<1x1x1x1x384xf32> to vector<1x384xf32>
    %275 = vector.broadcast %274 : vector<1x384xf32> to vector<2x384xf32>
    %276 = arith.mulf %275, %267 : vector<2x384xf32>
    %277 = arith.addf %265, %276 : vector<2x384xf32>
    %c0_297 = arith.constant 0 : index
    %c1_298 = arith.constant 1 : index
    %c0_299 = arith.constant 0 : index
    %c50_300 = arith.constant 50 : index
    %278 = vector.load %arg3[%c0_297, %c1_298, %c0_299, %c50_300] : memref<1x2x2x504xf32, #tpu.memory_space<vmem>>, vector<1x1x2x384xf32>
    %279 = vector.shape_cast %278 : vector<1x1x2x384xf32> to vector<2x384xf32>
    %c0_301 = arith.constant 0 : index
    %c0_302 = arith.constant 0 : index
    %c1_303 = arith.constant 1 : index
    %c4_304 = arith.constant 4 : index
    %c0_305 = arith.constant 0 : index
    %280 = vector.load %arg4[%c0_301, %c0_302, %c1_303, %c4_304, %c0_305] : memref<1x1x2x9x384xf32, #tpu.memory_space<vmem>>, vector<1x1x1x1x384xf32>
    %281 = vector.shape_cast %280 : vector<1x1x1x1x384xf32> to vector<1x384xf32>
    %282 = vector.broadcast %281 : vector<1x384xf32> to vector<2x384xf32>
    %283 = arith.mulf %282, %279 : vector<2x384xf32>
    %284 = arith.addf %272, %283 : vector<2x384xf32>
    %c0_306 = arith.constant 0 : index
    %c0_307 = arith.constant 0 : index
    %c1_308 = arith.constant 1 : index
    %c12_309 = arith.constant 12 : index
    %c0_310 = arith.constant 0 : index
    %285 = vector.load %arg5[%c0_306, %c0_307, %c1_308, %c12_309, %c0_310] : memref<1x1x2x25x384xf32, #tpu.memory_space<vmem>>, vector<1x1x1x1x384xf32>
    %286 = vector.shape_cast %285 : vector<1x1x1x1x384xf32> to vector<1x384xf32>
    %287 = vector.broadcast %286 : vector<1x384xf32> to vector<2x384xf32>
    %288 = arith.mulf %287, %279 : vector<2x384xf32>
    %289 = arith.addf %277, %288 : vector<2x384xf32>
    %c0_311 = arith.constant 0 : index
    %c1_312 = arith.constant 1 : index
    %c0_313 = arith.constant 0 : index
    %c51_314 = arith.constant 51 : index
    %290 = vector.load %arg3[%c0_311, %c1_312, %c0_313, %c51_314] : memref<1x2x2x504xf32, #tpu.memory_space<vmem>>, vector<1x1x2x384xf32>
    %291 = vector.shape_cast %290 : vector<1x1x2x384xf32> to vector<2x384xf32>
    %c0_315 = arith.constant 0 : index
    %c0_316 = arith.constant 0 : index
    %c1_317 = arith.constant 1 : index
    %c5_318 = arith.constant 5 : index
    %c0_319 = arith.constant 0 : index
    %292 = vector.load %arg4[%c0_315, %c0_316, %c1_317, %c5_318, %c0_319] : memref<1x1x2x9x384xf32, #tpu.memory_space<vmem>>, vector<1x1x1x1x384xf32>
    %293 = vector.shape_cast %292 : vector<1x1x1x1x384xf32> to vector<1x384xf32>
    %294 = vector.broadcast %293 : vector<1x384xf32> to vector<2x384xf32>
    %295 = arith.mulf %294, %291 : vector<2x384xf32>
    %296 = arith.addf %284, %295 : vector<2x384xf32>
    %c0_320 = arith.constant 0 : index
    %c0_321 = arith.constant 0 : index
    %c1_322 = arith.constant 1 : index
    %c13_323 = arith.constant 13 : index
    %c0_324 = arith.constant 0 : index
    %297 = vector.load %arg5[%c0_320, %c0_321, %c1_322, %c13_323, %c0_324] : memref<1x1x2x25x384xf32, #tpu.memory_space<vmem>>, vector<1x1x1x1x384xf32>
    %298 = vector.shape_cast %297 : vector<1x1x1x1x384xf32> to vector<1x384xf32>
    %299 = vector.broadcast %298 : vector<1x384xf32> to vector<2x384xf32>
    %300 = arith.mulf %299, %291 : vector<2x384xf32>
    %301 = arith.addf %289, %300 : vector<2x384xf32>
    %c0_325 = arith.constant 0 : index
    %c1_326 = arith.constant 1 : index
    %c0_327 = arith.constant 0 : index
    %c73_328 = arith.constant 73 : index
    %302 = vector.load %arg3[%c0_325, %c1_326, %c0_327, %c73_328] : memref<1x2x2x504xf32, #tpu.memory_space<vmem>>, vector<1x1x2x384xf32>
    %303 = vector.shape_cast %302 : vector<1x1x2x384xf32> to vector<2x384xf32>
    %c0_329 = arith.constant 0 : index
    %c0_330 = arith.constant 0 : index
    %c1_331 = arith.constant 1 : index
    %c6_332 = arith.constant 6 : index
    %c0_333 = arith.constant 0 : index
    %304 = vector.load %arg4[%c0_329, %c0_330, %c1_331, %c6_332, %c0_333] : memref<1x1x2x9x384xf32, #tpu.memory_space<vmem>>, vector<1x1x1x1x384xf32>
    %305 = vector.shape_cast %304 : vector<1x1x1x1x384xf32> to vector<1x384xf32>
    %306 = vector.broadcast %305 : vector<1x384xf32> to vector<2x384xf32>
    %307 = arith.mulf %306, %303 : vector<2x384xf32>
    %308 = arith.addf %296, %307 : vector<2x384xf32>
    %c0_334 = arith.constant 0 : index
    %c0_335 = arith.constant 0 : index
    %c1_336 = arith.constant 1 : index
    %c16_337 = arith.constant 16 : index
    %c0_338 = arith.constant 0 : index
    %309 = vector.load %arg5[%c0_334, %c0_335, %c1_336, %c16_337, %c0_338] : memref<1x1x2x25x384xf32, #tpu.memory_space<vmem>>, vector<1x1x1x1x384xf32>
    %310 = vector.shape_cast %309 : vector<1x1x1x1x384xf32> to vector<1x384xf32>
    %311 = vector.broadcast %310 : vector<1x384xf32> to vector<2x384xf32>
    %312 = arith.mulf %311, %303 : vector<2x384xf32>
    %313 = arith.addf %301, %312 : vector<2x384xf32>
    %c0_339 = arith.constant 0 : index
    %c1_340 = arith.constant 1 : index
    %c0_341 = arith.constant 0 : index
    %c74_342 = arith.constant 74 : index
    %314 = vector.load %arg3[%c0_339, %c1_340, %c0_341, %c74_342] : memref<1x2x2x504xf32, #tpu.memory_space<vmem>>, vector<1x1x2x384xf32>
    %315 = vector.shape_cast %314 : vector<1x1x2x384xf32> to vector<2x384xf32>
    %c0_343 = arith.constant 0 : index
    %c0_344 = arith.constant 0 : index
    %c1_345 = arith.constant 1 : index
    %c7_346 = arith.constant 7 : index
    %c0_347 = arith.constant 0 : index
    %316 = vector.load %arg4[%c0_343, %c0_344, %c1_345, %c7_346, %c0_347] : memref<1x1x2x9x384xf32, #tpu.memory_space<vmem>>, vector<1x1x1x1x384xf32>
    %317 = vector.shape_cast %316 : vector<1x1x1x1x384xf32> to vector<1x384xf32>
    %318 = vector.broadcast %317 : vector<1x384xf32> to vector<2x384xf32>
    %319 = arith.mulf %318, %315 : vector<2x384xf32>
    %320 = arith.addf %308, %319 : vector<2x384xf32>
    %c0_348 = arith.constant 0 : index
    %c0_349 = arith.constant 0 : index
    %c1_350 = arith.constant 1 : index
    %c17_351 = arith.constant 17 : index
    %c0_352 = arith.constant 0 : index
    %321 = vector.load %arg5[%c0_348, %c0_349, %c1_350, %c17_351, %c0_352] : memref<1x1x2x25x384xf32, #tpu.memory_space<vmem>>, vector<1x1x1x1x384xf32>
    %322 = vector.shape_cast %321 : vector<1x1x1x1x384xf32> to vector<1x384xf32>
    %323 = vector.broadcast %322 : vector<1x384xf32> to vector<2x384xf32>
    %324 = arith.mulf %323, %315 : vector<2x384xf32>
    %325 = arith.addf %313, %324 : vector<2x384xf32>
    %c0_353 = arith.constant 0 : index
    %c1_354 = arith.constant 1 : index
    %c0_355 = arith.constant 0 : index
    %c75_356 = arith.constant 75 : index
    %326 = vector.load %arg3[%c0_353, %c1_354, %c0_355, %c75_356] : memref<1x2x2x504xf32, #tpu.memory_space<vmem>>, vector<1x1x2x384xf32>
    %327 = vector.shape_cast %326 : vector<1x1x2x384xf32> to vector<2x384xf32>
    %c0_357 = arith.constant 0 : index
    %c0_358 = arith.constant 0 : index
    %c1_359 = arith.constant 1 : index
    %c8_360 = arith.constant 8 : index
    %c0_361 = arith.constant 0 : index
    %328 = vector.load %arg4[%c0_357, %c0_358, %c1_359, %c8_360, %c0_361] : memref<1x1x2x9x384xf32, #tpu.memory_space<vmem>>, vector<1x1x1x1x384xf32>
    %329 = vector.shape_cast %328 : vector<1x1x1x1x384xf32> to vector<1x384xf32>
    %330 = vector.broadcast %329 : vector<1x384xf32> to vector<2x384xf32>
    %331 = arith.mulf %330, %327 : vector<2x384xf32>
    %332 = arith.addf %320, %331 : vector<2x384xf32>
    %c0_362 = arith.constant 0 : index
    %c0_363 = arith.constant 0 : index
    %c1_364 = arith.constant 1 : index
    %c18_365 = arith.constant 18 : index
    %c0_366 = arith.constant 0 : index
    %333 = vector.load %arg5[%c0_362, %c0_363, %c1_364, %c18_365, %c0_366] : memref<1x1x2x25x384xf32, #tpu.memory_space<vmem>>, vector<1x1x1x1x384xf32>
    %334 = vector.shape_cast %333 : vector<1x1x1x1x384xf32> to vector<1x384xf32>
    %335 = vector.broadcast %334 : vector<1x384xf32> to vector<2x384xf32>
    %336 = arith.mulf %335, %327 : vector<2x384xf32>
    %337 = arith.addf %325, %336 : vector<2x384xf32>
    %c0_367 = arith.constant 0 : index
    %c1_368 = arith.constant 1 : index
    %c0_369 = arith.constant 0 : index
    %c0_370 = arith.constant 0 : index
    %338 = vector.load %arg3[%c0_367, %c1_368, %c0_369, %c0_370] : memref<1x2x2x504xf32, #tpu.memory_space<vmem>>, vector<1x1x2x384xf32>
    %339 = vector.shape_cast %338 : vector<1x1x2x384xf32> to vector<2x384xf32>
    %c0_371 = arith.constant 0 : index
    %c0_372 = arith.constant 0 : index
    %c1_373 = arith.constant 1 : index
    %c0_374 = arith.constant 0 : index
    %c0_375 = arith.constant 0 : index
    %340 = vector.load %arg5[%c0_371, %c0_372, %c1_373, %c0_374, %c0_375] : memref<1x1x2x25x384xf32, #tpu.memory_space<vmem>>, vector<1x1x1x1x384xf32>
    %341 = vector.shape_cast %340 : vector<1x1x1x1x384xf32> to vector<1x384xf32>
    %342 = vector.broadcast %341 : vector<1x384xf32> to vector<2x384xf32>
    %343 = arith.mulf %342, %339 : vector<2x384xf32>
    %344 = arith.addf %337, %343 : vector<2x384xf32>
    %c0_376 = arith.constant 0 : index
    %c1_377 = arith.constant 1 : index
    %c0_378 = arith.constant 0 : index
    %c1_379 = arith.constant 1 : index
    %345 = vector.load %arg3[%c0_376, %c1_377, %c0_378, %c1_379] : memref<1x2x2x504xf32, #tpu.memory_space<vmem>>, vector<1x1x2x384xf32>
    %346 = vector.shape_cast %345 : vector<1x1x2x384xf32> to vector<2x384xf32>
    %c0_380 = arith.constant 0 : index
    %c0_381 = arith.constant 0 : index
    %c1_382 = arith.constant 1 : index
    %c1_383 = arith.constant 1 : index
    %c0_384 = arith.constant 0 : index
    %347 = vector.load %arg5[%c0_380, %c0_381, %c1_382, %c1_383, %c0_384] : memref<1x1x2x25x384xf32, #tpu.memory_space<vmem>>, vector<1x1x1x1x384xf32>
    %348 = vector.shape_cast %347 : vector<1x1x1x1x384xf32> to vector<1x384xf32>
    %349 = vector.broadcast %348 : vector<1x384xf32> to vector<2x384xf32>
    %350 = arith.mulf %349, %346 : vector<2x384xf32>
    %351 = arith.addf %344, %350 : vector<2x384xf32>
    %c0_385 = arith.constant 0 : index
    %c1_386 = arith.constant 1 : index
    %c0_387 = arith.constant 0 : index
    %c2_388 = arith.constant 2 : index
    %352 = vector.load %arg3[%c0_385, %c1_386, %c0_387, %c2_388] : memref<1x2x2x504xf32, #tpu.memory_space<vmem>>, vector<1x1x2x384xf32>
    %353 = vector.shape_cast %352 : vector<1x1x2x384xf32> to vector<2x384xf32>
    %c0_389 = arith.constant 0 : index
    %c0_390 = arith.constant 0 : index
    %c1_391 = arith.constant 1 : index
    %c2_392 = arith.constant 2 : index
    %c0_393 = arith.constant 0 : index
    %354 = vector.load %arg5[%c0_389, %c0_390, %c1_391, %c2_392, %c0_393] : memref<1x1x2x25x384xf32, #tpu.memory_space<vmem>>, vector<1x1x1x1x384xf32>
    %355 = vector.shape_cast %354 : vector<1x1x1x1x384xf32> to vector<1x384xf32>
    %356 = vector.broadcast %355 : vector<1x384xf32> to vector<2x384xf32>
    %357 = arith.mulf %356, %353 : vector<2x384xf32>
    %358 = arith.addf %351, %357 : vector<2x384xf32>
    %c0_394 = arith.constant 0 : index
    %c1_395 = arith.constant 1 : index
    %c0_396 = arith.constant 0 : index
    %c3_397 = arith.constant 3 : index
    %359 = vector.load %arg3[%c0_394, %c1_395, %c0_396, %c3_397] : memref<1x2x2x504xf32, #tpu.memory_space<vmem>>, vector<1x1x2x384xf32>
    %360 = vector.shape_cast %359 : vector<1x1x2x384xf32> to vector<2x384xf32>
    %c0_398 = arith.constant 0 : index
    %c0_399 = arith.constant 0 : index
    %c1_400 = arith.constant 1 : index
    %c3_401 = arith.constant 3 : index
    %c0_402 = arith.constant 0 : index
    %361 = vector.load %arg5[%c0_398, %c0_399, %c1_400, %c3_401, %c0_402] : memref<1x1x2x25x384xf32, #tpu.memory_space<vmem>>, vector<1x1x1x1x384xf32>
    %362 = vector.shape_cast %361 : vector<1x1x1x1x384xf32> to vector<1x384xf32>
    %363 = vector.broadcast %362 : vector<1x384xf32> to vector<2x384xf32>
    %364 = arith.mulf %363, %360 : vector<2x384xf32>
    %365 = arith.addf %358, %364 : vector<2x384xf32>
    %c0_403 = arith.constant 0 : index
    %c1_404 = arith.constant 1 : index
    %c0_405 = arith.constant 0 : index
    %c4_406 = arith.constant 4 : index
    %366 = vector.load %arg3[%c0_403, %c1_404, %c0_405, %c4_406] : memref<1x2x2x504xf32, #tpu.memory_space<vmem>>, vector<1x1x2x384xf32>
    %367 = vector.shape_cast %366 : vector<1x1x2x384xf32> to vector<2x384xf32>
    %c0_407 = arith.constant 0 : index
    %c0_408 = arith.constant 0 : index
    %c1_409 = arith.constant 1 : index
    %c4_410 = arith.constant 4 : index
    %c0_411 = arith.constant 0 : index
    %368 = vector.load %arg5[%c0_407, %c0_408, %c1_409, %c4_410, %c0_411] : memref<1x1x2x25x384xf32, #tpu.memory_space<vmem>>, vector<1x1x1x1x384xf32>
    %369 = vector.shape_cast %368 : vector<1x1x1x1x384xf32> to vector<1x384xf32>
    %370 = vector.broadcast %369 : vector<1x384xf32> to vector<2x384xf32>
    %371 = arith.mulf %370, %367 : vector<2x384xf32>
    %372 = arith.addf %365, %371 : vector<2x384xf32>
    %c0_412 = arith.constant 0 : index
    %c1_413 = arith.constant 1 : index
    %c0_414 = arith.constant 0 : index
    %c24_415 = arith.constant 24 : index
    %373 = vector.load %arg3[%c0_412, %c1_413, %c0_414, %c24_415] : memref<1x2x2x504xf32, #tpu.memory_space<vmem>>, vector<1x1x2x384xf32>
    %374 = vector.shape_cast %373 : vector<1x1x2x384xf32> to vector<2x384xf32>
    %c0_416 = arith.constant 0 : index
    %c0_417 = arith.constant 0 : index
    %c1_418 = arith.constant 1 : index
    %c5_419 = arith.constant 5 : index
    %c0_420 = arith.constant 0 : index
    %375 = vector.load %arg5[%c0_416, %c0_417, %c1_418, %c5_419, %c0_420] : memref<1x1x2x25x384xf32, #tpu.memory_space<vmem>>, vector<1x1x1x1x384xf32>
    %376 = vector.shape_cast %375 : vector<1x1x1x1x384xf32> to vector<1x384xf32>
    %377 = vector.broadcast %376 : vector<1x384xf32> to vector<2x384xf32>
    %378 = arith.mulf %377, %374 : vector<2x384xf32>
    %379 = arith.addf %372, %378 : vector<2x384xf32>
    %c0_421 = arith.constant 0 : index
    %c1_422 = arith.constant 1 : index
    %c0_423 = arith.constant 0 : index
    %c28_424 = arith.constant 28 : index
    %380 = vector.load %arg3[%c0_421, %c1_422, %c0_423, %c28_424] : memref<1x2x2x504xf32, #tpu.memory_space<vmem>>, vector<1x1x2x384xf32>
    %381 = vector.shape_cast %380 : vector<1x1x2x384xf32> to vector<2x384xf32>
    %c0_425 = arith.constant 0 : index
    %c0_426 = arith.constant 0 : index
    %c1_427 = arith.constant 1 : index
    %c9_428 = arith.constant 9 : index
    %c0_429 = arith.constant 0 : index
    %382 = vector.load %arg5[%c0_425, %c0_426, %c1_427, %c9_428, %c0_429] : memref<1x1x2x25x384xf32, #tpu.memory_space<vmem>>, vector<1x1x1x1x384xf32>
    %383 = vector.shape_cast %382 : vector<1x1x1x1x384xf32> to vector<1x384xf32>
    %384 = vector.broadcast %383 : vector<1x384xf32> to vector<2x384xf32>
    %385 = arith.mulf %384, %381 : vector<2x384xf32>
    %386 = arith.addf %379, %385 : vector<2x384xf32>
    %c0_430 = arith.constant 0 : index
    %c1_431 = arith.constant 1 : index
    %c0_432 = arith.constant 0 : index
    %c48_433 = arith.constant 48 : index
    %387 = vector.load %arg3[%c0_430, %c1_431, %c0_432, %c48_433] : memref<1x2x2x504xf32, #tpu.memory_space<vmem>>, vector<1x1x2x384xf32>
    %388 = vector.shape_cast %387 : vector<1x1x2x384xf32> to vector<2x384xf32>
    %c0_434 = arith.constant 0 : index
    %c0_435 = arith.constant 0 : index
    %c1_436 = arith.constant 1 : index
    %c10_437 = arith.constant 10 : index
    %c0_438 = arith.constant 0 : index
    %389 = vector.load %arg5[%c0_434, %c0_435, %c1_436, %c10_437, %c0_438] : memref<1x1x2x25x384xf32, #tpu.memory_space<vmem>>, vector<1x1x1x1x384xf32>
    %390 = vector.shape_cast %389 : vector<1x1x1x1x384xf32> to vector<1x384xf32>
    %391 = vector.broadcast %390 : vector<1x384xf32> to vector<2x384xf32>
    %392 = arith.mulf %391, %388 : vector<2x384xf32>
    %393 = arith.addf %386, %392 : vector<2x384xf32>
    %c0_439 = arith.constant 0 : index
    %c1_440 = arith.constant 1 : index
    %c0_441 = arith.constant 0 : index
    %c52_442 = arith.constant 52 : index
    %394 = vector.load %arg3[%c0_439, %c1_440, %c0_441, %c52_442] : memref<1x2x2x504xf32, #tpu.memory_space<vmem>>, vector<1x1x2x384xf32>
    %395 = vector.shape_cast %394 : vector<1x1x2x384xf32> to vector<2x384xf32>
    %c0_443 = arith.constant 0 : index
    %c0_444 = arith.constant 0 : index
    %c1_445 = arith.constant 1 : index
    %c14_446 = arith.constant 14 : index
    %c0_447 = arith.constant 0 : index
    %396 = vector.load %arg5[%c0_443, %c0_444, %c1_445, %c14_446, %c0_447] : memref<1x1x2x25x384xf32, #tpu.memory_space<vmem>>, vector<1x1x1x1x384xf32>
    %397 = vector.shape_cast %396 : vector<1x1x1x1x384xf32> to vector<1x384xf32>
    %398 = vector.broadcast %397 : vector<1x384xf32> to vector<2x384xf32>
    %399 = arith.mulf %398, %395 : vector<2x384xf32>
    %400 = arith.addf %393, %399 : vector<2x384xf32>
    %c0_448 = arith.constant 0 : index
    %c1_449 = arith.constant 1 : index
    %c0_450 = arith.constant 0 : index
    %c72_451 = arith.constant 72 : index
    %401 = vector.load %arg3[%c0_448, %c1_449, %c0_450, %c72_451] : memref<1x2x2x504xf32, #tpu.memory_space<vmem>>, vector<1x1x2x384xf32>
    %402 = vector.shape_cast %401 : vector<1x1x2x384xf32> to vector<2x384xf32>
    %c0_452 = arith.constant 0 : index
    %c0_453 = arith.constant 0 : index
    %c1_454 = arith.constant 1 : index
    %c15_455 = arith.constant 15 : index
    %c0_456 = arith.constant 0 : index
    %403 = vector.load %arg5[%c0_452, %c0_453, %c1_454, %c15_455, %c0_456] : memref<1x1x2x25x384xf32, #tpu.memory_space<vmem>>, vector<1x1x1x1x384xf32>
    %404 = vector.shape_cast %403 : vector<1x1x1x1x384xf32> to vector<1x384xf32>
    %405 = vector.broadcast %404 : vector<1x384xf32> to vector<2x384xf32>
    %406 = arith.mulf %405, %402 : vector<2x384xf32>
    %407 = arith.addf %400, %406 : vector<2x384xf32>
    %c0_457 = arith.constant 0 : index
    %c1_458 = arith.constant 1 : index
    %c0_459 = arith.constant 0 : index
    %c76_460 = arith.constant 76 : index
    %408 = vector.load %arg3[%c0_457, %c1_458, %c0_459, %c76_460] : memref<1x2x2x504xf32, #tpu.memory_space<vmem>>, vector<1x1x2x384xf32>
    %409 = vector.shape_cast %408 : vector<1x1x2x384xf32> to vector<2x384xf32>
    %c0_461 = arith.constant 0 : index
    %c0_462 = arith.constant 0 : index
    %c1_463 = arith.constant 1 : index
    %c19_464 = arith.constant 19 : index
    %c0_465 = arith.constant 0 : index
    %410 = vector.load %arg5[%c0_461, %c0_462, %c1_463, %c19_464, %c0_465] : memref<1x1x2x25x384xf32, #tpu.memory_space<vmem>>, vector<1x1x1x1x384xf32>
    %411 = vector.shape_cast %410 : vector<1x1x1x1x384xf32> to vector<1x384xf32>
    %412 = vector.broadcast %411 : vector<1x384xf32> to vector<2x384xf32>
    %413 = arith.mulf %412, %409 : vector<2x384xf32>
    %414 = arith.addf %407, %413 : vector<2x384xf32>
    %c0_466 = arith.constant 0 : index
    %c1_467 = arith.constant 1 : index
    %c0_468 = arith.constant 0 : index
    %c96_469 = arith.constant 96 : index
    %415 = vector.load %arg3[%c0_466, %c1_467, %c0_468, %c96_469] : memref<1x2x2x504xf32, #tpu.memory_space<vmem>>, vector<1x1x2x384xf32>
    %416 = vector.shape_cast %415 : vector<1x1x2x384xf32> to vector<2x384xf32>
    %c0_470 = arith.constant 0 : index
    %c0_471 = arith.constant 0 : index
    %c1_472 = arith.constant 1 : index
    %c20_473 = arith.constant 20 : index
    %c0_474 = arith.constant 0 : index
    %417 = vector.load %arg5[%c0_470, %c0_471, %c1_472, %c20_473, %c0_474] : memref<1x1x2x25x384xf32, #tpu.memory_space<vmem>>, vector<1x1x1x1x384xf32>
    %418 = vector.shape_cast %417 : vector<1x1x1x1x384xf32> to vector<1x384xf32>
    %419 = vector.broadcast %418 : vector<1x384xf32> to vector<2x384xf32>
    %420 = arith.mulf %419, %416 : vector<2x384xf32>
    %421 = arith.addf %414, %420 : vector<2x384xf32>
    %c0_475 = arith.constant 0 : index
    %c1_476 = arith.constant 1 : index
    %c0_477 = arith.constant 0 : index
    %c97_478 = arith.constant 97 : index
    %422 = vector.load %arg3[%c0_475, %c1_476, %c0_477, %c97_478] : memref<1x2x2x504xf32, #tpu.memory_space<vmem>>, vector<1x1x2x384xf32>
    %423 = vector.shape_cast %422 : vector<1x1x2x384xf32> to vector<2x384xf32>
    %c0_479 = arith.constant 0 : index
    %c0_480 = arith.constant 0 : index
    %c1_481 = arith.constant 1 : index
    %c21_482 = arith.constant 21 : index
    %c0_483 = arith.constant 0 : index
    %424 = vector.load %arg5[%c0_479, %c0_480, %c1_481, %c21_482, %c0_483] : memref<1x1x2x25x384xf32, #tpu.memory_space<vmem>>, vector<1x1x1x1x384xf32>
    %425 = vector.shape_cast %424 : vector<1x1x1x1x384xf32> to vector<1x384xf32>
    %426 = vector.broadcast %425 : vector<1x384xf32> to vector<2x384xf32>
    %427 = arith.mulf %426, %423 : vector<2x384xf32>
    %428 = arith.addf %421, %427 : vector<2x384xf32>
    %c0_484 = arith.constant 0 : index
    %c1_485 = arith.constant 1 : index
    %c0_486 = arith.constant 0 : index
    %c98_487 = arith.constant 98 : index
    %429 = vector.load %arg3[%c0_484, %c1_485, %c0_486, %c98_487] : memref<1x2x2x504xf32, #tpu.memory_space<vmem>>, vector<1x1x2x384xf32>
    %430 = vector.shape_cast %429 : vector<1x1x2x384xf32> to vector<2x384xf32>
    %c0_488 = arith.constant 0 : index
    %c0_489 = arith.constant 0 : index
    %c1_490 = arith.constant 1 : index
    %c22_491 = arith.constant 22 : index
    %c0_492 = arith.constant 0 : index
    %431 = vector.load %arg5[%c0_488, %c0_489, %c1_490, %c22_491, %c0_492] : memref<1x1x2x25x384xf32, #tpu.memory_space<vmem>>, vector<1x1x1x1x384xf32>
    %432 = vector.shape_cast %431 : vector<1x1x1x1x384xf32> to vector<1x384xf32>
    %433 = vector.broadcast %432 : vector<1x384xf32> to vector<2x384xf32>
    %434 = arith.mulf %433, %430 : vector<2x384xf32>
    %435 = arith.addf %428, %434 : vector<2x384xf32>
    %c0_493 = arith.constant 0 : index
    %c1_494 = arith.constant 1 : index
    %c0_495 = arith.constant 0 : index
    %c99_496 = arith.constant 99 : index
    %436 = vector.load %arg3[%c0_493, %c1_494, %c0_495, %c99_496] : memref<1x2x2x504xf32, #tpu.memory_space<vmem>>, vector<1x1x2x384xf32>
    %437 = vector.shape_cast %436 : vector<1x1x2x384xf32> to vector<2x384xf32>
    %c0_497 = arith.constant 0 : index
    %c0_498 = arith.constant 0 : index
    %c1_499 = arith.constant 1 : index
    %c23_500 = arith.constant 23 : index
    %c0_501 = arith.constant 0 : index
    %438 = vector.load %arg5[%c0_497, %c0_498, %c1_499, %c23_500, %c0_501] : memref<1x1x2x25x384xf32, #tpu.memory_space<vmem>>, vector<1x1x1x1x384xf32>
    %439 = vector.shape_cast %438 : vector<1x1x1x1x384xf32> to vector<1x384xf32>
    %440 = vector.broadcast %439 : vector<1x384xf32> to vector<2x384xf32>
    %441 = arith.mulf %440, %437 : vector<2x384xf32>
    %442 = arith.addf %435, %441 : vector<2x384xf32>
    %c0_502 = arith.constant 0 : index
    %c1_503 = arith.constant 1 : index
    %c0_504 = arith.constant 0 : index
    %c100_505 = arith.constant 100 : index
    %443 = vector.load %arg3[%c0_502, %c1_503, %c0_504, %c100_505] : memref<1x2x2x504xf32, #tpu.memory_space<vmem>>, vector<1x1x2x384xf32>
    %444 = vector.shape_cast %443 : vector<1x1x2x384xf32> to vector<2x384xf32>
    %c0_506 = arith.constant 0 : index
    %c0_507 = arith.constant 0 : index
    %c1_508 = arith.constant 1 : index
    %c24_509 = arith.constant 24 : index
    %c0_510 = arith.constant 0 : index
    %445 = vector.load %arg5[%c0_506, %c0_507, %c1_508, %c24_509, %c0_510] : memref<1x1x2x25x384xf32, #tpu.memory_space<vmem>>, vector<1x1x1x1x384xf32>
    %446 = vector.shape_cast %445 : vector<1x1x1x1x384xf32> to vector<1x384xf32>
    %447 = vector.broadcast %446 : vector<1x384xf32> to vector<2x384xf32>
    %448 = arith.mulf %447, %444 : vector<2x384xf32>
    %449 = arith.addf %442, %448 : vector<2x384xf32>
    %c0_511 = arith.constant 0 : index
    %c0_512 = arith.constant 0 : index
    %c0_513 = arith.constant 0 : index
    %c1_514 = arith.constant 1 : index
    %c0_515 = arith.constant 0 : index
    %c0_516 = arith.constant 0 : index
    %450 = vector.load %arg6[%c0_511, %c0_512, %c0_513, %c1_514, %c0_515, %c0_516] : memref<1x2x1x2x2x384xf32, #tpu.memory_space<vmem>>, vector<1x1x1x1x2x384xf32>
    %451 = vector.shape_cast %450 : vector<1x1x1x1x2x384xf32> to vector<2x384xf32>
    %452 = vector.shape_cast %332 : vector<2x384xf32> to vector<1x1x1x1x2x384xf32>
    tpu.vector_store %arg6[%c0_511, %c0_512, %c0_513, %c1_514, %c0_515, %c0_516], %452 {strides = array<i32>} : memref<1x2x1x2x2x384xf32, #tpu.memory_space<vmem>>, vector<1x1x1x1x2x384xf32>,
    %c0_517 = arith.constant 0 : index
    %c1_518 = arith.constant 1 : index
    %c0_519 = arith.constant 0 : index
    %c1_520 = arith.constant 1 : index
    %c0_521 = arith.constant 0 : index
    %c0_522 = arith.constant 0 : index
    %453 = vector.load %arg6[%c0_517, %c1_518, %c0_519, %c1_520, %c0_521, %c0_522] : memref<1x2x1x2x2x384xf32, #tpu.memory_space<vmem>>, vector<1x1x1x1x2x384xf32>
    %454 = vector.shape_cast %453 : vector<1x1x1x1x2x384xf32> to vector<2x384xf32>
    %455 = vector.shape_cast %449 : vector<2x384xf32> to vector<1x1x1x1x2x384xf32>
    tpu.vector_store %arg6[%c0_517, %c1_518, %c0_519, %c1_520, %c0_521, %c0_522], %455 {strides = array<i32>} : memref<1x2x1x2x2x384xf32, #tpu.memory_space<vmem>>, vector<1x1x1x1x2x384xf32>,
    return
  }
  func.func @transform_0(%arg0: i32, %arg1: i32, %arg2: i32) -> (i32, i32, i32, i32) {
    %c0_i32 = arith.constant 0 : i32
    %c0_i32_0 = arith.constant 0 : i32
    %c0_i32_1 = arith.constant 0 : i32
    return %arg0, %arg1, %c0_i32, %c0_i32_0 : i32, i32, i32, i32
  }
  func.func @transform_1(%arg0: i32, %arg1: i32, %arg2: i32) -> (i32, i32, i32, i32, i32) {
    %c0_i32 = arith.constant 0 : i32
    %c0_i32_0 = arith.constant 0 : i32
    %c0_i32_1 = arith.constant 0 : i32
    return %arg0, %arg2, %arg1, %c0_i32, %c0_i32_0 : i32, i32, i32, i32, i32
  }
  func.func @transform_2(%arg0: i32, %arg1: i32, %arg2: i32) -> (i32, i32, i32, i32, i32) {
    %c0_i32 = arith.constant 0 : i32
    %c0_i32_0 = arith.constant 0 : i32
    %c0_i32_1 = arith.constant 0 : i32
    return %arg0, %arg2, %arg1, %c0_i32, %c0_i32_0 : i32, i32, i32, i32, i32
  }
  func.func @transform_3(%arg0: i32, %arg1: i32, %arg2: i32) -> (i32, i32, i32, i32, i32, i32) {
    %c0_i32 = arith.constant 0 : i32
    %c0_i32_0 = arith.constant 0 : i32
    %c0_i32_1 = arith.constant 0 : i32
    %c0_i32_2 = arith.constant 0 : i32
    return %arg0, %c0_i32, %arg2, %arg1, %c0_i32_0, %c0_i32_1 : i32, i32, i32, i32, i32, i32
  }
}

</mosaic_0001>

<bundles_post_ra>
// kernel: tpu_custom_call.1
= control target key start
LH: loop header
LB: loop body
LE: loop exit
PB: predicated region body
PF: predicated region fallthrough
CT: control target
= control target key end

     0   :  { %s5701_s0 = inlined_call_operand.hbm [shape: f32[2,2,2,504], index: 0, kind: input, shape index: {}]   ;;  %s5702_s1 = inlined_call_operand.hbm [shape: f32[2,2,2,9,384], index: 1, kind: input, shape index: {}]   ;;  %s5703_s2 = inlined_call_operand.hbm [shape: f32[2,2,2,25,384], index: 2, kind: input, shape index: {}]   ;;  %s5704_s3 = inlined_call_operand.hbm [shape: f32[2,2,2,2,2,384], index: 3, kind: output, shape index: {}]  }
   0x1   :  { %5751 = sst [smem:[#allocation34_spill]] %s5701_s0 }
   0x2   :  { %5752 = sst [smem:[#allocation35_spill]] %s5702_s1 }
   0x3   :  { %5753 = sst [smem:[#allocation36_spill]] %s5704_s3 }
   0x4   :  { %8 = vsyncpa [#allocation3], 0 }
   0x5   :  { %10 = vsyncpa [#allocation3 + $0x1], 0 }
   0x6   :  { %11 = vsyncpa [#allocation6], 0 }
   0x7   :  { %13 = vsyncpa [#allocation6 + $0x1], 0 }
   0x8   :  { %14 = vsyncpa [#allocation4], 0 }
   0x9   :  { %16 = vsyncpa [#allocation4 + $0x1], 0  ;;  %s3542_s12 = smov 0   ;;  %s3544_s13 = smov 0  }
   0xa   :  { %s3546_s14 = smov 0   ;;  %s3548_s15 = smov 0  }
   0xb   :  { %s3550_s16 = smov 0   ;;  %s3552_s17 = smov 0  }
   0xc   :  { %s3554_s18 = smov 0   ;;  %s3556_s19 = smov 0  }
   0xd   :  { %s3558_s20 = smov 0   ;;  %s3560_s21 = smov 0  }
   0xe   :  { %s3562_s22 = smov 0  }
   0xf LB: > { %5754 = sst [smem:[#allocation14_spill]] %s3441_s12  ;;  %s3598_s23 = sadd.s32 4294967295, %s3481_s22   ;;  %s3481_s22 = sphi %s3562_s22, %s22_s22   ;;  %s3477_s21 = sphi %s3560_s21, %s5918_s21   ;;  %s3473_s20 = sphi %s3558_s20, %s5917_s20   ;;  %s3469_s19 = sphi %s3556_s19, %s5916_s19   ;;  %s3465_s18 = sphi %s3554_s18, %s5915_s18   ;;  %s3461_s17 = sphi %s3552_s17, %s5908_s17   ;;  %s3457_s16 = sphi %s3550_s16, %s5914_s16   ;;  %s3453_s15 = sphi %s3548_s15, %s5913_s15   ;;  %s3449_s14 = sphi %s3546_s14, %s5906_s14   ;;  %s3445_s13 = sphi %s3544_s13, %s5912_s13   ;;  %s3441_s12 = sphi %s3542_s12, %s5911_s12  }
  0x10   : > { %5755 = sst [smem:[#allocation15_spill]] %s3449_s14  ;;  %s3039_s24 = sadd.s32 4294967294, %s3481_s22  }
  0x11   : > { %5756 = sst [smem:[#allocation16_spill]] %s3461_s17  ;;  %s34_s25 = sadd.s32 1, %s3473_s20 }
  0x12   : > { %s41_s26 = sadd.s32 1, %s3477_s21  ;;  %p35_p0 = scmp.ge.s32.totalorder %s34_s25, 2 }
  0x13   : > { %p5714_p1 = scmp.eq.s32.totalorder %s3481_s22, 0  ;;  %p5713_p2 = scmp.eq.s32.totalorder %s3598_s23, 0 }
  0x14   : > { %s80_s27 = sadd.s32 1, %s3449_s14  ;;  %s5920_s25 = smov (%p35_p0, %s34_s25), 0 }
  0x15   : > { %5757 = sst [smem:[#allocation17_spill]] %s5920_s25  ;;  %s5922_s26 = smov (!%p35_p0, %s41_s26), %s3477_s21 }
  0x16   : > { %s74_s28 = ssub.s32 %s3473_s20, %s5920_s25  ;;  %p87_p3 = scmp.ne.s32.totalorder %s3449_s14, %s3445_s13 }
  0x17   : > { %p43_p4 = scmp.ge.s32.totalorder %s5922_s26, 2  ;;  %p93_p5 = scmp.ne.s32.totalorder %s3445_s13, %s3441_s12 }
  0x18   : > { %p3617_p6 = por %p87_p3, %p5714_p1  ;;  %p151_p7 = scmp.eq.s32.totalorder %s3598_s23, 3 }
  0x19   : > { %s5924_s26 = smov (%p43_p4, %s5922_s26), 0  ;;  %p3626_p8 = por %p93_p5, %p5713_p2 }
  0x1a   : > { %5759 = sst [smem:[#allocation18_spill]] %s5924_s26  ;;  %p3630_p9 = por %p151_p7, %p87_p3 }
  0x1b   : > { %s5760_s30 = scalar_select %p3626_p8, 1, 0 }
  0x1c   : > { %s5761_s4 = scalar_select %p3630_p9, 1, 0 }
  0x1d   : > { %s3636_s5 = ssub.s32 %s3477_s21, %s5924_s26  ;;  %p157_p10 = scmp.eq.s32.totalorder %s3039_s24, 3 }
  0x1e   : > { %5762 = sst [smem:[#allocation19_spill]] %s5761_s4  ;;  %s75_s6 = sor.u32 %s74_s28, %s3636_s5 }
  0x1f   : > { %p78_p11 = scmp.eq.s32.totalorder %s75_s6, 0  ;;  %p3639_p12 = por %p157_p10, %p93_p5 }
  0x20   : > { %p5712_p13 = scmp.lt.s32.totalorder %s3481_s22, 4  ;;  %s201_s8 = sand.u32 1, %s3481_s22  }
  0x21   : > { %s5763_s7 = scalar_select %p3639_p12, 1, 0 }
  0x22   : > { %s3646_s9 = scalar_select %p78_p11, %s3449_s14, %s80_s27  }
  0x23   : > { %5764 = sst [smem:[#allocation20_spill]] %s5763_s7  ;;  %s203_s10 = sand.u32 1, %s3449_s14  }
  0x24   : > { %5765 = sst [smem:[#allocation21_spill]] %s3646_s9  ;;  %s3124_s11 = smul.u32 96, %s203_s10 }
  0x25   : > { %p3653_p0 = pnand %p5712_p13, %p3617_p6  ;;  %s3125_s24 = smul.u32 12, %s3473_s20 }
  0x26   : > { %s3126_s28 = smul.u32 24, %s3477_s21  ;;  %s205_s6 = scalar_lea.vmem [#allocation5], %s3124_s11 }
  0x27   : > { %s217_s26 = sshll.u32 %s205_s6, 4  ;;  %s5767_s1 = sld [smem:[#allocation35_spill]]  ;;  %s3659_s26 = int_to_ptr.vmem [resolvable:$true] %s217_s26 }
  0x28   : > { %s214_s12 = sadd.s32 %s3126_s28, %s3125_s24  ;;  %s3666_s29 = smul.u32 192, %s203_s10 }
  0x29   : > { %s3045_s7 = sshll.u32 %s214_s12, 7  ;;  %s3668_s3 = scalar_lea.sflag [#allocation6], %s201_s8 }
  0x2a   : > { %p5717_p4 = pneg %p3653_p0 }
  0x2d   : > { %s3664_s14 = scalar_lea.hbm %s5767_s1, %s3045_s7  ;;  %s3298_s7 = scalar_lea.hbm %s5767_s1, 6144 }
  0x2e   : > { %s3293_s4 = scalar_lea.hbm %s3664_s14, 1536  ;;  %p3299_p7 = scmp.lt.u32.totalorder %s3664_s14, %s5767_s1 }
  0x2f   : > { %p3294_p3 = scmp.ne.s32.totalorder %s3664_s14, %s3293_s4  ;;  %p3300_p10 = scmp.lt.u32.totalorder %s3298_s7, %s3293_s4 }
  0x30   : > { %p3302_p13 = scmp.lt.u32.totalorder %s3293_s4, %s3664_s14 }
  0x31   : > { %p3296_p5 = pnand %p5717_p4, %p3294_p3  ;;  %p3301_p11 = por %p3300_p10, %p3299_p7 }
  0x33   : > { %p3297_p6 = pneg %p3296_p5  ;;  %p3303_p2 = por %p3302_p13, %p3301_p11 }
  0x35   : > { %p3304_p1 = pnand %p3303_p2, %p3297_p6 }
  0x37   : > { %3307 = shalt.err (!%p3304_p1)
}
  0x38   : > { %s3308_s8 = scalar_lea.vmem %s3659_s26, 1536  ;;  %s3483_s10 = smov [#allocation5]  }
  0x39   : > { %p3309_p3 = scmp.ne.s32.totalorder %s3659_s26, %s3308_s8  ;;  %s3313_s28 = sshll.u32 %s3483_s10, 4  ;;  %s3314_s28 = int_to_ptr.vmem [resolvable:$false] %s3313_s28 }
  0x3a   : > { %s3315_s6 = scalar_lea.vmem %s3314_s28, 3072  ;;  %p3316_p9 = scmp.lt.s32.totalorder %s3659_s26, %s3314_s28 }
  0x3b   : > { %p3311_p5 = pnand %p3309_p3, %p5717_p4  ;;  %p3317_p7 = scmp.lt.s32.totalorder %s3315_s6, %s3308_s8 }
  0x3d   : > { %p3312_p12 = pneg %p3311_p5  ;;  %p3318_p10 = por %p3317_p7, %p3316_p9 }
  0x3f   : > { %p3319_p13 = pnand %p3318_p10, %p3312_p12 }
  0x41   : > { %3322 = shalt.err (!%p3319_p13)
}
  0x42   : > { %s5716_s4 = smov 384   ;;  %s5720_s27 = smov 24  }
  0x43   : > { %3155 = dma.hbm_to_vmem [thread:$0]  (!%p3653_p0), %s3664_s14, 1536, %s3659_s26, %s3668_s3, %s5716_s4, %s5716_s4, %s5720_s27  }
  0x44   : > { %p3047_p1 = scmp.ge.s32.totalorder %s3481_s22, 1  ;;  %p251_p2 = scmp.lt.s32.totalorder %s3481_s22, 5 }
  0x45   : > { %p48_p12 = scmp.eq.s32.totalorder %s3636_s5, 0  ;;  %s50_s9 = sadd.s32 1, %s3461_s17 }
  0x46   : > { %p3701_p9 = pnand %p3047_p1, %p251_p2  ;;  %p57_p6 = scmp.ne.s32.totalorder %s3461_s17, %s3457_s16 }
  0x47   : > { %p63_p11 = scmp.ne.s32.totalorder %s3457_s16, %s3453_s15  ;;  %p5770_p3 = scmp.eq.s32.totalorder %s3481_s22, 0 }
  0x48   : > { %s5768_s12 = scalar_select %p3701_p9, 1, 0 }
  0x49   : > { %s3712_s7 = scalar_select %p48_p12, %s3461_s17, %s50_s9  }
  0x4a   : > { %p59_p5 = por %p5770_p3, %p57_p6  ;;  %p5771_p7 = scmp.eq.s32.totalorder %s3598_s23, 0 }
  0x4b   : > { %5769 = sst [smem:[#allocation22_spill]] %s3712_s7  ;;  %s177_s14 = sand.u32 1, %s3461_s17  }
  0x4c   : > { %p3718_p10 = por %p5771_p7, %p63_p11  ;;  %s3123_s26 = sshll.u32 %s3477_s21, 8 }
  0x4d   : > { %s3042_s24 = sshll.u32 %s177_s14, 4  ;;  %s5773_s0 = sld [smem:[#allocation34_spill]] }
  0x4e   : > { %s5772_s11 = scalar_select %p3718_p10, 1, 0 }
  0x4f   : > { %s181_s15 = scalar_lea.vmem [#allocation2], %s3042_s24  ;;  %p5774_p13 = scmp.lt.s32.totalorder %s3481_s22, 4 }
  0x50   : > { %s191_s5 = sshll.u32 %s181_s15, 4  ;;  %s3737_s9 = scalar_lea.sflag [#allocation3], %s177_s14  ;;  %s3735_s5 = int_to_ptr.vmem [resolvable:$true] %s191_s5 }
  0x51   : > { %p3731_p1 = pnand %p5774_p13, %p59_p5 }
  0x53   : > { %s3727_s28 = scalar_lea.hbm %s5773_s0, %s3123_s26  ;;  %p3325_p12 = pneg %p3731_p1 }
  0x54   : > { %s3323_s8 = scalar_lea.hbm %s3727_s28, 256  ;;  %s3328_s10 = scalar_lea.hbm %s5773_s0, 512 }
  0x55   : > { %p3324_p2 = scmp.ne.s32.totalorder %s3727_s28, %s3323_s8  ;;  %p3329_p3 = scmp.lt.u32.totalorder %s3727_s28, %s5773_s0 }
  0x56   : > { %p3330_p5 = scmp.lt.u32.totalorder %s3328_s10, %s3323_s8  ;;  %p3332_p13 = scmp.lt.u32.totalorder %s3323_s8, %s3727_s28 }
  0x57   : > { %p3326_p6 = pnand %p3325_p12, %p3324_p2 }
  0x58   : > { %p3331_p7 = por %p3330_p5, %p3329_p3 }
  0x59   : > { %p3327_p11 = pneg %p3326_p6 }
  0x5a   : > { %p3333_p4 = por %p3332_p13, %p3331_p7 }
  0x5c   : > { %p3334_p8 = pnand %p3333_p4, %p3327_p11 }
  0x5e   : > { %3337 = shalt.err (!%p3334_p8)
}
  0x5f   : > { %s3338_s14 = scalar_lea.vmem %s3735_s5, 256  ;;  %s3486_s26 = smov [#allocation2]  }
  0x60   : > { %p3339_p2 = scmp.ne.s32.totalorder %s3735_s5, %s3338_s14  ;;  %s3343_s24 = sshll.u32 %s3486_s26, 4  ;;  %s3344_s24 = int_to_ptr.vmem [resolvable:$false] %s3343_s24 }
  0x61   : > { %s3345_s4 = scalar_lea.vmem %s3344_s24, 512  ;;  %p3346_p9 = scmp.lt.s32.totalorder %s3735_s5, %s3344_s24 }
  0x62   : > { %p3341_p6 = pnand %p3339_p2, %p3325_p12  ;;  %p3347_p3 = scmp.lt.s32.totalorder %s3345_s4, %s3338_s14 }
  0x64   : > { %p3342_p10 = pneg %p3341_p6  ;;  %p3348_p5 = por %p3347_p3, %p3346_p9 }
  0x66   : > { %p3349_p7 = pnand %p3348_p5, %p3342_p10 }
  0x68   : > { %3352 = shalt.err (!%p3349_p7)
}
  0x69   : > { %s3487_s8 = smov 128   ;;  %s3488_s10 = smov 8  }
  0x6a   : > { %3152 = dma.hbm_to_vmem [thread:$0]  (!%p3731_p1), %s3727_s28, 256, %s3735_s5, %s3737_s9, %s3487_s8, %s3487_s8, %s3488_s10  }
  0x6b   : > { %s3128_s15 = smul.u32 24, %s3473_s20  ;;  %s231_s26 = scalar_lea.vmem [#allocation7], %s3666_s29 }
  0x6c   : > { %s243_s27 = sshll.u32 %s231_s26, 4  ;;  %s3129_s24 = smul.u32 48, %s3477_s21  ;;  %s3768_s27 = int_to_ptr.vmem [resolvable:$true] %s243_s27 }
  0x6d   : > { %p5776_p4 = pneg %p3653_p0  ;;  %s3358_s5 = scalar_lea.hbm %s5703_s2, 12288 }
  0x6e   : > { %s240_s14 = sadd.s32 %s3129_s24, %s3128_s15 }
  0x6f   : > { %s3046_s4 = sshll.u32 %s240_s14, 7 }
  0x70   : > { %s3773_s7 = scalar_lea.hbm %s5703_s2, %s3046_s4 }
  0x71   : > { %s3353_s17 = scalar_lea.hbm %s3773_s7, 3072  ;;  %p3359_p1 = scmp.lt.u32.totalorder %s3773_s7, %s5703_s2 }
  0x72   : > { %p3354_p8 = scmp.ne.s32.totalorder %s3773_s7, %s3353_s17  ;;  %p3360_p12 = scmp.lt.u32.totalorder %s3358_s5, %s3353_s17 }
  0x73   : > { %p3362_p13 = scmp.lt.u32.totalorder %s3353_s17, %s3773_s7 }
  0x74   : > { %p3356_p9 = pnand %p3354_p8, %p5776_p4  ;;  %p3361_p11 = por %p3360_p12, %p3359_p1 }
  0x76   : > { %p3357_p10 = pneg %p3356_p9  ;;  %p3363_p2 = por %p3362_p13, %p3361_p11 }
  0x78   : > { %p3364_p6 = pnand %p3363_p2, %p3357_p10 }
  0x7a   : > { %3367 = shalt.err (!%p3364_p6)
}
  0x7b   : > { %s3368_s0 = scalar_lea.vmem %s3768_s27, 3072  ;;  %p5777_p5 = pmov %p5776_p4 }
  0x7c   : > { %p3369_p3 = scmp.ne.s32.totalorder %s3768_s27, %s3368_s0  ;;  %s3489_s1 = smov [#allocation7]  }
  0x7d   : > { %s3373_s8 = sshll.u32 %s3489_s1, 4  ;;  %s3374_s8 = int_to_ptr.vmem [resolvable:$false] %s3373_s8 }
  0x7e   : > { %p3371_p7 = pnand %p3369_p3, %p5777_p5  ;;  %s3375_s10 = scalar_lea.vmem %s3374_s8, 6144 }
  0x7f   : > { %p3376_p4 = scmp.lt.s32.totalorder %s3768_s27, %s3374_s8  ;;  %p3377_p9 = scmp.lt.s32.totalorder %s3375_s10, %s3368_s0 }
  0x80   : > { %p3372_p8 = pneg %p3371_p7 }
  0x81   : > { %p3378_p1 = por %p3377_p9, %p3376_p4 }
  0x83   : > { %p3379_p12 = pnand %p3378_p1, %p3372_p8 }
  0x85   : > { %3382 = shalt.err (!%p3379_p12)
}
  0x86   : > { %s5778_s17 = smov 24   ;;  %s5779_s15 = smov 384  }
  0x87   : > { %3158 = dma.hbm_to_vmem [thread:$0]  (!%p3653_p0), %s3773_s7, 3072, %s3768_s27, %s3668_s3, %s5779_s15, %s5779_s15, %s5778_s17  }
  0x88   : > { %p5780_p10 = scmp.ne.s32.totalorder %s5768_s12, 0 }
  0x8a   : > { %255 = sbr.rel (%p5780_p10) target bundleno = 687 (0x2af), region = 32 }
  0x91   : > { %s257_s26 = sand.u32 1, %s3457_s16   ;;  %p5781_p11 = scmp.ne.s32.totalorder %s5772_s11, 0 }
  0x92   : > { %s3048_s24 = sshll.u32 %s257_s26, 4  ;;  %s258_s14 = scalar_lea.sflag [#allocation3], %s257_s26 }
  0x93   : > { %s3805_s4 = scalar_lea.vmem [#allocation2], %s3048_s24 }
  0x94   : > { %3428 = dma.done.wait (%p5781_p11), %s258_s14, 256  }
  0x95   : > { %3430 = vsyncadd (%p5781_p11), %s258_s14, 4294967040  ;;  %s266_s25 = sand.u32 1, %s3598_s23   ;;  %s3813_s3 = sand.u32 1, %s3445_s13  }
  0x96   : > { %s3130_s27 = smul.u32 96, %s3813_s3  ;;  %s267_s12 = scalar_lea.sflag [#allocation6], %s266_s25 }
  0x97   : > { %p5782_p0 = scmp.ne.s32.totalorder %s5760_s30, 0 }
  0x98   : > { %s3816_s7 = scalar_lea.vmem [#allocation5], %s3130_s27 }
  0x99   : > { %3432 = dma.done.wait (%p5782_p0), %s267_s12, 4608  }
  0x9a   : > { %3434 = vsyncadd (%p5782_p0), %s267_s12, 4294962688  ;;  %v319_v0 = vlaneseq  ;;  %v3490_v1 = vmov 1983009808   ;;  %v316_v6 = vld [vmem:[%s3805_s4] sm:$0xff]  ;;  %s3491_s23 = smov 103   ;;  %s3492_s30 = smov 102  }
  0x9b   : > { %v337_v2 = vunpack.c.l.s4 %v3490_v1  ;;  %v335_v8 = vcombine.high %v316_v6, %v316_v6  ;;  %s3493_s11 = smov 101   ;;  %s3494_s29 = smov 79   ;;  %vm423_vm0 = vcmask 834560   ;;  %vm360_vm1 = vcmask 842752  }
  0x9c   : > { %v3822_v3 = vshrl.u32 %v319_v0, 7  ;;  %s3495_s28 = smov 78   ;;  %s3496_s5 = smov 77   ;;  %vm486_vm2 = vcmask 826368   ;;  %vm549_vm3 = vcmask 646144   ;;  %vm612_vm4 = vcmask 637952  }
  0x9d   : > { %v338_v4 = vunpack.c.0.s8 %v337_v2  ;;  %s3497_s6 = smov 55   ;;  %s3498_s9 = smov 54   ;;  %vm675_vm5 = vcmask 629760   ;;  %vm738_vm6 = vcmask 449536   ;;  %vm801_vm7 = vcmask 441344  }
  0x9e   : > { %s3499_s0 = smov 53   ;;  %s3500_s1 = smov 127   ;;  %v3962_v14 = vsub.s32 0, %v3822_v3  ;;  %v3974_v20 = vsub.s32 1, %v3822_v3  ;;  %v3983_v24 = vsub.s32 2, %v3822_v3  ;;  %vm864_vm8 = vcmask 433152  }
  0x9f   : > { %v3825_v5 = vsub.s32 %v338_v4, %v3822_v3  ;;  %s3501_s8 = smov 126   ;;  %s3502_s10 = smov 125   ;;  %vm971_vm9 = vcmask 1039360   ;;  %vm5743_vm10 = vcmask 1031168   ;;  %vm5744_vm11 = vcmask 1022976  }
  0xa0   : > { %s3503_s17 = smov 124   ;;  %s3504_s15 = smov 104   ;;  %vm5745_vm12 = vcmask 1014784   ;;  %vm5746_vm13 = vcmask 850944   ;;  %vm5747_vm14 = vcmask 818176   ;;  %vm5748_vm15 = vcmask 654336  }
  0xa1   : > { %5783 = vst [vmem:[#allocation23_spill] sm:$0xff] %v3825_v5  ;;  %v3829_v7 = vrot.slane %v316_v6, %v3825_v5  ;;  %v3834_v9 = vrot.slane %v335_v8, %v3825_v5  ;;  %s3131_s26 = smul.u32 192, %s3813_s3  ;;  %s3505_s24 = smov 100  }
  0xa2   : > { %s3506_s25 = smov 80   ;;  %s5734_s27 = smov 76  }
  0xa3   : > { %352 = vrot.lane.b32.xlu0 %v3829_v7, %s3491_s23  ;;  %356 = vrot.lane.b32.xlu1 %v3834_v9, %s3491_s23  ;;  %v3840_v10 = vcombine.high %v3829_v7, %v3829_v7  ;;  %v3848_v11 = vcombine.high %v3834_v9, %v3834_v9  ;;  %s3964_s14 = scalar_lea.vmem [#allocation7], %s3131_s26  ;;  %s5722_s12 = smov 56  }
  0xa4   : > { %v3051_v15 = vld [vmem:[%s3964_s14 + $0x7] ss:$8 sm:$0x7]  ;;  %v3049_v16 = vld [vmem:[%s3964_s14 + $0x6] ss:$8 sm:$0x7] }
  0xa5   : > { %v442_v18 = vrot.slane %v3051_v15, %v3962_v14  ;;  %v379_v21 = vrot.slane %v3049_v16, %v3962_v14  ;;  %v383_v27 = vrot.slane %v3049_v16, %v3974_v20  ;;  %v446_v30 = vrot.slane %v3051_v15, %v3974_v20  ;;  %v3053_v38 = vld [vmem:[%s3964_s14 + $0x18] ss:$8 sm:$0x7]  ;;  %v3055_v56 = vld [vmem:[%s3964_s14 + $0x1b] ss:$8 sm:$0x7] }
  0xa6   : > { %v387_v33 = vrot.slane %v3049_v16, %v3983_v24  ;;  %v450_v35 = vrot.slane %v3051_v15, %v3983_v24  ;;  %v505_v47 = vrot.slane %v3053_v38, %v3962_v14  ;;  %v509_v50 = vrot.slane %v3053_v38, %v3974_v20  ;;  %v3057_v15 = vld [vmem:[%s3964_s14 + $0x1c] ss:$8 sm:$0x7]  ;;  %s5732_s26 = smov 52  }
  0xa7   : > { %415 = vrot.lane.b32.xlu0 %v3829_v7, %s3492_s30  ;;  %417 = vrot.lane.b32.xlu1 %v3840_v10, %s3492_s30  ;;  %v513_v54 = vrot.slane %v3053_v38, %v3983_v24  ;;  %v568_v0 = vrot.slane %v3055_v56, %v3962_v14  ;;  %v572_v3 = vrot.slane %v3055_v56, %v3974_v20 }
  0xab   : > { %354 = vrot.lane.b32.xlu0 %v3840_v10, %s3491_s23  ;;  %358 = vrot.lane.b32.xlu1 %v3848_v11, %s3491_s23 }
  0xaf   : > { %419 = vrot.lane.b32.xlu0 %v3834_v9, %s3492_s30  ;;  %421 = vrot.lane.b32.xlu1 %v3848_v11, %s3492_s30 }
  0xb3   : > { %478 = vrot.lane.b32.xlu0 %v3829_v7, %s3493_s11  ;;  %480 = vrot.lane.b32.xlu1 %v3840_v10, %s3493_s11 }
  0xb7   : > { %482 = vrot.lane.b32.xlu0 %v3834_v9, %s3493_s11  ;;  %484 = vrot.lane.b32.xlu1 %v3848_v11, %s3493_s11 }
  0xbb   : > { %541 = vrot.lane.b32.xlu0 %v3829_v7, %s3494_s29  ;;  %543 = vrot.lane.b32.xlu1 %v3840_v10, %s3494_s29 }
  0xbf   : > { %545 = vrot.lane.b32.xlu0 %v3834_v9, %s3494_s29  ;;  %547 = vrot.lane.b32.xlu1 %v3848_v11, %s3494_s29 }
  0xc3   : > { %604 = vrot.lane.b32.xlu0 %v3829_v7, %s3495_s28  ;;  %606 = vrot.lane.b32.xlu1 %v3840_v10, %s3495_s28 }
  0xc7   : > { %608 = vrot.lane.b32.xlu0 %v3834_v9, %s3495_s28  ;;  %610 = vrot.lane.b32.xlu1 %v3848_v11, %s3495_s28 }
  0xcb   : > { %667 = vrot.lane.b32.xlu0 %v3829_v7, %s3496_s5  ;;  %669 = vrot.lane.b32.xlu1 %v3840_v10, %s3496_s5 }
  0xcf   : > { %671 = vrot.lane.b32.xlu0 %v3834_v9, %s3496_s5  ;;  %673 = vrot.lane.b32.xlu1 %v3848_v11, %s3496_s5 }
  0xd3   : > { %730 = vrot.lane.b32.xlu0 %v3829_v7, %s3497_s6  ;;  %732 = vrot.lane.b32.xlu1 %v3840_v10, %s3497_s6 }
  0xd7   : > { %734 = vrot.lane.b32.xlu0 %v3834_v9, %s3497_s6  ;;  %736 = vrot.lane.b32.xlu1 %v3848_v11, %s3497_s6 }
  0xdb   : > { %793 = vrot.lane.b32.xlu0 %v3829_v7, %s3498_s9  ;;  %795 = vrot.lane.b32.xlu1 %v3840_v10, %s3498_s9 }
  0xdf   : > { %797 = vrot.lane.b32.xlu0 %v3834_v9, %s3498_s9  ;;  %799 = vrot.lane.b32.xlu1 %v3848_v11, %s3498_s9 }
  0xe3   : > { %856 = vrot.lane.b32.xlu0 %v3829_v7, %s3499_s0  ;;  %858 = vrot.lane.b32.xlu1 %v3840_v10, %s3499_s0 }
  0xe7   : > { %860 = vrot.lane.b32.xlu0 %v3834_v9, %s3499_s0  ;;  %862 = vrot.lane.b32.xlu1 %v3848_v11, %s3499_s0 }
  0xeb   : > { %963 = vrot.lane.b32.xlu0 %v3829_v7, %s3500_s1  ;;  %965 = vrot.lane.b32.xlu1 %v3840_v10, %s3500_s1 }
  0xef   : > { %967 = vrot.lane.b32.xlu0 %v3834_v9, %s3500_s1  ;;  %969 = vrot.lane.b32.xlu1 %v3848_v11, %s3500_s1 }
  0xf3   : > { %1002 = vrot.lane.b32.xlu0 %v3829_v7, %s3501_s8  ;;  %1004 = vrot.lane.b32.xlu1 %v3840_v10, %s3501_s8 }
  0xf7   : > { %1006 = vrot.lane.b32.xlu0 %v3834_v9, %s3501_s8  ;;  %1008 = vrot.lane.b32.xlu1 %v3848_v11, %s3501_s8 }
  0xfb   : > { %1041 = vrot.lane.b32.xlu0 %v3829_v7, %s3502_s10  ;;  %1043 = vrot.lane.b32.xlu1 %v3840_v10, %s3502_s10 }
  0xff   : > { %1045 = vrot.lane.b32.xlu0 %v3834_v9, %s3502_s10  ;;  %1047 = vrot.lane.b32.xlu1 %v3848_v11, %s3502_s10 }
 0x103   : > { %1080 = vrot.lane.b32.xlu0 %v3829_v7, %s3503_s17  ;;  %1082 = vrot.lane.b32.xlu1 %v3840_v10, %s3503_s17 }
 0x107   : > { %1084 = vrot.lane.b32.xlu0 %v3834_v9, %s3503_s17  ;;  %1086 = vrot.lane.b32.xlu1 %v3848_v11, %s3503_s17 }
 0x10b   : > { %1119 = vrot.lane.b32.xlu0 %v3829_v7, %s3504_s15  ;;  %1121 = vrot.lane.b32.xlu1 %v3840_v10, %s3504_s15 }
 0x10f   : > { %1123 = vrot.lane.b32.xlu0 %v3834_v9, %s3504_s15  ;;  %1125 = vrot.lane.b32.xlu1 %v3848_v11, %s3504_s15 }
 0x113   : > { %1158 = vrot.lane.b32.xlu0 %v3829_v7, %s3505_s24  ;;  %1160 = vrot.lane.b32.xlu1 %v3840_v10, %s3505_s24 }
 0x115   : > { %v353_v12 = vpop.permute.xlu0 %352  ;;  %v357_v13 = vpop.permute.xlu1 %356 }
 0x117   : > { %1162 = vrot.lane.b32.xlu0 %v3834_v9, %s3505_s24  ;;  %1164 = vrot.lane.b32.xlu1 %v3848_v11, %s3505_s24 }
 0x119   : > { %v416_v17 = vpop.permute.xlu0 %415  ;;  %v418_v19 = vpop.permute.xlu1 %417 }
 0x11a   : > { %v3978_v22 = vsel %vm423_vm0, %v416_v17, %v418_v19 }
 0x11b   : > { %1197 = vrot.lane.b32.xlu0 %v3829_v7, %s3506_s25  ;;  %1199 = vrot.lane.b32.xlu1 %v3840_v10, %s3506_s25  ;;  %v454_v26 = vmul.f32 %v442_v18, %v3978_v22 }
 0x11d   : > { %v355_v23 = vpop.permute.xlu0 %354  ;;  %v359_v29 = vpop.permute.xlu1 %358 }
 0x11e   : > { %v3986_v25 = vsel %vm360_vm1, %v353_v12, %v355_v23  ;;  %v3995_v31 = vsel %vm360_vm1, %v355_v23, %v357_v13  ;;  %v4002_v36 = vsel %vm360_vm1, %v357_v13, %v359_v29  ;;  %v576_v12 = vrot.slane %v3055_v56, %v3983_v24 }
 0x11f   : > { %v391_v28 = vmul.f32 %v379_v21, %v3986_v25  ;;  %1201 = vrot.lane.b32.xlu0 %v3834_v9, %s3506_s25  ;;  %1203 = vrot.lane.b32.xlu1 %v3848_v11, %s3506_s25  ;;  %v392_v39 = vmul.f32 %v383_v27, %v3995_v31  ;;  %v393_v43 = vmul.f32 %v387_v33, %v4002_v36 }
 0x120   : > { %v631_v27 = vrot.slane %v3057_v15, %v3962_v14 }
 0x121   : > { %v457_v32 = vadd.f32 %v454_v26, %v391_v28  ;;  %v420_v34 = vpop.permute.xlu0 %419  ;;  %v422_v41 = vpop.permute.xlu1 %421 }
 0x122   : > { %v4005_v37 = vsel %vm423_vm0, %v418_v19, %v420_v34  ;;  %v4013_v42 = vsel %vm423_vm0, %v420_v34, %v422_v41  ;;  %v4086_v41 = vld [vmem:[%s3816_s7] ss:$8 sm:$0x7] }
 0x123   : > { %v455_v40 = vmul.f32 %v446_v30, %v4005_v37  ;;  %1236 = vrot.lane.b32.xlu0 %v3829_v7, %s5734_s27  ;;  %v456_v45 = vmul.f32 %v450_v35, %v4013_v42  ;;  %1238 = vrot.lane.b32.xlu1 %v3840_v10, %s5734_s27  ;;  %v635_v30 = vrot.slane %v3057_v15, %v3974_v20 }
 0x124   : > { %v639_v35 = vrot.slane %v3057_v15, %v3983_v24  ;;  %v326_v56 = vrot.slane %v4086_v41, %v3974_v20 }
 0x125   : > { %v458_v44 = vadd.f32 %v455_v40, %v392_v39  ;;  %v479_v46 = vpop.permute.xlu0 %478  ;;  %v459_v48 = vadd.f32 %v456_v45, %v393_v43  ;;  %v481_v49 = vpop.permute.xlu1 %480  ;;  %v3059_v39 = vld [vmem:[%s3964_s14 + $0x1d] ss:$8 sm:$0x7]  ;;  %v4083_v40 = vld [vmem:[%s3816_s7 + $0x1] ss:$8 sm:$0x7] }
 0x126   : > { %v4024_v51 = vsel %vm486_vm2, %v479_v46, %v481_v49 }
 0x127   : > { %1240 = vrot.lane.b32.xlu0 %v3834_v9, %s5734_s27  ;;  %v517_v52 = vmul.f32 %v505_v47, %v4024_v51  ;;  %1242 = vrot.lane.b32.xlu1 %v3848_v11, %s5734_s27  ;;  %v4095_v47 = vld [vmem:[%s3816_s7 + $0x2] ss:$8 sm:$0x7] }
 0x129   : > { %v483_v53 = vpop.permute.xlu0 %482  ;;  %v520_v57 = vadd.f32 %v517_v52, %v457_v32  ;;  %v485_v59 = vpop.permute.xlu1 %484  ;;  %v694_v52 = vrot.slane %v3059_v39, %v3962_v14 }
 0x12a   : > { %v4031_v55 = vsel %vm486_vm2, %v481_v49, %v483_v53  ;;  %v4038_v60 = vsel %vm486_vm2, %v483_v53, %v485_v59  ;;  %v403_v53 = vrot.slane %v4083_v40, %v3962_v14  ;;  %v330_v59 = vrot.slane %v4086_v41, %v3983_v24 }
 0x12b   : > { %v518_v58 = vmul.f32 %v509_v50, %v4031_v55  ;;  %1275 = vrot.lane.b32.xlu0 %v3829_v7, %s5722_s12  ;;  %v519_v62 = vmul.f32 %v513_v54, %v4038_v60  ;;  %1277 = vrot.lane.b32.xlu1 %v3840_v10, %s5722_s12  ;;  %v322_v54 = vrot.slane %v4086_v41, %v3962_v14 }
 0x12d   : > { %v521_v61 = vadd.f32 %v518_v58, %v458_v44  ;;  %v542_v63 = vpop.permute.xlu0 %541  ;;  %v522_v1 = vadd.f32 %v519_v62, %v459_v48  ;;  %v544_v2 = vpop.permute.xlu1 %543  ;;  %v4110_v58 = vld [vmem:[%s3816_s7 + $0x3] ss:$8 sm:$0x7]  ;;  %v4117_v62 = vld [vmem:[%s3816_s7 + $0x4] ss:$8 sm:$0x7] }
 0x12e   : > { %v4048_v4 = vsel %vm549_vm3, %v542_v63, %v544_v2  ;;  %v529_v15 = vrot.slane %v4110_v58, %v3962_v14 }
 0x12f   : > { %1279 = vrot.lane.b32.xlu0 %v3834_v9, %s5722_s12  ;;  %v580_v6 = vmul.f32 %v568_v0, %v4048_v4  ;;  %1281 = vrot.lane.b32.xlu1 %v3848_v11, %s5722_s12  ;;  %s5724_s12 = smov 32  }
 0x131   : > { %v546_v8 = vpop.permute.xlu0 %545  ;;  %v583_v16 = vadd.f32 %v580_v6, %v520_v57  ;;  %v548_v18 = vpop.permute.xlu1 %547  ;;  %v407_v57 = vrot.slane %v4083_v40, %v3974_v20  ;;  %v474_v6 = vrot.slane %v4095_v47, %v3983_v24 }
 0x132   : > { %v4055_v13 = vsel %vm549_vm3, %v544_v2, %v546_v8  ;;  %v4062_v19 = vsel %vm549_vm3, %v546_v8, %v548_v18  ;;  %v466_v2 = vrot.slane %v4095_v47, %v3962_v14  ;;  %v4129_v8 = vld [vmem:[%s3816_s7 + $0x5] ss:$8 sm:$0x7] }
 0x133   : > { %v581_v17 = vmul.f32 %v572_v3, %v4055_v13  ;;  %1314 = vrot.lane.b32.xlu0 %v3829_v7, %s5732_s26  ;;  %v582_v23 = vmul.f32 %v576_v12, %v4062_v19  ;;  %1316 = vrot.lane.b32.xlu1 %v3840_v10, %s5732_s26  ;;  %v470_v3 = vrot.slane %v4095_v47, %v3974_v20 }
 0x135   : > { %v584_v21 = vadd.f32 %v581_v17, %v521_v61  ;;  %v605_v26 = vpop.permute.xlu0 %604  ;;  %v585_v28 = vadd.f32 %v582_v23, %v522_v1  ;;  %v607_v29 = vpop.permute.xlu1 %606  ;;  %v411_v61 = vrot.slane %v4083_v40, %v3983_v24  ;;  %v698_v1 = vrot.slane %v3059_v39, %v3974_v20  ;;  %v4143_v23 = vld [vmem:[%s3816_s7 + $0x6] ss:$8 sm:$0x7] }
 0x136   : > { %v4072_v32 = vsel %vm612_vm4, %v605_v26, %v607_v29  ;;  %v495_v40 = vmul.f32 %v4038_v60, %v474_v6 }
 0x137   : > { %1318 = vrot.lane.b32.xlu0 %v3834_v9, %s5732_s26  ;;  %v643_v33 = vmul.f32 %v631_v27, %v4072_v32  ;;  %1320 = vrot.lane.b32.xlu1 %v3848_v11, %s5732_s26  ;;  %s3132_s26 = smul.u32 24, %s3813_s3 }
 0x139   : > { %v609_v34 = vpop.permute.xlu0 %608  ;;  %v646_v43 = vadd.f32 %v643_v33, %v583_v16  ;;  %v611_v45 = vpop.permute.xlu1 %610  ;;  %v533_v16 = vrot.slane %v4110_v58, %v3974_v20  ;;  %v431_v33 = vmul.f32 %v4005_v37, %v407_v57  ;;  %v369_v37 = vmul.f32 %v4002_v36, %v330_v59  ;;  %s4381_s27 = scalar_lea.vmem [#allocation8], %s3132_s26 }
 0x13a   : > { %v4079_v38 = vsel %vm612_vm4, %v607_v29, %v609_v34  ;;  %v4092_v46 = vsel %vm612_vm4, %v609_v34, %v611_v45  ;;  %v556_v57 = vmul.f32 %v4048_v4, %v529_v15 }
 0x13b   : > { %v644_v44 = vmul.f32 %v635_v30, %v4079_v38  ;;  %1353 = vrot.lane.b32.xlu0 %v3829_v7, %s5724_s12  ;;  %v645_v49 = vmul.f32 %v639_v35, %v4092_v46  ;;  %1355 = vrot.lane.b32.xlu1 %v3840_v10, %s5724_s12  ;;  %v3061_v30 = vld [vmem:[%s3964_s14 + $0x30] ss:$8 sm:$0x7]  ;;  %v557_v47 = vmul.f32 %v4055_v13, %v533_v16 }
 0x13c   : > { %v765_v45 = vrot.slane %v3061_v30, %v3983_v24  ;;  %v5785_v13 = vrot.slane %v4117_v62, %v3962_v14 }
 0x13d   : > { %v647_v48 = vadd.f32 %v644_v44, %v584_v21  ;;  %v668_v50 = vpop.permute.xlu0 %667  ;;  %v648_v63 = vadd.f32 %v645_v49, %v585_v28  ;;  %v670_v0 = vpop.permute.xlu1 %669  ;;  %v702_v21 = vrot.slane %v3059_v39, %v3983_v24  ;;  %v757_v49 = vrot.slane %v3061_v30, %v3962_v14 }
 0x13e   : > { %v4132_v12 = vsel %vm675_vm5, %v668_v50, %v670_v0  ;;  %v367_v28 = vmul.f32 %v3986_v25, %v322_v54  ;;  %v432_v54 = vmul.f32 %v4013_v42, %v411_v61  ;;  %v493_v25 = vmul.f32 %v4024_v51, %v466_v2 }
 0x13f   : > { %1357 = vrot.lane.b32.xlu0 %v3834_v9, %s5724_s12  ;;  %v706_v17 = vmul.f32 %v694_v52, %v4132_v12  ;;  %1359 = vrot.lane.b32.xlu1 %v3848_v11, %s5724_s12  ;;  %s5726_s12 = smov 31   ;;  %v4172_v52 = vld [vmem:[%s3816_s7 + $0x7] ss:$8 sm:$0x7]  ;;  %v494_v42 = vmul.f32 %v4031_v55, %v470_v3  ;;  %v5784_v3 = vrot.slane %v4110_v58, %v3983_v24 }
 0x140   : > { %v435_v4 = vadd.f32 %v432_v54, %v369_v37  ;;  %v619_v16 = vmul.f32 %v4072_v32, %v5785_v13  ;;  %v5787_v32 = vrot.slane %v4117_v62, %v3983_v24  ;;  %v5791_v37 = vrot.slane %v4143_v23, %v3962_v14 }
 0x141   : > { %v672_v18 = vpop.permute.xlu0 %671  ;;  %v709_v35 = vadd.f32 %v706_v17, %v646_v43  ;;  %v674_v44 = vpop.permute.xlu1 %673  ;;  %v558_v6 = vmul.f32 %v4062_v19, %v5784_v3  ;;  %v5786_v19 = vrot.slane %v4117_v62, %v3974_v20  ;;  %v5797_v13 = vrot.slane %v4172_v52, %v3983_v24 }
 0x142   : > { %v4152_v29 = vsel %vm675_vm5, %v670_v0, %v672_v18  ;;  %v4167_v50 = vsel %vm675_vm5, %v672_v18, %v674_v44  ;;  %v4175_v0 = vld [vmem:[%s3964_s14 + $0x31] ss:$8 sm:$0x7]  ;;  %v761_v44 = vrot.slane %v3061_v30, %v3974_v20 }
 0x143   : > { %v707_v39 = vmul.f32 %v698_v1, %v4152_v29  ;;  %1392 = vrot.lane.b32.xlu0 %v3829_v7, %s5726_s12  ;;  %v708_v17 = vmul.f32 %v702_v21, %v4167_v50  ;;  %1394 = vrot.lane.b32.xlu1 %v3840_v10, %s5726_s12  ;;  %v820_v18 = vrot.slane %v4175_v0, %v3962_v14 }
 0x145   : > { %v710_v1 = vadd.f32 %v707_v39, %v647_v48  ;;  %v731_v34 = vpop.permute.xlu0 %730  ;;  %v4188_v48 = vld [vmem:[%s3816_s7 + $0x18] ss:$8 sm:$0x7]  ;;  %v711_v21 = vadd.f32 %v708_v17, %v648_v63  ;;  %v733_v39 = vpop.permute.xlu1 %732  ;;  %v824_v63 = vrot.slane %v4175_v0, %v3974_v20 }
 0x146   : > { %v4198_v43 = vsel %vm738_vm6, %v731_v34, %v733_v39  ;;  %v430_v34 = vmul.f32 %v3978_v22, %v403_v53  ;;  %v848_v59 = vrot.slane %v4188_v48, %v3974_v20 }
 0x147   : > { %1396 = vrot.lane.b32.xlu0 %v3834_v9, %s5726_s12  ;;  %v769_v17 = vmul.f32 %v757_v49, %v4198_v43  ;;  %1398 = vrot.lane.b32.xlu1 %v3848_v11, %s5726_s12  ;;  %v368_v49 = vmul.f32 %v3995_v31, %v326_v56  ;;  %s5728_s12 = smov 30   ;;  %v4234_v56 = vld [vmem:[%s3964_s14 + $0x32] ss:$8 sm:$0x7] }
 0x148   : > { %v433_v26 = vadd.f32 %v430_v34, %v367_v28  ;;  %v883_v60 = vrot.slane %v4234_v56, %v3962_v14 }
 0x149   : > { %v735_v27 = vpop.permute.xlu0 %734  ;;  %v772_v22 = vadd.f32 %v769_v17, %v709_v35  ;;  %v737_v31 = vpop.permute.xlu1 %736  ;;  %v434_v55 = vadd.f32 %v431_v33, %v368_v49  ;;  %v498_v35 = vadd.f32 %v495_v40, %v435_v4  ;;  %v5788_v17 = vrot.slane %v4129_v8, %v3962_v14 }
 0x14a   : > { %v740_v30 = vsel %vm738_vm6, %v733_v39, %v735_v27  ;;  %v741_v51 = vsel %vm738_vm6, %v735_v27, %v737_v31  ;;  %v496_v2 = vadd.f32 %v493_v25, %v433_v26  ;;  %v887_v26 = vrot.slane %v4234_v56, %v3974_v20 }
 0x14b   : > { %v770_v53 = vmul.f32 %v761_v44, %v740_v30  ;;  %1431 = vrot.lane.b32.xlu0 %v3829_v7, %s5728_s12  ;;  %v771_v61 = vmul.f32 %v765_v45, %v741_v51  ;;  %1433 = vrot.lane.b32.xlu1 %v3840_v10, %s5728_s12  ;;  %v497_v28 = vadd.f32 %v494_v42, %v434_v55 }
 0x14c   : > { %v559_v58 = vadd.f32 %v556_v57, %v496_v2  ;;  %v620_v45 = vmul.f32 %v4079_v38, %v5786_v19  ;;  %v621_v39 = vmul.f32 %v4092_v46, %v5787_v32  ;;  %v682_v25 = vmul.f32 %v4132_v12, %v5788_v17 }
 0x14d   : > { %v773_v41 = vadd.f32 %v770_v53, %v710_v1  ;;  %v794_v36 = vpop.permute.xlu0 %793  ;;  %v774_v15 = vadd.f32 %v771_v61, %v711_v21  ;;  %v796_v27 = vpop.permute.xlu1 %795  ;;  %v560_v21 = vadd.f32 %v557_v47, %v497_v28  ;;  %v561_v34 = vadd.f32 %v558_v6, %v498_v35  ;;  %v3082_v28 = vld [vmem:[%s3805_s4 + $0x8] sm:$0xff] }
 0x14e   : > { %v802_v33 = vsel %vm801_vm7, %v794_v36, %v796_v27  ;;  %v5789_v38 = vrot.slane %v4129_v8, %v3974_v20  ;;  %v622_v62 = vadd.f32 %v619_v16, %v559_v58  ;;  %v5790_v31 = vrot.slane %v4129_v8, %v3983_v24 }
 0x14f   : > { %1435 = vrot.lane.b32.xlu0 %v3834_v9, %s5728_s12  ;;  %v832_v1 = vmul.f32 %v820_v18, %v802_v33  ;;  %1437 = vrot.lane.b32.xlu1 %v3848_v11, %s5728_s12  ;;  %s5730_s12 = smov 29   ;;  %v745_v42 = vmul.f32 %v4198_v43, %v5791_v37  ;;  %v5793_v61 = vrot.slane %v4175_v0, %v3983_v24 }
 0x150   : > { %v683_v18 = vmul.f32 %v4152_v29, %v5789_v38  ;;  %v684_v12 = vmul.f32 %v4167_v50, %v5790_v31  ;;  %v624_v50 = vadd.f32 %v621_v39, %v561_v34  ;;  %v685_v55 = vadd.f32 %v682_v25, %v622_v62 }
 0x151   : > { %v798_v44 = vpop.permute.xlu0 %797  ;;  %v835_v49 = vadd.f32 %v832_v1, %v772_v22  ;;  %v800_v46 = vpop.permute.xlu1 %799  ;;  %v623_v22 = vadd.f32 %v620_v45, %v560_v21  ;;  %v5794_v43 = vrot.slane %v4143_v23, %v3983_v24  ;;  %v5795_v4 = vrot.slane %v4172_v52, %v3962_v14 }
 0x152   : > { %v803_v54 = vsel %vm801_vm7, %v796_v27, %v798_v44  ;;  %v804_v29 = vsel %vm801_vm7, %v798_v44, %v800_v46  ;;  %v852_v27 = vrot.slane %v4188_v48, %v3983_v24  ;;  %v891_v1 = vrot.slane %v4234_v56, %v3983_v24 }
 0x153   : > { %v833_v53 = vmul.f32 %v824_v63, %v803_v54  ;;  %1470 = vrot.lane.b32.xlu0 %v3829_v7, %s5730_s12  ;;  %v5792_v63 = vrot.slane %v4143_v23, %v3974_v20  ;;  %v834_v8 = vmul.f32 %v5793_v61, %v804_v29  ;;  %1472 = vrot.lane.b32.xlu1 %v3840_v10, %s5730_s12 }
 0x154   : > { %v747_v47 = vmul.f32 %v741_v51, %v5794_v43  ;;  %v808_v2 = vmul.f32 %v802_v33, %v5795_v4  ;;  %v687_v23 = vadd.f32 %v684_v12, %v624_v50  ;;  %v748_v51 = vadd.f32 %v745_v42, %v685_v55 }
 0x155   : > { %v746_v40 = vmul.f32 %v740_v30, %v5792_v63  ;;  %v836_v57 = vadd.f32 %v833_v53, %v773_v41  ;;  %v857_v36 = vpop.permute.xlu0 %856  ;;  %v686_v30 = vadd.f32 %v683_v18, %v623_v22  ;;  %v5796_v41 = vrot.slane %v4172_v52, %v3974_v20  ;;  %v859_v6 = vpop.permute.xlu1 %858 }
 0x156   : > { %v837_v3 = vadd.f32 %v834_v8, %v774_v15  ;;  %v810_v16 = vmul.f32 %v804_v29, %v5797_v13  ;;  %v865_v33 = vsel %vm864_vm8, %v857_v36, %v859_v6  ;;  %v5798_v15 = vrot.slane %v4188_v48, %v3962_v14 }
 0x157   : > { %v809_v0 = vmul.f32 %v803_v54, %v5796_v41  ;;  %1474 = vrot.lane.b32.xlu0 %v3834_v9, %s5730_s12  ;;  %v749_v35 = vadd.f32 %v746_v40, %v686_v30  ;;  %v895_v19 = vmul.f32 %v883_v60, %v865_v33  ;;  %1476 = vrot.lane.b32.xlu1 %v3848_v11, %s5730_s12  ;;  %s3514_s12 = smov 28  }
 0x158   : > { %v871_v58 = vmul.f32 %v865_v33, %v5798_v15  ;;  %v750_v44 = vadd.f32 %v747_v47, %v687_v23  ;;  %v811_v21 = vadd.f32 %v808_v2, %v748_v51  ;;  %v4341_v32 = vrot.slane %v3082_v28, %v3825_v5 }
 0x159   : > { %v861_v45 = vpop.permute.xlu0 %860  ;;  %v812_v39 = vadd.f32 %v809_v0, %v749_v35  ;;  %v4343_v17 = vadd.f32 %v895_v19, %v835_v49  ;;  %v863_v56 = vpop.permute.xlu1 %862  ;;  %v1594_v18 = vcombine.high %v3082_v28, %v3082_v28  ;;  %v901_v19 = vld [vmem:[%s3805_s4] sm:$0x3f] }
 0x15a   : > { %v866_v52 = vsel %vm864_vm8, %v859_v6, %v861_v45  ;;  %v813_v54 = vadd.f32 %v810_v16, %v750_v44  ;;  %v874_v34 = vadd.f32 %v871_v58, %v811_v21  ;;  %v867_v38 = vsel %vm864_vm8, %v861_v45, %v863_v56 }
 0x15b   : > { %v872_v60 = vmul.f32 %v866_v52, %v848_v59  ;;  %v896_v25 = vmul.f32 %v887_v26, %v866_v52  ;;  %1509 = vrot.lane.b32.xlu0 %v3829_v7, %s3514_s12  ;;  %v873_v49 = vmul.f32 %v867_v38, %v852_v27  ;;  %v897_v62 = vmul.f32 %v891_v1, %v867_v38  ;;  %v902_v1 = vld [vmem:[%s3964_s14] ss:$8 sm:$0x7] }
 0x15c   : > { %1511 = vrot.lane.b32.xlu1 %v3840_v10, %s3514_s12  ;;  %v4372_v10 = vcombine.high %v4341_v32, %v4341_v32  ;;  %v4375_v29 = vrot.slane %v1594_v18, %v3825_v5  ;;  %v927_v44 = vrot.slane %v901_v19, %v3825_v5  ;;  %v920_v21 = vcombine.high %v901_v19, %v901_v19  ;;  %v4520_v18 = vld [vmem:[%s3964_s14 + $0x1] ss:$8 sm:$0x7] }
 0x15d   : > { %v875_v53 = vadd.f32 %v872_v60, %v812_v39  ;;  %v4351_v46 = vadd.f32 %v896_v25, %v836_v57  ;;  %v4353_v31 = vpop.permute.xlu0 %963  ;;  %v876_v59 = vadd.f32 %v873_v49, %v813_v54  ;;  %v4358_v7 = vadd.f32 %v897_v62, %v837_v3  ;;  %v4362_v26 = vpop.permute.xlu1 %965 }
 0x15e   : > { %v907_v60 = vrot.slane %v902_v1, %v3962_v14  ;;  %v911_v25 = vrot.slane %v902_v1, %v3974_v20  ;;  %v935_v56 = vcombine.high %v927_v44, %v927_v44  ;;  %v915_v54 = vrot.slane %v902_v1, %v3983_v24 }
 0x15f   : > { %v1533_v48 = vcombine.low %v874_v34, %v875_v53  ;;  %1513 = vrot.lane.b32.xlu0 %v3834_v9, %s3514_s12  ;;  %v1547_v37 = vrot.slane %v876_v59, %v3825_v5  ;;  %v934_v34 = vrot.slane %v920_v21, %v3825_v5  ;;  %v4523_v53 = vld [vmem:[%s3964_s14 + $0x2] ss:$8 sm:$0x7]  ;;  %v951_v59 = vrot.slane %v4520_v18, %v3962_v14 }
 0x160   : > { %1515 = vrot.lane.b32.xlu1 %v3848_v11, %s3514_s12  ;;  %v4390_v11 = vcombine.high %v4375_v29, %v4375_v29  ;;  %v939_v62 = vmul.f32 %v927_v44, %v907_v60  ;;  %v955_v1 = vrot.slane %v4520_v18, %v3974_v20  ;;  %v959_v44 = vrot.slane %v4520_v18, %v3983_v24  ;;  %v4552_v60 = vld [vmem:[%s3964_s14 + $0x5] ss:$8 sm:$0x7] }
 0x161   : > { %v1540_v12 = vrot.slane %v1533_v48, %v3825_v5  ;;  %v4366_v42 = vpop.permute.xlu0 %967  ;;  %v4379_v9 = vpop.permute.xlu1 %969  ;;  %v4530_v48 = vld [vmem:[%s3964_s14 + $0x3] ss:$8 sm:$0x7]  ;;  %v990_v21 = vrot.slane %v4523_v53, %v3962_v14 }
 0x162   : > { %v973_v5 = vsel %vm971_vm9, %v4362_v26, %v4366_v42 }
 0x163   : > { %v1548_v22 = vcombine.low %v1540_v12, %v1547_v37  ;;  %1611 = vrot.lane.b32.xlu0 %v4341_v32, %s3491_s23  ;;  %v4534_v12 = vmul.f32 %v935_v56, %v911_v25  ;;  %v4536_v37 = vmul.f32 %v934_v34, %v915_v54  ;;  %v994_v25 = vrot.slane %v4523_v53, %v3974_v20  ;;  %v4561_v34 = vld [vmem:[%s3964_s14 + $0x19] ss:$8 sm:$0x7]  ;;  %v4574_v54 = vld [vmem:[%s3964_s14 + $0x1a] ss:$8 sm:$0x7] }
 0x164   : > { %1613 = vrot.lane.b32.xlu1 %v4372_v10, %s3491_s23  ;;  %v4601_v56 = vld [vmem:[%s3964_s14 + $0x1f] ss:$8 sm:$0x7] }
 0x165   : > { %1550 = vst [vmem:[%s4381_s27] sm:$0x3f] %v1548_v22  ;;  %v4384_v63 = vpop.permute.xlu0 %1002  ;;  %v4394_v40 = vpop.permute.xlu1 %1004  ;;  %v4539_v22 = vld [vmem:[%s3964_s14 + $0x4] ss:$8 sm:$0x7] }
 0x167   : > { %1615 = vrot.lane.b32.xlu0 %v4375_v29, %s3491_s23 }
 0x168   : > { %1617 = vrot.lane.b32.xlu1 %v4390_v11, %s3491_s23  ;;  %s5841_s23 = smov 76  }
 0x169   : > { %v4396_v57 = vpop.permute.xlu0 %1006  ;;  %v4402_v61 = vpop.permute.xlu1 %1008 }
 0x16b   : > { %1674 = vrot.lane.b32.xlu0 %v4341_v32, %s3492_s30 }
 0x16c   : > { %1676 = vrot.lane.b32.xlu1 %v4372_v10, %s3492_s30 }
 0x16d   : > { %v4404_v8 = vpop.permute.xlu0 %1041  ;;  %v4410_v36 = vpop.permute.xlu1 %1043 }
 0x16f   : > { %1678 = vrot.lane.b32.xlu0 %v4375_v29, %s3492_s30 }
 0x170   : > { %1680 = vrot.lane.b32.xlu1 %v4390_v11, %s3492_s30  ;;  %s5842_s30 = smov 56  }
 0x171   : > { %v4412_v50 = vpop.permute.xlu0 %1045  ;;  %v4418_v55 = vpop.permute.xlu1 %1047 }
 0x173   : > { %1736 = vrot.lane.b32.xlu0 %v4341_v32, %s3493_s11 }
 0x174   : > { %1738 = vrot.lane.b32.xlu1 %v4372_v10, %s3493_s11 }
 0x175   : > { %v4420_v43 = vpop.permute.xlu0 %1080  ;;  %v4426_v47 = vpop.permute.xlu1 %1082 }
 0x177   : > { %1740 = vrot.lane.b32.xlu0 %v4375_v29, %s3493_s11 }
 0x178   : > { %1742 = vrot.lane.b32.xlu1 %v4390_v11, %s3493_s11  ;;  %s5843_s11 = smov 52  }
 0x179   : > { %v4428_v4 = vpop.permute.xlu0 %1084  ;;  %v4434_v2 = vpop.permute.xlu1 %1086 }
 0x17b   : > { %1798 = vrot.lane.b32.xlu0 %v4341_v32, %s3494_s29 }
 0x17c   : > { %1800 = vrot.lane.b32.xlu1 %v4372_v10, %s3494_s29 }
 0x17d   : > { %v4436_v30 = vpop.permute.xlu0 %1119  ;;  %v4442_v41 = vpop.permute.xlu1 %1121 }
 0x17f   : > { %1802 = vrot.lane.b32.xlu0 %v4375_v29, %s3494_s29 }
 0x180   : > { %1804 = vrot.lane.b32.xlu1 %v4390_v11, %s3494_s29  ;;  %s5844_s29 = smov 32  }
 0x181   : > { %v4444_v0 = vpop.permute.xlu0 %1123  ;;  %v4450_v3 = vpop.permute.xlu1 %1125 }
 0x183   : > { %1860 = vrot.lane.b32.xlu0 %v4341_v32, %s3495_s28 }
 0x184   : > { %1862 = vrot.lane.b32.xlu1 %v4372_v10, %s3495_s28 }
 0x185   : > { %v4452_v6 = vpop.permute.xlu0 %1158  ;;  %v4458_v27 = vpop.permute.xlu1 %1160 }
 0x187   : > { %1864 = vrot.lane.b32.xlu0 %v4375_v29, %s3495_s28 }
 0x188   : > { %1866 = vrot.lane.b32.xlu1 %v4390_v11, %s3495_s28  ;;  %s5845_s28 = smov 31  }
 0x189   : > { %v4460_v28 = vpop.permute.xlu0 %1162  ;;  %v4466_v23 = vpop.permute.xlu1 %1164 }
 0x18b   : > { %1922 = vrot.lane.b32.xlu0 %v4341_v32, %s3496_s5 }
 0x18c   : > { %1924 = vrot.lane.b32.xlu1 %v4372_v10, %s3496_s5 }
 0x18d   : > { %v4468_v51 = vpop.permute.xlu0 %1197  ;;  %v4474_v13 = vpop.permute.xlu1 %1199 }
 0x18f   : > { %1926 = vrot.lane.b32.xlu0 %v4375_v29, %s3496_s5 }
 0x190   : > { %1928 = vrot.lane.b32.xlu1 %v4390_v11, %s3496_s5  ;;  %s2811_s5 = scalar_lea.sflag [#allocation4], %s3813_s3 }
 0x191   : > { %v4476_v16 = vpop.permute.xlu0 %1201  ;;  %v4482_v33 = vpop.permute.xlu1 %1203 }
 0x193   : > { %1984 = vrot.lane.b32.xlu0 %v4341_v32, %s3497_s6 }
 0x194   : > { %1986 = vrot.lane.b32.xlu1 %v4372_v10, %s3497_s6 }
 0x195   : > { %v4484_v35 = vpop.permute.xlu0 %1236  ;;  %v4490_v15 = vpop.permute.xlu1 %1238 }
 0x197   : > { %1988 = vrot.lane.b32.xlu0 %v4375_v29, %s3497_s6 }
 0x198   : > { %1990 = vrot.lane.b32.xlu1 %v4390_v11, %s3497_s6 }
 0x199   : > { %v4492_v58 = vpop.permute.xlu0 %1240  ;;  %v4499_v45 = vpop.permute.xlu1 %1242 }
 0x19a   : > { %5799 = vst [vmem:[#allocation24_spill] sm:$0xff] %v4492_v58  ;;  %5800 = vst [vmem:[#allocation25_spill] sm:$0xff] %v4499_v45  ;;  %v4633_v58 = vld [vmem:[%s3964_s14 + $0x33] ss:$8 sm:$0x7] }
 0x19b   : > { %2046 = vrot.lane.b32.xlu0 %v4341_v32, %s3498_s9 }
 0x19c   : > { %2048 = vrot.lane.b32.xlu1 %v4372_v10, %s3498_s9 }
 0x19d   : > { %v4503_v52 = vpop.permute.xlu0 %1275  ;;  %v4509_v39 = vpop.permute.xlu1 %1277 }
 0x19e   : > { %5801 = vst [vmem:[#allocation26_spill] sm:$0xff] %v4503_v52  ;;  %5802 = vst [vmem:[#allocation27_spill] sm:$0xff] %v4509_v39 }
 0x19f   : > { %2050 = vrot.lane.b32.xlu0 %v4375_v29, %s3498_s9 }
 0x1a0   : > { %2052 = vrot.lane.b32.xlu1 %v4390_v11, %s3498_s9 }
 0x1a1   : > { %v4515_v38 = vpop.permute.xlu0 %1279  ;;  %v4527_v49 = vpop.permute.xlu1 %1281 }
 0x1a2   : > { %5803 = vst [vmem:[#allocation28_spill] sm:$0xff] %v4515_v38  ;;  %5804 = vst [vmem:[#allocation29_spill] sm:$0xff] %v4527_v49  ;;  %v972_v49 = vsel %vm971_vm9, %v4353_v31, %v4362_v26  ;;  %v979_v26 = vmul.f32 %v973_v5, %v955_v1  ;;  %v1013_v38 = vsel %vm5743_vm10, %v4396_v57, %v4402_v61  ;;  %v4664_v61 = vld [vmem:[%s3964_s14 + $0x34] ss:$8 sm:$0x7] }
 0x1a3   : > { %2108 = vrot.lane.b32.xlu0 %v4341_v32, %s3499_s0  ;;  %v978_v39 = vmul.f32 %v972_v49, %v951_v59  ;;  %v1302_v5 = vrot.slane %v4633_v58, %v3962_v14 }
 0x1a4   : > { %2110 = vrot.lane.b32.xlu1 %v4372_v10, %s3499_s0 }
 0x1a5   : > { %v4541_v19 = vpop.permute.xlu0 %1314  ;;  %v4565_v18 = vpop.permute.xlu1 %1316 }
 0x1a6   : > { %5805 = vst [vmem:[#allocation30_spill] sm:$0xff] %v4541_v19  ;;  %5806 = vst [vmem:[#allocation31_spill] sm:$0xff] %v4565_v18  ;;  %v4585_v19 = vld [vmem:[%s3964_s14 + $0x1e] ss:$8 sm:$0x7] }
 0x1a7   : > { %2112 = vrot.lane.b32.xlu0 %v4375_v29, %s3499_s0  ;;  %v1224_v31 = vrot.slane %v4585_v19, %v3962_v14 }
 0x1a8   : > { %2114 = vrot.lane.b32.xlu1 %v4390_v11, %s3499_s0 }
 0x1a9   : > { %v4587_v52 = vpop.permute.xlu0 %1318  ;;  %v4613_v18 = vpop.permute.xlu1 %1320 }
 0x1aa   : > { %5807 = vst [vmem:[#allocation32_spill] sm:$0xff] %v4587_v52  ;;  %5808 = vst [vmem:[#allocation33_spill] sm:$0xff] %v4613_v18  ;;  %v974_v52 = vsel %vm971_vm9, %v4366_v42, %v4379_v9  ;;  %v1011_v18 = vsel %vm5743_vm10, %v4384_v63, %v4394_v40  ;;  %v942_v9 = vadd.f32 %v939_v62, %v4343_v17 }
 0x1ab   : > { %2214 = vrot.lane.b32.xlu0 %v4341_v32, %s3500_s1  ;;  %v1012_v63 = vsel %vm5743_vm10, %v4394_v40, %v4396_v57  ;;  %v980_v45 = vmul.f32 %v974_v52, %v959_v44  ;;  %v1050_v17 = vsel %vm5744_vm11, %v4404_v8, %v4410_v36  ;;  %v943_v62 = vadd.f32 %v4534_v12, %v4351_v46 }
 0x1ac   : > { %2216 = vrot.lane.b32.xlu1 %v4372_v10, %s3500_s1  ;;  %v1017_v59 = vmul.f32 %v1011_v18, %v990_v21  ;;  %v1306_v57 = vrot.slane %v4633_v58, %v3974_v20  ;;  %v981_v52 = vadd.f32 %v978_v39, %v942_v9  ;;  %v944_v8 = vadd.f32 %v4536_v37, %v4358_v7 }
 0x1ad   : > { %v4635_v42 = vpop.permute.xlu0 %1353  ;;  %v4655_v40 = vpop.permute.xlu1 %1355  ;;  %v1018_v1 = vmul.f32 %v1012_v63, %v994_v25  ;;  %v1051_v44 = vsel %vm5744_vm11, %v4410_v36, %v4412_v50  ;;  %v5809_v46 = vrot.slane %v4523_v53, %v3983_v24  ;;  %v5810_v39 = vrot.slane %v4530_v48, %v3962_v14 }
 0x1ae   : > { %v1052_v7 = vsel %vm5744_vm11, %v4412_v50, %v4418_v55  ;;  %v1089_v36 = vsel %vm5745_vm12, %v4420_v43, %v4426_v47  ;;  %vm5749_vm10 = vcmask 621568   ;;  %v982_v37 = vadd.f32 %v979_v26, %v943_v62 }
 0x1af   : > { %2218 = vrot.lane.b32.xlu0 %v4375_v29, %s3500_s1  ;;  %v1019_v12 = vmul.f32 %v1013_v38, %v5809_v46  ;;  %v1056_v21 = vmul.f32 %v1050_v17, %v5810_v39  ;;  %v983_v25 = vadd.f32 %v980_v45, %v944_v8  ;;  %v1310_v53 = vrot.slane %v4633_v58, %v3983_v24 }
 0x1b0   : > { %2220 = vrot.lane.b32.xlu1 %v4390_v11, %s3500_s1  ;;  %v1341_v38 = vrot.slane %v4664_v61, %v3962_v14  ;;  %v1020_v50 = vadd.f32 %v1017_v59, %v981_v52  ;;  %v5811_v55 = vrot.slane %v4530_v48, %v3974_v20  ;;  %v1090_v45 = vsel %vm5745_vm12, %v4426_v47, %v4428_v4 }
 0x1b1   : > { %v4671_v49 = vpop.permute.xlu0 %1357  ;;  %v4693_v18 = vpop.permute.xlu1 %1359  ;;  %v1091_v26 = vsel %vm5745_vm12, %v4428_v4, %v4434_v2  ;;  %vm1283_vm11 = vcmask 457728   ;;  %v5812_v9 = vrot.slane %v4530_v48, %v3983_v24  ;;  %v5813_v59 = vrot.slane %v4539_v22, %v3962_v14  ;;  %v4720_v4 = vld [vmem:[%s3964_s14 + $0x35] ss:$8 sm:$0x7] }
 0x1b2   : > { %v1057_v43 = vmul.f32 %v1051_v44, %v5811_v55  ;;  %v1128_v62 = vsel %vm5746_vm13, %v4436_v30, %v4442_v41  ;;  %v1345_v47 = vrot.slane %v4664_v61, %v3974_v20  ;;  %v1021_v2 = vadd.f32 %v1018_v1, %v982_v37 }
 0x1b3   : > { %2252 = vrot.lane.b32.xlu0 %v4341_v32, %s3501_s8  ;;  %v1058_v63 = vmul.f32 %v1052_v7, %v5812_v9  ;;  %v1095_v17 = vmul.f32 %v1089_v36, %v5813_v59  ;;  %v1022_v48 = vadd.f32 %v1019_v12, %v983_v25  ;;  %v1059_v8 = vadd.f32 %v1056_v21, %v1020_v50 }
 0x1b4   : > { %2254 = vrot.lane.b32.xlu1 %v4372_v10, %s3501_s8  ;;  %v1129_v44 = vsel %vm5746_vm13, %v4442_v41, %v4444_v0  ;;  %v5814_v30 = vrot.slane %v4539_v22, %v3974_v20  ;;  %v5815_v39 = vrot.slane %v4539_v22, %v3983_v24  ;;  %v1130_v36 = vsel %vm5746_vm13, %v4444_v0, %v4450_v3 }
 0x1b5   : > { %v4715_v52 = vpop.permute.xlu0 %1392  ;;  %v1167_v1 = vsel %vm5747_vm14, %v4452_v6, %v4458_v27  ;;  %vm5750_vm12 = vcmask 424960   ;;  %v4739_v41 = vpop.permute.xlu1 %1394  ;;  %v1060_v12 = vadd.f32 %v1057_v43, %v1021_v2  ;;  %v5816_v22 = vrot.slane %v4552_v60, %v3962_v14 }
 0x1b6   : > { %v1096_v46 = vmul.f32 %v1090_v45, %v5814_v30  ;;  %v1097_v7 = vmul.f32 %v1091_v26, %v5815_v39  ;;  %v1349_v37 = vrot.slane %v4664_v61, %v3983_v24  ;;  %v1380_v0 = vrot.slane %v4720_v4, %v3962_v14 }
 0x1b7   : > { %2256 = vrot.lane.b32.xlu0 %v4375_v29, %s3501_s8  ;;  %v1134_v21 = vmul.f32 %v1128_v62, %v5816_v22  ;;  %v1061_v3 = vadd.f32 %v1058_v63, %v1022_v48  ;;  %v1098_v6 = vadd.f32 %v1095_v17, %v1059_v8  ;;  %v5817_v25 = vrot.slane %v4552_v60, %v3974_v20  ;;  %v4771_v17 = vld [vmem:[%s3964_s14 + $0x36] ss:$8 sm:$0x7] }
 0x1b8   : > { %v1168_v55 = vsel %vm5747_vm14, %v4458_v27, %v4460_v28  ;;  %vm1361_vm13 = vcmask 261120   ;;  %2258 = vrot.lane.b32.xlu1 %v4390_v11, %s3501_s8  ;;  %v5818_v45 = vrot.slane %v4552_v60, %v3983_v24  ;;  %v5819_v9 = vrot.slane %v4561_v34, %v3962_v14  ;;  %v5823_v22 = vld [vmem:[#allocation24_spill] sm:$0xff] }
 0x1b9   : > { %v1135_v50 = vmul.f32 %v1129_v44, %v5817_v25  ;;  %v4754_v43 = vpop.permute.xlu0 %1396  ;;  %v1169_v59 = vsel %vm5747_vm14, %v4460_v28, %v4466_v23  ;;  %v1206_v27 = vsel %vm5748_vm15, %v4468_v51, %v4474_v13  ;;  %v1099_v62 = vadd.f32 %v1096_v46, %v1060_v12  ;;  %v4779_v8 = vpop.permute.xlu1 %1398 }
 0x1ba   : > { %v1136_v26 = vmul.f32 %v1130_v36, %v5818_v45  ;;  %v1173_v63 = vmul.f32 %v1167_v1, %v5819_v9  ;;  %v1100_v2 = vadd.f32 %v1097_v7, %v1061_v3  ;;  %v1384_v60 = vrot.slane %v4720_v4, %v3974_v20  ;;  %v5827_v9 = vld [vmem:[#allocation27_spill] sm:$0xff] }
 0x1bb   : > { %2290 = vrot.lane.b32.xlu0 %v4341_v32, %s3502_s10  ;;  %v1388_v48 = vrot.slane %v4720_v4, %v3983_v24  ;;  %v1137_v28 = vadd.f32 %v1134_v21, %v1098_v6  ;;  %v5820_v23 = vrot.slane %v4561_v34, %v3974_v20  ;;  %v1207_v44 = vsel %vm5748_vm15, %v4474_v13, %v4476_v16 }
 0x1bc   : > { %v1208_v30 = vsel %vm5748_vm15, %v4476_v16, %v4482_v33  ;;  %vm1400_vm14 = vcmask 252928   ;;  %v5821_v46 = vrot.slane %v4561_v34, %v3983_v24  ;;  %v5822_v7 = vrot.slane %v4574_v54, %v3962_v14  ;;  %2292 = vrot.lane.b32.xlu1 %v4372_v10, %s3502_s10 }
 0x1bd   : > { %v1174_v51 = vmul.f32 %v1168_v55, %v5820_v23  ;;  %v1245_v1 = vsel %vm5749_vm10, %v4484_v35, %v4490_v15  ;;  %v4799_v12 = vpop.permute.xlu0 %1431  ;;  %v1419_v13 = vrot.slane %v4771_v17, %v3962_v14  ;;  %v1138_v16 = vadd.f32 %v1135_v50, %v1099_v62  ;;  %v5826_v55 = vld [vmem:[#allocation25_spill] sm:$0xff]  ;;  %v5828_v50 = vld [vmem:[#allocation26_spill] sm:$0xff] }
 0x1be   : > { %v1175_v39 = vmul.f32 %v1169_v59, %v5821_v46  ;;  %v1212_v36 = vmul.f32 %v1206_v27, %v5822_v7  ;;  %v1139_v33 = vadd.f32 %v1136_v26, %v1100_v2  ;;  %v1176_v34 = vadd.f32 %v1173_v63, %v1137_v28  ;;  %v4830_v62 = vld [vmem:[%s3964_s14 + $0x37] ss:$8 sm:$0x7] }
 0x1bf   : > { %v1246_v21 = vsel %vm5749_vm10, %v4490_v15, %v5823_v22  ;;  %v5824_v3 = vrot.slane %v4574_v54, %v3974_v20  ;;  %v5825_v6 = vrot.slane %v4574_v54, %v3983_v24  ;;  %v1247_v45 = vsel %vm5749_vm10, %v5823_v22, %v5826_v55  ;;  %2294 = vrot.lane.b32.xlu0 %v4375_v29, %s3502_s10  ;;  %v1434_v15 = vpop.permute.xlu1 %1433 }
 0x1c0   : > { %v1284_v26 = vsel %vm1283_vm11, %v5828_v50, %v5827_v9  ;;  %vm1439_vm15 = vcmask 244736   ;;  %v1177_v63 = vadd.f32 %v1174_v51, %v1138_v16  ;;  %v1251_v59 = vmul.f32 %v1245_v1, %v1224_v31  ;;  %2296 = vrot.lane.b32.xlu1 %v4390_v11, %s3502_s10  ;;  %v5833_v1 = vld [vmem:[#allocation29_spill] sm:$0xff] }
 0x1c1   : > { %v1213_v35 = vmul.f32 %v1207_v44, %v5824_v3  ;;  %v1214_v25 = vmul.f32 %v1208_v30, %v5825_v6  ;;  %v1423_v54 = vrot.slane %v4771_v17, %v3974_v20  ;;  %v1427_v27 = vrot.slane %v4771_v17, %v3983_v24  ;;  %v5830_v30 = vld [vmem:[#allocation28_spill] sm:$0xff]  ;;  %v1436_v46 = vpop.permute.xlu0 %1435 }
 0x1c2   : > { %v1178_v2 = vadd.f32 %v1175_v39, %v1139_v33  ;;  %v1215_v28 = vadd.f32 %v1212_v36, %v1176_v34  ;;  %v5829_v23 = vrot.slane %v4585_v19, %v3974_v20  ;;  %v1285_v51 = vsel %vm1283_vm11, %v5827_v9, %v5830_v30  ;;  %v5834_v33 = vld [vmem:[#allocation31_spill] sm:$0xff]  ;;  %v5835_v34 = vld [vmem:[#allocation30_spill] sm:$0xff]  ;;  %v5836_v6 = vld [vmem:[#allocation32_spill] sm:$0xff] }
 0x1c3   : > { %vm1478_vm10 = vcmask 236544   ;;  %v5831_v31 = vrot.slane %v4585_v19, %v3983_v24  ;;  %v5832_v39 = vrot.slane %v4601_v56, %v3962_v14  ;;  %v1286_v16 = vsel %vm1283_vm11, %v5830_v30, %v5833_v1  ;;  %2328 = vrot.lane.b32.xlu0 %v4341_v32, %s3503_s17  ;;  %v1438_v19 = vpop.permute.xlu1 %1437 }
 0x1c4   : > { %v1252_v44 = vmul.f32 %v1246_v21, %v5829_v23  ;;  %v1323_v22 = vsel %vm5750_vm12, %v5835_v34, %v5834_v33  ;;  %v1216_v21 = vadd.f32 %v1213_v35, %v1177_v63  ;;  %v1217_v3 = vadd.f32 %v1214_v25, %v1178_v2  ;;  %v5838_v23 = vld [vmem:[#allocation33_spill] sm:$0xff]  ;;  %2330 = vrot.lane.b32.xlu1 %v4372_v10, %s3503_s17 }
 0x1c5   : > { %v1253_v7 = vmul.f32 %v1247_v45, %v5831_v31  ;;  %v1290_v36 = vmul.f32 %v1284_v26, %v5832_v39  ;;  %v1324_v55 = vsel %vm5750_vm12, %v5834_v33, %v5836_v6  ;;  %v1458_v45 = vrot.slane %v4830_v62, %v3962_v14  ;;  %v3080_v33 = vld [vmem:[%s3964_s14 + $0x48] ss:$8 sm:$0x7] }
 0x1c6   : > { %v1254_v9 = vadd.f32 %v1251_v59, %v1215_v28  ;;  %v5837_v50 = vrot.slane %v4601_v56, %v3974_v20  ;;  %v1325_v35 = vsel %vm5750_vm12, %v5836_v6, %v5838_v23  ;;  %v1362_v25 = vsel %vm1361_vm13, %v4635_v42, %v4655_v40  ;;  %v1471_v28 = vpop.permute.xlu0 %1470 }
 0x1c7   : > { %v1255_v63 = vadd.f32 %v1252_v44, %v1216_v21  ;;  %v5839_v2 = vrot.slane %v4601_v56, %v3983_v24  ;;  %v1329_v59 = vmul.f32 %v1323_v22, %v1302_v5  ;;  %v1256_v31 = vadd.f32 %v1253_v7, %v1217_v3  ;;  %2332 = vrot.lane.b32.xlu0 %v4375_v29, %s3503_s17 }
 0x1c8   : > { %v1291_v26 = vmul.f32 %v1285_v51, %v5837_v50  ;;  %v1462_v51 = vrot.slane %v4830_v62, %v3974_v20  ;;  %v1293_v39 = vadd.f32 %v1290_v36, %v1254_v9  ;;  %v1330_v42 = vmul.f32 %v1324_v55, %v1306_v57  ;;  %2334 = vrot.lane.b32.xlu1 %v4390_v11, %s3503_s17 }
 0x1c9   : > { %v1292_v30 = vmul.f32 %v1286_v16, %v5839_v2  ;;  %v1363_v56 = vsel %vm1361_vm13, %v4655_v40, %v4671_v49  ;;  %v1331_v5 = vmul.f32 %v1325_v35, %v1310_v53  ;;  %v1368_v44 = vmul.f32 %v1362_v25, %v1341_v38  ;;  %v1473_v40 = vpop.permute.xlu1 %1472 }
 0x1ca   : > { %v1364_v7 = vsel %vm1361_vm13, %v4671_v49, %v4693_v18  ;;  %v1401_v57 = vsel %vm1400_vm14, %v4715_v52, %v4739_v41  ;;  %v1294_v36 = vadd.f32 %v1291_v26, %v1255_v63  ;;  %v1402_v58 = vsel %vm1400_vm14, %v4739_v41, %v4754_v43  ;;  %v1475_v1 = vpop.permute.xlu0 %1474 }
 0x1cb   : > { %v1466_v53 = vrot.slane %v4830_v62, %v3983_v24  ;;  %vm1517_vm12 = vcmask 228352   ;;  %v1295_v38 = vadd.f32 %v1292_v30, %v1256_v31  ;;  %v1332_v49 = vadd.f32 %v1329_v59, %v1293_v39  ;;  %2366 = vrot.lane.b32.xlu0 %v4341_v32, %s3504_s15 }
 0x1cc   : > { %v1369_v18 = vmul.f32 %v1363_v56, %v1345_v47  ;;  %v1403_v52 = vsel %vm1400_vm14, %v4754_v43, %v4779_v8  ;;  %v1370_v41 = vmul.f32 %v1364_v7, %v1349_v37  ;;  %v1407_v62 = vmul.f32 %v1401_v57, %v1380_v0  ;;  %2368 = vrot.lane.b32.xlu1 %v4372_v10, %s3504_s15 }
 0x1cd   : > { %v1440_v16 = vsel %vm1439_vm15, %v4799_v12, %v1434_v15  ;;  %v1441_v47 = vsel %vm1439_vm15, %v1434_v15, %v1436_v46  ;;  %v1333_v34 = vadd.f32 %v1330_v42, %v1294_v36  ;;  %v1334_v43 = vadd.f32 %v1331_v5, %v1295_v38  ;;  %v1477_v61 = vpop.permute.xlu1 %1476 }
 0x1ce   : > { %v1371_v8 = vadd.f32 %v1368_v44, %v1332_v49  ;;  %v1408_v22 = vmul.f32 %v1402_v58, %v1384_v60  ;;  %v1409_v37 = vmul.f32 %v1403_v52, %v1388_v48  ;;  %v1442_v0 = vsel %vm1439_vm15, %v1436_v46, %v1438_v19  ;;  %v1510_v6 = vpop.permute.xlu0 %1509  ;;  %v3084_v52 = vld [vmem:[%s3964_s14 + $0x66] ss:$8 sm:$0x7] }
 0x1cf   : > { %v1479_v12 = vsel %vm1478_vm10, %v1471_v28, %v1473_v40  ;;  %v1480_v15 = vsel %vm1478_vm10, %v1473_v40, %v1475_v1  ;;  %v1372_v21 = vadd.f32 %v1369_v18, %v1333_v34  ;;  %v1446_v3 = vmul.f32 %v1440_v16, %v1419_v13  ;;  %2370 = vrot.lane.b32.xlu0 %v4375_v29, %s3504_s15 }
 0x1d0   : > { %v1447_v60 = vmul.f32 %v1441_v47, %v1423_v54  ;;  %v1497_v4 = vrot.slane %v3080_v33, %v3962_v14  ;;  %v1373_v48 = vadd.f32 %v1370_v41, %v1334_v43  ;;  %v1410_v46 = vadd.f32 %v1407_v62, %v1371_v8  ;;  %2372 = vrot.lane.b32.xlu1 %v4390_v11, %s3504_s15 }
 0x1d1   : > { %v1481_v55 = vsel %vm1478_vm10, %v1475_v1, %v1477_v61  ;;  %v1501_v19 = vrot.slane %v3080_v33, %v3974_v20  ;;  %v1411_v9 = vadd.f32 %v1408_v22, %v1372_v21  ;;  %v1448_v13 = vmul.f32 %v1442_v0, %v1427_v27  ;;  %v1512_v54 = vpop.permute.xlu1 %1511  ;;  %v3086_v1 = vld [vmem:[%s3964_s14 + $0x67] ss:$8 sm:$0x7] }
 0x1d2   : > { %v1485_v50 = vmul.f32 %v1479_v12, %v1458_v45  ;;  %v1486_v26 = vmul.f32 %v1480_v15, %v1462_v51  ;;  %v1412_v23 = vadd.f32 %v1409_v37, %v1373_v48  ;;  %v1518_v35 = vsel %vm1517_vm12, %v1510_v6, %v1512_v54  ;;  %v1514_v28 = vpop.permute.xlu0 %1513 }
 0x1d3   : > { %v1505_v25 = vrot.slane %v3080_v33, %v3983_v24  ;;  %v1449_v63 = vadd.f32 %v1446_v3, %v1410_v46  ;;  %v1450_v2 = vadd.f32 %v1447_v60, %v1411_v9  ;;  %v1487_v30 = vmul.f32 %v1481_v55, %v1466_v53  ;;  %2404 = vrot.lane.b32.xlu0 %v4341_v32, %s3505_s24  ;;  %v5840_v53 = vld [vmem:[#allocation23_spill] sm:$0xff] }
 0x1d4   : > { %v1524_v59 = vmul.f32 %v1518_v35, %v1497_v4  ;;  %v1519_v17 = vsel %vm1517_vm12, %v1512_v54, %v1514_v28  ;;  %v1451_v27 = vadd.f32 %v1448_v13, %v1412_v23  ;;  %2406 = vrot.lane.b32.xlu1 %v4372_v10, %s3505_s24  ;;  %v1638_v16 = vrot.slane %v3084_v52, %v3962_v14  ;;  %v3088_v4 = vld [vmem:[%s3964_s14 + $0x78] ss:$8 sm:$0x7] }
 0x1d5   : > { %v1488_v45 = vadd.f32 %v1485_v50, %v1449_v63  ;;  %v1489_v51 = vadd.f32 %v1486_v26, %v1450_v2  ;;  %v1525_v31 = vmul.f32 %v1519_v17, %v1501_v19  ;;  %v1516_v39 = vpop.permute.xlu1 %1515  ;;  %v1700_v33 = vrot.slane %v3086_v1, %v3962_v14 }
 0x1d6   : > { %v1520_v42 = vsel %vm1517_vm12, %v1514_v28, %v1516_v39  ;;  %v1490_v56 = vadd.f32 %v1487_v30, %v1451_v27  ;;  %v1612_v57 = vpop.permute.xlu0 %1611  ;;  %v1642_v43 = vrot.slane %v3084_v52, %v3974_v20  ;;  %v1704_v22 = vrot.slane %v3086_v1, %v3974_v20  ;;  %v3090_v27 = vld [vmem:[%s3964_s14 + $0x7b] ss:$8 sm:$0x7] }
 0x1d7   : > { %v1527_v5 = vadd.f32 %v1524_v59, %v1488_v45  ;;  %v1528_v44 = vadd.f32 %v1525_v31, %v1489_v51  ;;  %v1526_v7 = vmul.f32 %v1520_v42, %v1505_v25  ;;  %2408 = vrot.lane.b32.xlu0 %v4375_v29, %s3505_s24  ;;  %v1646_v12 = vrot.slane %v3084_v52, %v3983_v24  ;;  %v3092_v52 = vld [vmem:[%s3964_s14 + $0x7c] ss:$8 sm:$0x7] }
 0x1d8   : > { %2410 = vrot.lane.b32.xlu1 %v4390_v11, %s3505_s24  ;;  %v1708_v3 = vrot.slane %v3086_v1, %v3983_v24  ;;  %v1762_v23 = vrot.slane %v3088_v4, %v3962_v14  ;;  %v1766_v63 = vrot.slane %v3088_v4, %v3974_v20  ;;  %v1770_v28 = vrot.slane %v3088_v4, %v3983_v24 }
 0x1d9   : > { %v1554_v40 = vcombine.low %v1527_v5, %v1528_v44  ;;  %v1529_v36 = vadd.f32 %v1526_v7, %v1490_v56  ;;  %v1614_v58 = vpop.permute.xlu1 %1613  ;;  %v1824_v44 = vrot.slane %v3090_v27, %v3962_v14 }
 0x1da   : > { %v1616_v18 = vpop.permute.xlu0 %1615  ;;  %v4974_v34 = vsel %vm360_vm1, %v1612_v57, %v1614_v58 }
 0x1db   : > { %v1561_v38 = vrot.slane %v1554_v40, %v5840_v53  ;;  %v1568_v49 = vrot.slane %v1529_v36, %v5840_v53  ;;  %2442 = vrot.lane.b32.xlu0 %v4341_v32, %s3506_s25  ;;  %v4981_v61 = vsel %vm360_vm1, %v1614_v58, %v1616_v18  ;;  %v1650_v0 = vmul.f32 %v1638_v16, %v4974_v34 }
 0x1dc   : > { %2444 = vrot.lane.b32.xlu1 %v4372_v10, %s3506_s25  ;;  %v1651_v48 = vmul.f32 %v1642_v43, %v4981_v61  ;;  %v1828_v40 = vrot.slane %v3090_v27, %v3974_v20 }
 0x1dd   : > { %v1569_v41 = vcombine.low %v1561_v38, %v1568_v49  ;;  %v1618_v62 = vpop.permute.xlu1 %1617  ;;  %v1832_v49 = vrot.slane %v3090_v27, %v3983_v24  ;;  %v5102_v27 = vld [vmem:[%s3816_s7 + $0x34] ss:$8 sm:$0x7] }
 0x1de   : > { %v1675_v47 = vpop.permute.xlu0 %1674  ;;  %v4993_v60 = vsel %vm360_vm1, %v1616_v18, %v1618_v62 }
 0x1df   : > { %3081 = vst [vmem:[%s4381_s27 + $0xc] sm:$0x3f] %v1569_v41  ;;  %2446 = vrot.lane.b32.xlu0 %v4375_v29, %s3506_s25  ;;  %v1652_v13 = vmul.f32 %v1646_v12, %v4993_v60  ;;  %v1890_v12 = vrot.slane %v3092_v52, %v3974_v20 }
 0x1e0   : > { %2448 = vrot.lane.b32.xlu1 %v4390_v11, %s3506_s25 }
 0x1e1   : > { %v1677_v8 = vpop.permute.xlu1 %1676 }
 0x1e2   : > { %v4984_v37 = vsel %vm423_vm0, %v1675_v47, %v1677_v8  ;;  %v1679_v21 = vpop.permute.xlu0 %1678 }
 0x1e3   : > { %v1712_v15 = vmul.f32 %v1700_v33, %v4984_v37  ;;  %v4996_v6 = vsel %vm423_vm0, %v1677_v8, %v1679_v21  ;;  %2480 = vrot.lane.b32.xlu0 %v4341_v32, %s5841_s23  ;;  %v1886_v8 = vrot.slane %v3092_v52, %v3962_v14 }
 0x1e4   : > { %v1713_v55 = vmul.f32 %v1704_v22, %v4996_v6  ;;  %2482 = vrot.lane.b32.xlu1 %v4372_v10, %s5841_s23 }
 0x1e5   : > { %v1715_v46 = vadd.f32 %v1712_v15, %v1650_v0  ;;  %v1681_v19 = vpop.permute.xlu1 %1680  ;;  %v5063_v15 = vld [vmem:[%s3816_s7 + $0x30] ss:$8 sm:$0x7] }
 0x1e6   : > { %v5004_v9 = vsel %vm423_vm0, %v1679_v21, %v1681_v19  ;;  %v1716_v50 = vadd.f32 %v1713_v55, %v1651_v48  ;;  %v1737_v54 = vpop.permute.xlu0 %1736  ;;  %v3094_v19 = vld [vmem:[%s3964_s14 + $0x7d] ss:$8 sm:$0x7]  ;;  %vm5872_vm0 = vcmask 1031168  }
 0x1e7   : > { %v1714_v26 = vmul.f32 %v1708_v3, %v5004_v9  ;;  %2484 = vrot.lane.b32.xlu0 %v4375_v29, %s5841_s23  ;;  %v5069_v3 = vld [vmem:[%s3816_s7 + $0x31] ss:$8 sm:$0x7]  ;;  %vm5873_vm1 = vmmov %vm5872_vm0 }
 0x1e8   : > { %2486 = vrot.lane.b32.xlu1 %v4390_v11, %s5841_s23 }
 0x1e9   : > { %v1717_v35 = vadd.f32 %v1714_v26, %v1652_v13  ;;  %v1739_v25 = vpop.permute.xlu1 %1738  ;;  %v1581_v13 = vrot.slane %v5063_v15, %v3962_v14 }
 0x1ea   : > { %v5015_v2 = vsel %vm486_vm2, %v1737_v54, %v1739_v25  ;;  %v1741_v59 = vpop.permute.xlu0 %1740 }
 0x1eb   : > { %v1774_v30 = vmul.f32 %v1762_v23, %v5015_v2  ;;  %v5022_v17 = vsel %vm486_vm2, %v1739_v25, %v1741_v59  ;;  %2518 = vrot.lane.b32.xlu0 %v4341_v32, %s5842_s30  ;;  %v1589_v25 = vrot.slane %v5063_v15, %v3983_v24 }
 0x1ec   : > { %v1775_v51 = vmul.f32 %v1766_v63, %v5022_v17  ;;  %2520 = vrot.lane.b32.xlu1 %v4372_v10, %s5842_s30  ;;  %v1662_v63 = vrot.slane %v5069_v3, %v3962_v14 }
 0x1ed   : > { %v1777_v45 = vadd.f32 %v1774_v30, %v1715_v46  ;;  %v1743_v31 = vpop.permute.xlu1 %1742  ;;  %v1894_v46 = vrot.slane %v3092_v52, %v3983_v24  ;;  %v5094_v30 = vld [vmem:[%s3816_s7 + $0x33] ss:$8 sm:$0x7]  ;;  %v1952_v52 = vrot.slane %v3094_v19, %v3974_v20 }
 0x1ee   : > { %v5029_v39 = vsel %vm486_vm2, %v1741_v59, %v1743_v31  ;;  %v1778_v42 = vadd.f32 %v1775_v51, %v1716_v50  ;;  %v1799_v5 = vpop.permute.xlu0 %1798  ;;  %v5082_v50 = vld [vmem:[%s3816_s7 + $0x32] ss:$8 sm:$0x7]  ;;  %vm5874_vm2 = vmmov %vm5872_vm0 }
 0x1ef   : > { %v1776_v56 = vmul.f32 %v1770_v28, %v5029_v39  ;;  %2522 = vrot.lane.b32.xlu0 %v4375_v29, %s5842_s30  ;;  %v1666_v28 = vrot.slane %v5069_v3, %v3974_v20 }
 0x1f0   : > { %2524 = vrot.lane.b32.xlu1 %v4390_v11, %s5842_s30 }
 0x1f1   : > { %v1779_v7 = vadd.f32 %v1776_v56, %v1717_v35  ;;  %v1801_v57 = vpop.permute.xlu1 %1800  ;;  %v1585_v35 = vrot.slane %v5063_v15, %v3974_v20  ;;  %v1670_v56 = vrot.slane %v5069_v3, %v3983_v24 }
 0x1f2   : > { %v5039_v36 = vsel %vm549_vm3, %v1799_v5, %v1801_v57  ;;  %v1803_v38 = vpop.permute.xlu0 %1802  ;;  %v1724_v5 = vrot.slane %v5082_v50, %v3962_v14 }
 0x1f3   : > { %v1836_v58 = vmul.f32 %v1824_v44, %v5039_v36  ;;  %v5046_v18 = vsel %vm549_vm3, %v1801_v57, %v1803_v38  ;;  %2556 = vrot.lane.b32.xlu0 %v4341_v32, %s5843_s11  ;;  %v1728_v44 = vrot.slane %v5082_v50, %v3974_v20  ;;  %v5117_v57 = vld [vmem:[%s3816_s7 + $0x35] ss:$8 sm:$0x7] }
 0x1f4   : > { %v1837_v41 = vmul.f32 %v1828_v40, %v5046_v18  ;;  %2558 = vrot.lane.b32.xlu1 %v4372_v10, %s5843_s11 }
 0x1f5   : > { %v1839_v1 = vadd.f32 %v1836_v58, %v1777_v45  ;;  %v1805_v62 = vpop.permute.xlu1 %1804 }
 0x1f6   : > { %v5053_v16 = vsel %vm549_vm3, %v1803_v38, %v1805_v62  ;;  %v1840_v47 = vadd.f32 %v1837_v41, %v1778_v42  ;;  %v1861_v43 = vpop.permute.xlu0 %1860  ;;  %v1948_v42 = vrot.slane %v3094_v19, %v3962_v14  ;;  %v5205_v41 = vld [vmem:[%s3805_s4 + $0x8] sm:$0x3f]  ;;  %s5846_s4 = smov 30   ;;  %vm5875_vm3 = vcmask 1022976  }
 0x1f7   : > { %v1838_v33 = vmul.f32 %v1832_v49, %v5053_v16  ;;  %2560 = vrot.lane.b32.xlu0 %v4375_v29, %s5843_s11 }
 0x1f8   : > { %2562 = vrot.lane.b32.xlu1 %v4390_v11, %s5843_s11 }
 0x1f9   : > { %v1841_v22 = vadd.f32 %v1838_v33, %v1779_v7  ;;  %v1863_v0 = vpop.permute.xlu1 %1862 }
 0x1fa   : > { %v5066_v21 = vsel %vm612_vm4, %v1861_v43, %v1863_v0  ;;  %v1865_v48 = vpop.permute.xlu0 %1864  ;;  %v5139_v43 = vld [vmem:[%s3964_s14 + $0x90] ss:$8 sm:$0x7] }
 0x1fb   : > { %v1898_v4 = vmul.f32 %v1886_v8, %v5066_v21  ;;  %v5076_v55 = vsel %vm612_vm4, %v1863_v0, %v1865_v48  ;;  %2594 = vrot.lane.b32.xlu0 %v4341_v32, %s5844_s29  ;;  %v5184_v8 = vld [vmem:[%s3964_s14 + $0x92] ss:$8 sm:$0x7] }
 0x1fc   : > { %v1899_v54 = vmul.f32 %v1890_v12, %v5076_v55  ;;  %2596 = vrot.lane.b32.xlu1 %v4372_v10, %s5844_s29 }
 0x1fd   : > { %v1901_v26 = vadd.f32 %v1898_v4, %v1839_v1  ;;  %v1867_v23 = vpop.permute.xlu1 %1866  ;;  %v5127_v1 = vld [vmem:[%s3816_s7 + $0x36] ss:$8 sm:$0x7]  ;;  %v1956_v4 = vrot.slane %v3094_v19, %v3983_v24 }
 0x1fe   : > { %v5097_v59 = vsel %vm612_vm4, %v1865_v48, %v1867_v23  ;;  %v1902_v45 = vadd.f32 %v1899_v54, %v1840_v47  ;;  %v1923_v31 = vpop.permute.xlu0 %1922  ;;  %v2010_v48 = vrot.slane %v5139_v43, %v3962_v14  ;;  %vm5876_vm4 = vmmov %vm5875_vm3 }
 0x1ff   : > { %v1900_v51 = vmul.f32 %v1894_v46, %v5097_v59  ;;  %2598 = vrot.lane.b32.xlu0 %v4375_v29, %s5844_s29 }
 0x200   : > { %2600 = vrot.lane.b32.xlu1 %v4390_v11, %s5844_s29 }
 0x201   : > { %v1903_v38 = vadd.f32 %v1900_v51, %v1841_v22  ;;  %v1925_v49 = vpop.permute.xlu1 %1924  ;;  %v5159_v51 = vld [vmem:[%s3816_s7 + $0x37] ss:$8 sm:$0x7]  ;;  %v2014_v22 = vrot.slane %v5139_v43, %v3974_v20 }
 0x202   : > { %v5136_v33 = vsel %vm675_vm5, %v1923_v31, %v1925_v49  ;;  %v1927_v12 = vpop.permute.xlu0 %1926  ;;  %v5162_v31 = vld [vmem:[%s3964_s14 + $0x91] ss:$8 sm:$0x7] }
 0x203   : > { %v1960_v0 = vmul.f32 %v1948_v42, %v5136_v33  ;;  %v5152_v46 = vsel %vm675_vm5, %v1925_v49, %v1927_v12  ;;  %2632 = vrot.lane.b32.xlu0 %v4341_v32, %s5845_s28 }
 0x204   : > { %v1961_v19 = vmul.f32 %v1952_v52, %v5152_v46  ;;  %v2018_v52 = vrot.slane %v5139_v43, %v3983_v24  ;;  %2634 = vrot.lane.b32.xlu1 %v4372_v10, %s5845_s28 }
 0x205   : > { %v1963_v42 = vadd.f32 %v1960_v0, %v1901_v26  ;;  %v1929_v49 = vpop.permute.xlu1 %1928  ;;  %v5181_v0 = vld [vmem:[%s3816_s7 + $0x48] ss:$8 sm:$0x7]  ;;  %s5857_s7 = smov 29  }
 0x206   : > { %v5172_v23 = vsel %vm675_vm5, %v1927_v12, %v1929_v49  ;;  %v1964_v47 = vadd.f32 %v1961_v19, %v1902_v45  ;;  %v1985_v62 = vpop.permute.xlu0 %1984  ;;  %v2072_v49 = vrot.slane %v5162_v31, %v3962_v14  ;;  %v5194_v26 = vld [vmem:[%s3964_s14 + $0x60] ss:$8 sm:$0x7]  ;;  %v1690_v45 = vmul.f32 %v5004_v9, %v1670_v56  ;;  %vm5877_vm5 = vmmov %vm5875_vm3 }
 0x207   : > { %v1962_v54 = vmul.f32 %v1956_v4, %v5172_v23  ;;  %2636 = vrot.lane.b32.xlu0 %v4375_v29, %s5845_s28  ;;  %v1688_v4 = vmul.f32 %v4984_v37, %v1662_v63  ;;  %v2158_v19 = vrot.slane %v5194_v26, %v3962_v14  ;;  %v5232_v37 = vrot.slane %v5205_v41, %v5840_v53 }
 0x208   : > { %2638 = vrot.lane.b32.xlu1 %v4390_v11, %s5845_s28  ;;  %v1625_v63 = vmul.f32 %v4974_v34, %v1581_v13  ;;  %v1750_v34 = vmul.f32 %v5015_v2, %v1724_v5  ;;  %v1751_v9 = vmul.f32 %v5022_v17, %v1728_v44  ;;  %v5847_v2 = vrot.slane %v5082_v50, %v3983_v24 }
 0x209   : > { %v1965_v12 = vadd.f32 %v1962_v54, %v1903_v38  ;;  %v1987_v58 = vpop.permute.xlu1 %1986  ;;  %v5848_v56 = vrot.slane %v5094_v30, %v3962_v14  ;;  %v5849_v17 = vrot.slane %v5094_v30, %v3974_v20  ;;  %v5281_v50 = vmul.f32 %v5232_v37, %v2158_v19 }
 0x20a   : > { %v1992_v38 = vsel %vm738_vm6, %v1985_v62, %v1987_v58  ;;  %v1989_v7 = vpop.permute.xlu0 %1988  ;;  %v1626_v62 = vmul.f32 %v4981_v61, %v1585_v35  ;;  %v1691_v35 = vadd.f32 %v1688_v4, %v1625_v63 }
 0x20b   : > { %v2022_v40 = vmul.f32 %v2010_v48, %v1992_v38  ;;  %v1689_v48 = vmul.f32 %v4996_v6, %v1666_v28  ;;  %v1993_v43 = vsel %vm738_vm6, %v1987_v58, %v1989_v7  ;;  %2670 = vrot.lane.b32.xlu0 %v4341_v32, %s5846_s4  ;;  %v1627_v6 = vmul.f32 %v4993_v60, %v1589_v25 }
 0x20c   : > { %v2023_v54 = vmul.f32 %v2014_v22, %v1993_v43  ;;  %v1752_v28 = vmul.f32 %v5029_v39, %v5847_v2  ;;  %v1812_v15 = vmul.f32 %v5039_v36, %v5848_v56  ;;  %2672 = vrot.lane.b32.xlu1 %v4372_v10, %s5846_s4  ;;  %v1813_v44 = vmul.f32 %v5046_v18, %v5849_v17 }
 0x20d   : > { %v2025_v13 = vadd.f32 %v2022_v40, %v1963_v42  ;;  %v1991_v61 = vpop.permute.xlu1 %1990  ;;  %v1692_v40 = vadd.f32 %v1689_v48, %v1626_v62  ;;  %v2162_v39 = vrot.slane %v5194_v26, %v3974_v20  ;;  %v1753_v36 = vadd.f32 %v1750_v34, %v1691_v35 }
 0x20e   : > { %v1994_v3 = vsel %vm738_vm6, %v1989_v7, %v1991_v61  ;;  %v2026_v5 = vadd.f32 %v2023_v54, %v1964_v47  ;;  %v2047_v25 = vpop.permute.xlu0 %2046  ;;  %v1693_v7 = vadd.f32 %v1690_v45, %v1627_v6  ;;  %v5850_v58 = vrot.slane %v5094_v30, %v3983_v24 }
 0x20f   : > { %v2024_v60 = vmul.f32 %v2018_v52, %v1994_v3  ;;  %2674 = vrot.lane.b32.xlu0 %v4375_v29, %s5846_s4  ;;  %v1754_v52 = vadd.f32 %v1751_v9, %v1692_v40  ;;  %v5851_v18 = vrot.slane %v5102_v27, %v3962_v14  ;;  %v2186_v45 = vcombine.high %v5232_v37, %v5232_v37 }
 0x210   : > { %v1814_v47 = vmul.f32 %v5053_v16, %v5850_v58  ;;  %v1755_v54 = vadd.f32 %v1752_v28, %v1693_v7  ;;  %v1815_v30 = vadd.f32 %v1812_v15, %v1753_v36  ;;  %v5852_v16 = vrot.slane %v5102_v27, %v3974_v20  ;;  %2676 = vrot.lane.b32.xlu1 %v4390_v11, %s5846_s4 }
 0x211   : > { %v2027_v22 = vadd.f32 %v2024_v60, %v1965_v12  ;;  %v2049_v42 = vpop.permute.xlu1 %2048  ;;  %v1874_v4 = vmul.f32 %v5066_v21, %v5851_v18  ;;  %v1816_v48 = vadd.f32 %v1813_v44, %v1754_v52  ;;  %v5853_v21 = vrot.slane %v5102_v27, %v3983_v24 }
 0x212   : > { %v2054_v19 = vsel %vm801_vm7, %v2047_v25, %v2049_v42  ;;  %v1875_v12 = vmul.f32 %v5076_v55, %v5852_v16  ;;  %v2051_v62 = vpop.permute.xlu0 %2050  ;;  %v5854_v61 = vrot.slane %v5117_v57, %v3962_v14  ;;  %v1817_v9 = vadd.f32 %v1814_v47, %v1755_v54  ;;  %v3103_v54 = vld [vmem:[%s3964_s14 + $0x61] ss:$8 sm:$0x7] }
 0x213   : > { %v2084_v63 = vmul.f32 %v2072_v49, %v2054_v19  ;;  %v1876_v34 = vmul.f32 %v5097_v59, %v5853_v21  ;;  %v2055_v35 = vsel %vm801_vm7, %v2049_v42, %v2051_v62  ;;  %v5855_v55 = vrot.slane %v5117_v57, %v3974_v20  ;;  %2708 = vrot.lane.b32.xlu0 %v4341_v32, %s5857_s7 }
 0x214   : > { %v1936_v6 = vmul.f32 %v5136_v33, %v5854_v61  ;;  %v5856_v28 = vrot.slane %v5162_v31, %v3974_v20  ;;  %v1877_v56 = vadd.f32 %v1874_v4, %v1815_v30  ;;  %v5858_v33 = vrot.slane %v5117_v57, %v3983_v24  ;;  %2710 = vrot.lane.b32.xlu1 %v4372_v10, %s5857_s7 }
 0x215   : > { %v1937_v49 = vmul.f32 %v5152_v46, %v5855_v55  ;;  %v2087_v2 = vadd.f32 %v2084_v63, %v2025_v13  ;;  %v2053_v59 = vpop.permute.xlu1 %2052  ;;  %v5859_v60 = vrot.slane %v5127_v1, %v3962_v14  ;;  %v1878_v13 = vadd.f32 %v1875_v12, %v1816_v48 }
 0x216   : > { %v2085_v27 = vmul.f32 %v5856_v28, %v2055_v35  ;;  %v1938_v15 = vmul.f32 %v5172_v23, %v5858_v33  ;;  %v2056_v46 = vsel %vm801_vm7, %v2051_v62, %v2053_v59  ;;  %v5860_v40 = vrot.slane %v5127_v1, %v3974_v20  ;;  %v2109_v57 = vpop.permute.xlu0 %2108 }
 0x217   : > { %v1998_v25 = vmul.f32 %v1992_v38, %v5859_v60  ;;  %v5861_v7 = vrot.slane %v5162_v31, %v3983_v24  ;;  %v1879_v23 = vadd.f32 %v1876_v34, %v1817_v9  ;;  %v1939_v58 = vadd.f32 %v1936_v6, %v1877_v56  ;;  %2712 = vrot.lane.b32.xlu0 %v4375_v29, %s5857_s7 }
 0x218   : > { %v1999_v17 = vmul.f32 %v1993_v43, %v5860_v40  ;;  %v2088_v44 = vadd.f32 %v2085_v27, %v2026_v5  ;;  %v5862_v38 = vrot.slane %v5127_v1, %v3983_v24  ;;  %v5863_v42 = vrot.slane %v5159_v51, %v3962_v14  ;;  %2714 = vrot.lane.b32.xlu1 %v4390_v11, %s5857_s7 }
 0x219   : > { %v2086_v36 = vmul.f32 %v5861_v7, %v2056_v46  ;;  %v1940_v43 = vadd.f32 %v1937_v49, %v1878_v13  ;;  %v5864_v5 = vrot.slane %v5159_v51, %v3974_v20  ;;  %v2111_v4 = vpop.permute.xlu1 %2110  ;;  %v2171_v30 = vcombine.high %v5205_v41, %v5205_v41 }
 0x21a   : > { %v2000_v47 = vmul.f32 %v1994_v3, %v5862_v38  ;;  %v2060_v52 = vmul.f32 %v2054_v19, %v5863_v42  ;;  %v1941_v1 = vadd.f32 %v1938_v15, %v1879_v23  ;;  %v2001_v3 = vadd.f32 %v1998_v25, %v1939_v58  ;;  %v2113_v34 = vpop.permute.xlu0 %2112  ;;  %v3104_v42 = vld [vmem:[%s3964_s14 + $0x62] ss:$8 sm:$0x7] }
 0x21b   : > { %v2061_v31 = vmul.f32 %v2055_v35, %v5864_v5  ;;  %v2089_v18 = vadd.f32 %v2086_v36, %v2027_v22  ;;  %v5865_v16 = vrot.slane %v5159_v51, %v3983_v24  ;;  %v2116_v12 = vsel %vm864_vm8, %v2109_v57, %v2111_v4  ;;  %2746 = vrot.lane.b32.xlu0 %v4341_v32, %s3514_s12 }
 0x21c   : > { %v2002_v63 = vadd.f32 %v1999_v17, %v1940_v43  ;;  %v5866_v22 = vrot.slane %v5181_v0, %v3962_v14  ;;  %v5867_v48 = vrot.slane %v5184_v8, %v3962_v14  ;;  %v2166_v41 = vrot.slane %v5194_v26, %v3983_v24  ;;  %2748 = vrot.lane.b32.xlu1 %v4372_v10, %s3514_s12 }
 0x21d   : > { %v2062_v19 = vmul.f32 %v2056_v46, %v5865_v16  ;;  %v2003_v51 = vadd.f32 %v2000_v47, %v1941_v1  ;;  %v2063_v61 = vadd.f32 %v2060_v52, %v2001_v3  ;;  %v2117_v6 = vsel %vm864_vm8, %v2111_v4, %v2113_v34  ;;  %v2115_v56 = vpop.permute.xlu1 %2114 }
 0x21e   : > { %v2122_v62 = vmul.f32 %v2116_v12, %v5866_v22  ;;  %v2146_v21 = vmul.f32 %v5867_v48, %v2116_v12  ;;  %v2202_v35 = vrot.slane %v3103_v54, %v3962_v14  ;;  %v2064_v9 = vadd.f32 %v2061_v31, %v2002_v63  ;;  %v2215_v36 = vpop.permute.xlu0 %2214 }
 0x21f   : > { %v5868_v49 = vrot.slane %v5181_v0, %v3974_v20  ;;  %v5869_v27 = vrot.slane %v5184_v8, %v3974_v20  ;;  %v2065_v33 = vadd.f32 %v2062_v19, %v2003_v51  ;;  %v2118_v60 = vsel %vm864_vm8, %v2113_v34, %v2115_v56  ;;  %2750 = vrot.lane.b32.xlu0 %v4375_v29, %s3514_s12 }
 0x220   : > { %v2149_v55 = vadd.f32 %v2146_v21, %v2087_v2  ;;  %v2125_v15 = vadd.f32 %v2122_v62, %v2063_v61  ;;  %v2185_v25 = vrot.slane %v2171_v30, %v5840_v53  ;;  %v5870_v13 = vrot.slane %v5181_v0, %v3983_v24  ;;  %2752 = vrot.lane.b32.xlu1 %v4390_v11, %s3514_s12  ;;  %v3105_v21 = vld [vmem:[%s3964_s14 + $0x63] ss:$8 sm:$0x7] }
 0x221   : > { %v2123_v28 = vmul.f32 %v2117_v6, %v5868_v49  ;;  %v2147_v59 = vmul.f32 %v5869_v27, %v2117_v6  ;;  %v5871_v17 = vrot.slane %v5184_v8, %v3983_v24  ;;  %v2191_v32 = vmul.f32 %v2186_v45, %v2162_v39  ;;  %v2217_v8 = vpop.permute.xlu1 %2216 }
 0x222   : > { %v2124_v40 = vmul.f32 %v2118_v60, %v5870_v13  ;;  %v2206_v23 = vrot.slane %v3103_v54, %v3974_v20  ;;  %v2222_v58 = vsel %vm971_vm9, %v2215_v36, %v2217_v8  ;;  %v2192_v10 = vmul.f32 %v2185_v25, %v2166_v41  ;;  %v2219_v47 = vpop.permute.xlu0 %2218  ;;  %v3106_v25 = vld [vmem:[%s3964_s14 + $0x64] ss:$8 sm:$0x7] }
 0x223   : > { %v2126_v46 = vadd.f32 %v2123_v28, %v2064_v9  ;;  %v2150_v2 = vadd.f32 %v2147_v59, %v2088_v44  ;;  %v2148_v7 = vmul.f32 %v5871_v17, %v2118_v60  ;;  %v2210_v26 = vrot.slane %v3103_v54, %v3983_v24 }
 0x224   : > { %v2127_v57 = vadd.f32 %v2124_v40, %v2065_v33  ;;  %v2193_v39 = vadd.f32 %v5281_v50, %v2149_v55  ;;  %v2228_v45 = vmul.f32 %v2222_v58, %v2202_v35  ;;  %v2223_v29 = vsel %vm971_vm9, %v2217_v8, %v2219_v47 }
 0x225   : > { %v2769_v44 = vcombine.low %v2125_v15, %v2126_v46  ;;  %v2151_v0 = vadd.f32 %v2148_v7, %v2089_v18  ;;  %v2194_v5 = vadd.f32 %v2191_v32, %v2150_v2  ;;  %v2229_v31 = vmul.f32 %v2223_v29, %v2206_v23  ;;  %v2221_v18 = vpop.permute.xlu1 %2220 }
 0x226   : > { %v2783_v37 = vrot.slane %v2127_v57, %v5840_v53  ;;  %v2231_v43 = vadd.f32 %v2228_v45, %v2193_v39  ;;  %v2224_v4 = vsel %vm971_vm9, %v2219_v47, %v2221_v18  ;;  %v2253_v1 = vpop.permute.xlu0 %2252  ;;  %v2240_v3 = vrot.slane %v3104_v42, %v3962_v14 }
 0x227   : > { %v2776_v38 = vrot.slane %v2769_v44, %v5840_v53  ;;  %v2232_v54 = vadd.f32 %v2229_v31, %v2194_v5  ;;  %v2195_v30 = vadd.f32 %v2192_v10, %v2151_v0  ;;  %v2230_v50 = vmul.f32 %v2224_v4, %v2210_v26 }
 0x228   : > { %v2244_v19 = vrot.slane %v3104_v42, %v3974_v20  ;;  %v2248_v62 = vrot.slane %v3104_v42, %v3983_v24  ;;  %v2278_v55 = vrot.slane %v3105_v21, %v3962_v14  ;;  %v2282_v27 = vrot.slane %v3105_v21, %v3974_v20 }
 0x229   : > { %v2784_v52 = vcombine.low %v2776_v38, %v2783_v37  ;;  %v2233_v16 = vadd.f32 %v2230_v50, %v2195_v30  ;;  %v2255_v11 = vpop.permute.xlu1 %2254  ;;  %v2286_v15 = vrot.slane %v3105_v21, %v3983_v24  ;;  %v2316_v32 = vrot.slane %v3106_v25, %v3962_v14  ;;  %v5426_v38 = vld [vmem:[%s3964_s14 + $0x65] ss:$8 sm:$0x7] }
 0x22a   : > { %v2260_v12 = vsel %vm5872_vm0, %v2253_v1, %v2255_v11  ;;  %v2257_v22 = vpop.permute.xlu0 %2256  ;;  %v2320_v0 = vrot.slane %v3106_v25, %v3974_v20  ;;  %vm5878_vm6 = vcmask 1014784   ;;  %v2324_v10 = vrot.slane %v3106_v25, %v3983_v24 }
 0x22b   : > { %3118 = vst [vmem:[%s4381_s27 + $0x6] sm:$0x3f] %v2784_v52  ;;  %v2266_v63 = vmul.f32 %v2260_v12, %v2240_v3  ;;  %v2261_v48 = vsel %vm5873_vm1, %v2255_v11, %v2257_v22  ;;  %vm5879_vm7 = vmmov %vm5878_vm6  ;;  %vm5881_vm9 = vcmask 850944   ;;  %v2358_v25 = vrot.slane %v5426_v38, %v3974_v20 }
 0x22c   : > { %v2267_v41 = vmul.f32 %v2261_v48, %v2244_v19  ;;  %vm5880_vm8 = vmmov %vm5878_vm6 }
 0x22d   : > { %v2269_v34 = vadd.f32 %v2266_v63, %v2231_v43  ;;  %v2259_v51 = vpop.permute.xlu1 %2258  ;;  %v2354_v43 = vrot.slane %v5426_v38, %v3962_v14  ;;  %vm5882_vm0 = vmmov %vm5881_vm9 }
 0x22e   : > { %v2262_v61 = vsel %vm5874_vm2, %v2257_v22, %v2259_v51  ;;  %v2270_v6 = vadd.f32 %v2267_v41, %v2232_v54  ;;  %v2291_v9 = vpop.permute.xlu0 %2290  ;;  %vm5883_vm1 = vmmov %vm5882_vm0  ;;  %vm5884_vm2 = vcmask 818176  }
 0x22f   : > { %v2268_v35 = vmul.f32 %v2262_v61, %v2248_v62 }
 0x231   : > { %v2271_v49 = vadd.f32 %v2268_v35, %v2233_v16  ;;  %v2293_v28 = vpop.permute.xlu1 %2292 }
 0x232   : > { %v2298_v59 = vsel %vm5875_vm3, %v2291_v9, %v2293_v28  ;;  %v2295_v33 = vpop.permute.xlu0 %2294  ;;  %vm5885_vm3 = vmmov %vm5884_vm2 }
 0x233   : > { %v2304_v56 = vmul.f32 %v2298_v59, %v2278_v55  ;;  %v2299_v60 = vsel %vm5876_vm4, %v2293_v28, %v2295_v33  ;;  %vm5886_vm4 = vmmov %vm5884_vm2 }
 0x234   : > { %v2305_v2 = vmul.f32 %v2299_v60, %v2282_v27 }
 0x235   : > { %v2307_v46 = vadd.f32 %v2304_v56, %v2269_v34  ;;  %v2297_v13 = vpop.permute.xlu1 %2296  ;;  %v3108_v56 = vld [vmem:[%s3964_s14 + $0x79] ss:$8 sm:$0x7] }
 0x236   : > { %v2300_v40 = vsel %vm5877_vm5, %v2295_v33, %v2297_v13  ;;  %v2308_v17 = vadd.f32 %v2305_v2, %v2270_v6  ;;  %v2329_v36 = vpop.permute.xlu0 %2328  ;;  %v3109_v33 = vld [vmem:[%s3964_s14 + $0x7a] ss:$8 sm:$0x7]  ;;  %v2392_v2 = vrot.slane %v3108_v56, %v3962_v14  ;;  %v2396_v13 = vrot.slane %v3108_v56, %v3974_v20 }
 0x237   : > { %v2306_v7 = vmul.f32 %v2300_v40, %v2286_v15  ;;  %v5471_v15 = vld [vmem:[%s3964_s14 + $0x7e] ss:$8 sm:$0x7]  ;;  %v2400_v40 = vrot.slane %v3108_v56, %v3983_v24  ;;  %vm5887_vm5 = vcmask 654336  }
 0x239   : > { %v2309_v44 = vadd.f32 %v2306_v7, %v2271_v49  ;;  %v2331_v57 = vpop.permute.xlu1 %2330  ;;  %v5484_v7 = vld [vmem:[%s3964_s14 + $0x7f] ss:$8 sm:$0x7] }
 0x23a   : > { %v2336_v8 = vsel %vm5878_vm6, %v2329_v36, %v2331_v57  ;;  %v2333_v58 = vpop.permute.xlu0 %2332  ;;  %v5487_v36 = vld [vmem:[%s3964_s14 + $0x93] ss:$8 sm:$0x7]  ;;  %vm5888_vm6 = vmmov %vm5887_vm5 }
 0x23b   : > { %v2342_v23 = vmul.f32 %v2336_v8, %v2316_v32  ;;  %v2337_v26 = vsel %vm5879_vm7, %v2331_v57, %v2333_v58  ;;  %v2434_v57 = vrot.slane %v3109_v33, %v3974_v20  ;;  %v2468_v8 = vrot.slane %v5471_v15, %v3962_v14  ;;  %vm5889_vm7 = vmmov %vm5887_vm5 }
 0x23c   : > { %v2343_v39 = vmul.f32 %v2337_v26, %v2320_v0  ;;  %v2438_v0 = vrot.slane %v3109_v33, %v3983_v24  ;;  %v2476_v26 = vrot.slane %v5471_v15, %v3983_v24 }
 0x23d   : > { %v2345_v37 = vadd.f32 %v2342_v23, %v2307_v46  ;;  %v2335_v45 = vpop.permute.xlu1 %2334  ;;  %v2362_v46 = vrot.slane %v5426_v38, %v3983_v24 }
 0x23e   : > { %v2338_v47 = vsel %vm5880_vm8, %v2333_v58, %v2335_v45  ;;  %v5429_v29 = vadd.f32 %v2343_v39, %v2308_v17  ;;  %v2367_v52 = vpop.permute.xlu0 %2366  ;;  %v2430_v17 = vrot.slane %v3109_v33, %v3962_v14  ;;  %v2510_v39 = vrot.slane %v5484_v7, %v3974_v20 }
 0x23f   : > { %v2344_v42 = vmul.f32 %v2338_v47, %v2324_v10  ;;  %v2472_v10 = vrot.slane %v5471_v15, %v3974_v20  ;;  %v2514_v45 = vrot.slane %v5484_v7, %v3983_v24  ;;  %v2544_v47 = vrot.slane %v5487_v36, %v3962_v14 }
 0x240   : > { %vm5890_vm8 = vcmask 621568  }
 0x241   : > { %v5433_v5 = vadd.f32 %v2344_v42, %v2309_v44  ;;  %v2369_v31 = vpop.permute.xlu1 %2368  ;;  %v5513_v42 = vld [vmem:[%s3964_s14 + $0x94] ss:$8 sm:$0x7] }
 0x242   : > { %v2374_v18 = vsel %vm5881_vm9, %v2367_v52, %v2369_v31  ;;  %v2371_v54 = vpop.permute.xlu0 %2370  ;;  %v5516_v52 = vld [vmem:[%s3964_s14 + $0x95] ss:$8 sm:$0x7]  ;;  %v2582_v15 = vrot.slane %v5513_v42, %v3962_v14  ;;  %vm5891_vm9 = vmmov %vm5890_vm8 }
 0x243   : > { %v2380_v4 = vmul.f32 %v2374_v18, %v2354_v43  ;;  %v2375_v44 = vsel %vm5882_vm0, %v2369_v31, %v2371_v54  ;;  %v2548_v18 = vrot.slane %v5487_v36, %v3974_v20  ;;  %vm5892_vm0 = vmmov %vm5890_vm8 }
 0x244   : > { %v2381_v43 = vmul.f32 %v2375_v44, %v2358_v25  ;;  %v2628_v25 = vrot.slane %v5516_v52, %v3983_v24 }
 0x245   : > { %v5436_v30 = vadd.f32 %v2380_v4, %v2345_v37  ;;  %v2373_v50 = vpop.permute.xlu1 %2372  ;;  %v2506_v37 = vrot.slane %v5484_v7, %v3962_v14  ;;  %v2552_v4 = vrot.slane %v5487_v36, %v3983_v24 }
 0x246   : > { %v2405_v1 = vpop.permute.xlu0 %2404  ;;  %v2376_v23 = vsel %vm5883_vm1, %v2371_v54, %v2373_v50  ;;  %vm5893_vm1 = vcmask 424960  }
 0x247   : > { %v2382_v50 = vmul.f32 %v2376_v23, %v2362_v46 }
 0x249   : > { %v2407_v3 = vpop.permute.xlu1 %2406 }
 0x24a   : > { %v2409_v16 = vpop.permute.xlu0 %2408  ;;  %v2412_v58 = vsel %vm5884_vm2, %v2405_v1, %v2407_v3  ;;  %vm5894_vm2 = vmmov %vm5893_vm1 }
 0x24b   : > { %v2413_v31 = vsel %vm5885_vm3, %v2407_v3, %v2409_v16  ;;  %v2418_v1 = vmul.f32 %v2412_v58, %v2392_v2  ;;  %v5547_v3 = vld [vmem:[%s3964_s14 + $0x96] ss:$8 sm:$0x7] }
 0x24c   : > { %v2419_v46 = vmul.f32 %v2413_v31, %v2396_v13  ;;  %v2384_v13 = vadd.f32 %v2381_v43, %v5429_v29 }
 0x24d   : > { %v2411_v11 = vpop.permute.xlu1 %2410 }
 0x24e   : > { %v2443_v19 = vpop.permute.xlu0 %2442  ;;  %v2414_v56 = vsel %vm5886_vm4, %v2409_v16, %v2411_v11  ;;  %v2422_v43 = vadd.f32 %v2419_v46, %v2384_v13 }
 0x24f   : > { %v2420_v2 = vmul.f32 %v2414_v56, %v2400_v40 }
 0x251   : > { %v2445_v12 = vpop.permute.xlu1 %2444 }
 0x252   : > { %v2447_v63 = vpop.permute.xlu0 %2446  ;;  %v2450_v33 = vsel %vm5887_vm5, %v2443_v19, %v2445_v12  ;;  %v2624_v19 = vrot.slane %v5516_v52, %v3974_v20 }
 0x253   : > { %v2451_v16 = vsel %vm5888_vm6, %v2445_v12, %v2447_v63  ;;  %v2456_v23 = vmul.f32 %v2450_v33, %v2430_v17  ;;  %v2385_v12 = vadd.f32 %v2382_v50, %v5433_v5  ;;  %v5575_v33 = vld [vmem:[%s3964_s14 + $0x97] ss:$8 sm:$0x7] }
 0x254   : > { %v2457_v40 = vmul.f32 %v2451_v16, %v2434_v57  ;;  %v2700_v36 = vrot.slane %v5575_v33, %v3974_v20 }
 0x255   : > { %v2449_v22 = vpop.permute.xlu1 %2448  ;;  %v2423_v57 = vadd.f32 %v2420_v2, %v2385_v12 }
 0x256   : > { %v5438_v62 = vpop.permute.xlu0 %2480  ;;  %v2452_v11 = vsel %vm5889_vm7, %v2447_v63, %v2449_v22  ;;  %v2421_v63 = vadd.f32 %v2418_v1, %v5436_v30  ;;  %v2658_v30 = vrot.slane %v5547_v3, %v3962_v14  ;;  %v2460_v46 = vadd.f32 %v2457_v40, %v2422_v43 }
 0x257   : > { %v2458_v17 = vmul.f32 %v2452_v11, %v2438_v0 }
 0x258   : > { %v2459_v0 = vadd.f32 %v2456_v23, %v2421_v63 }
 0x259   : > { %v5440_v48 = vpop.permute.xlu1 %2482  ;;  %v2461_v16 = vadd.f32 %v2458_v17, %v2423_v57  ;;  %v5898_v17 = vrot.slane %v5516_v52, %v3962_v14 }
 0x25a   : > { %v5442_v21 = vpop.permute.xlu0 %2484  ;;  %v2488_v58 = vsel %vm5890_vm8, %v5438_v62, %v5440_v48 }
 0x25b   : > { %v2489_v22 = vsel %vm5891_vm9, %v5440_v48, %v5442_v21  ;;  %v2494_v5 = vmul.f32 %v2488_v58, %v2468_v8  ;;  %v2662_v48 = vrot.slane %v5547_v3, %v3974_v20 }
 0x25c   : > { %v2495_v50 = vmul.f32 %v2489_v22, %v2472_v10 }
 0x25d   : > { %v5444_v34 = vpop.permute.xlu1 %2486 }
 0x25e   : > { %v5446_v41 = vpop.permute.xlu0 %2518  ;;  %v2490_v62 = vsel %vm5892_vm0, %v5442_v21, %v5444_v34 }
 0x25f   : > { %v2496_v1 = vmul.f32 %v2490_v62, %v2476_v26 }
 0x261   : > { %v5448_v51 = vpop.permute.xlu1 %2520  ;;  %v2499_v13 = vadd.f32 %v2496_v1, %v2461_v16 }
 0x262   : > { %v5450_v61 = vpop.permute.xlu0 %2522  ;;  %v2526_v31 = vsel %vm1283_vm11, %v5446_v41, %v5448_v51 }
 0x263   : > { %v2527_v21 = vsel %vm1283_vm11, %v5448_v51, %v5450_v61  ;;  %v2532_v56 = vmul.f32 %v2526_v31, %v2506_v37  ;;  %v2666_v51 = vrot.slane %v5547_v3, %v3983_v24  ;;  %v2497_v37 = vadd.f32 %v2494_v5, %v2459_v0  ;;  %v3117_v5 = vld [vmem:[%s3964_s14 + $0xa8] ss:$8 sm:$0x7] }
 0x264   : > { %v2533_v11 = vmul.f32 %v2527_v21, %v2510_v39 }
 0x265   : > { %v5452_v6 = vpop.permute.xlu1 %2524  ;;  %v2535_v3 = vadd.f32 %v2532_v56, %v2497_v37 }
 0x266   : > { %v5454_v35 = vpop.permute.xlu0 %2556  ;;  %v2528_v41 = vsel %vm1283_vm11, %v5450_v61, %v5452_v6  ;;  %vm5895_vm11 = vmmov %vm5893_vm1 }
 0x267   : > { %v2534_v2 = vmul.f32 %v2528_v41, %v2514_v45 }
 0x269   : > { %v5456_v9 = vpop.permute.xlu1 %2558 }
 0x26a   : > { %v5458_v55 = vpop.permute.xlu0 %2560  ;;  %v2564_v8 = vsel %vm5893_vm1, %v5454_v35, %v5456_v9  ;;  %v2498_v35 = vadd.f32 %v2495_v50, %v2460_v46 }
 0x26b   : > { %v2565_v10 = vsel %vm5894_vm2, %v5456_v9, %v5458_v55  ;;  %v2570_v23 = vmul.f32 %v2564_v8, %v2544_v47  ;;  %v2696_v9 = vrot.slane %v5575_v33, %v3962_v14 }
 0x26c   : > { %v2571_v12 = vmul.f32 %v2565_v10, %v2548_v18  ;;  %v2536_v18 = vadd.f32 %v2533_v11, %v2498_v35  ;;  %v2738_v10 = vrot.slane %v3117_v5, %v3974_v20 }
 0x26d   : > { %v5460_v49 = vpop.permute.xlu1 %2562  ;;  %v2573_v63 = vadd.f32 %v2570_v23, %v2535_v3 }
 0x26e   : > { %v5462_v28 = vpop.permute.xlu0 %2594  ;;  %v2566_v61 = vsel %vm5895_vm11, %v5458_v55, %v5460_v49  ;;  %v2574_v57 = vadd.f32 %v2571_v12, %v2536_v18 }
 0x26f   : > { %v2572_v55 = vmul.f32 %v2566_v61, %v2552_v4  ;;  %v2704_v4 = vrot.slane %v5575_v33, %v3983_v24  ;;  %v2734_v33 = vrot.slane %v3117_v5, %v3962_v14 }
 0x271   : > { %v5464_v27 = vpop.permute.xlu1 %2596 }
 0x272   : > { %v5466_v59 = vpop.permute.xlu0 %2598  ;;  %v2602_v6 = vsel %vm1361_vm13, %v5462_v28, %v5464_v27 }
 0x273   : > { %v2603_v39 = vsel %vm1361_vm13, %v5464_v27, %v5466_v59  ;;  %v2608_v49 = vmul.f32 %v2602_v6, %v2582_v15  ;;  %v2537_v15 = vadd.f32 %v2534_v2, %v2499_v13 }
 0x275   : > { %v5473_v60 = vpop.permute.xlu1 %2600  ;;  %v2575_v0 = vadd.f32 %v2572_v55, %v2537_v15  ;;  %v2611_v50 = vadd.f32 %v2608_v49, %v2573_v63 }
 0x276   : > { %v5489_v32 = vpop.permute.xlu0 %2632  ;;  %v2604_v28 = vsel %vm1361_vm13, %v5466_v59, %v5473_v60  ;;  %v5896_v59 = vrot.slane %v5513_v42, %v3974_v20 }
 0x278   : > { %v2609_v60 = vmul.f32 %v2603_v39, %v5896_v59 }
 0x279   : > { %v5502_v38 = vpop.permute.xlu1 %2634 }
 0x27a   : > { %v5523_v54 = vpop.permute.xlu0 %2636  ;;  %v2640_v45 = vsel %vm1400_vm14, %v5489_v32, %v5502_v38 }
 0x27b   : > { %v2641_v27 = vsel %vm1400_vm14, %v5502_v38, %v5523_v54  ;;  %v5897_v38 = vrot.slane %v5513_v42, %v3983_v24  ;;  %v2646_v62 = vmul.f32 %v2640_v45, %v5898_v17 }
 0x27d   : > { %v5535_v44 = vpop.permute.xlu1 %2638  ;;  %v2610_v40 = vmul.f32 %v2604_v28, %v5897_v38  ;;  %v2649_v16 = vadd.f32 %v2646_v62, %v2611_v50 }
 0x27e   : > { %v2671_v7 = vpop.permute.xlu0 %2670  ;;  %v2642_v32 = vsel %vm1400_vm14, %v5523_v54, %v5535_v44  ;;  %v2647_v54 = vmul.f32 %v2641_v27, %v2624_v19 }
 0x27f   : > { %v2648_v42 = vmul.f32 %v2642_v32, %v2628_v25  ;;  %v2613_v46 = vadd.f32 %v2610_v40, %v2575_v0 }
 0x281   : > { %v2673_v29 = vpop.permute.xlu1 %2672  ;;  %v2651_v11 = vadd.f32 %v2648_v42, %v2613_v46 }
 0x282   : > { %v2675_v34 = vpop.permute.xlu0 %2674  ;;  %v2678_v31 = vsel %vm1439_vm15, %v2671_v7, %v2673_v29 }
 0x283   : > { %v2679_v43 = vsel %vm1439_vm15, %v2673_v29, %v2675_v34  ;;  %v2612_v29 = vadd.f32 %v2609_v60, %v2574_v57  ;;  %v2684_v56 = vmul.f32 %v2678_v31, %v2658_v30  ;;  %v2742_v30 = vrot.slane %v3117_v5, %v3983_v24 }
 0x284   : > { %v2685_v41 = vmul.f32 %v2679_v43, %v2662_v48 }
 0x285   : > { %v2677_v26 = vpop.permute.xlu1 %2676  ;;  %v2650_v52 = vadd.f32 %v2647_v54, %v2612_v29  ;;  %v2687_v48 = vadd.f32 %v2684_v56, %v2649_v16 }
 0x286   : > { %v2709_v58 = vpop.permute.xlu0 %2708  ;;  %v2680_v21 = vsel %vm1439_vm15, %v2675_v34, %v2677_v26 }
 0x287   : > { %v2686_v25 = vmul.f32 %v2680_v21, %v2666_v51  ;;  %v2688_v6 = vadd.f32 %v2685_v41, %v2650_v52 }
 0x289   : > { %v2711_v47 = vpop.permute.xlu1 %2710 }
 0x28a   : > { %v2713_v22 = vpop.permute.xlu0 %2712  ;;  %v2716_v1 = vsel %vm1478_vm10, %v2709_v58, %v2711_v47  ;;  %v2689_v58 = vadd.f32 %v2686_v25, %v2651_v11 }
 0x28b   : > { %v2717_v7 = vsel %vm1478_vm10, %v2711_v47, %v2713_v22  ;;  %v2722_v37 = vmul.f32 %v2716_v1, %v2696_v9 }
 0x28c   : > { %v2723_v34 = vmul.f32 %v2717_v7, %v2700_v36 }
 0x28d   : > { %v2715_v44 = vpop.permute.xlu1 %2714  ;;  %v2725_v20 = vadd.f32 %v2722_v37, %v2687_v48 }
 0x28e   : > { %v2747_v8 = vpop.permute.xlu0 %2746  ;;  %v2718_v19 = vsel %vm1478_vm10, %v2713_v22, %v2715_v44  ;;  %v2726_v51 = vadd.f32 %v2723_v34, %v2688_v6 }
 0x28f   : > { %v2724_v35 = vmul.f32 %v2718_v19, %v2704_v4 }
 0x291   : > { %v2749_v26 = vpop.permute.xlu1 %2748  ;;  %v2727_v12 = vadd.f32 %v2724_v35, %v2689_v58 }
 0x292   : > { %v2754_v61 = vsel %vm1517_vm12, %v2747_v8, %v2749_v26  ;;  %v2751_v2 = vpop.permute.xlu0 %2750 }
 0x293   : > { %v2760_v14 = vmul.f32 %v2754_v61, %v2734_v33  ;;  %v2755_v23 = vsel %vm1517_vm12, %v2749_v26, %v2751_v2 }
 0x294   : > { %v2761_v9 = vmul.f32 %v2755_v23, %v2738_v10 }
 0x295   : > { %v2753_v13 = vpop.permute.xlu1 %2752  ;;  %v2763_v39 = vadd.f32 %v2760_v14, %v2725_v20 }
 0x296   : > { %v2756_v3 = vsel %vm1517_vm12, %v2751_v2, %v2753_v13  ;;  %v2764_v55 = vadd.f32 %v2761_v9, %v2726_v51 }
 0x297   : > { %v2762_v24 = vmul.f32 %v2756_v3, %v2742_v30 }
 0x298   : > { %v2791_v49 = vcombine.low %v2763_v39, %v2764_v55 }
 0x299   : > { %v2765_v28 = vadd.f32 %v2762_v24, %v2727_v12 }
 0x29a   : > { %v2798_v45 = vrot.slane %v2791_v49, %v5840_v53 }
 0x29b   : > { %v2805_v47 = vrot.slane %v2765_v28, %v5840_v53 }
 0x29d   : > { %v2806_v18 = vcombine.low %v2798_v45, %v2805_v47 }
 0x29f   : > { %3119 = vst [vmem:[%s4381_s27 + $0x12] sm:$0x3f] %v2806_v18 }
 0x2a0   : > { %s5899_s6 = sld [smem:[#allocation19_spill]]  ;;  %s3133_s9 = smul.u32 6, %s3465_s18 }
 0x2a1   : > { %s2845_s0 = sshll.u32 %s4381_s27, 4  ;;  %s3134_s1 = smul.u32 24, %s3469_s19  ;;  %s2846_s0 = int_to_ptr.vmem [resolvable:$true] %s2845_s0 }
 0x2a2   : > { %s3515_s10 = smov 192   ;;  %s3516_s3 = smov 384  }
 0x2a3   : > { %s2826_s8 = sadd.s32 %s3134_s1, %s3133_s9  ;;  %s5901_s14 = sld [smem:[#allocation36_spill]] }
 0x2a4   : > { %s3120_s17 = sshll.u32 %s2826_s8, 5  ;;  %s3517_s12 = smov 2  }
 0x2a5   : > { %s3518_s18 = smov 96   ;;  %s3519_s19 = smov 6  }
 0x2a6   : > { %p5900_p13 = scmp.ne.s32.totalorder %s5899_s6, 0  ;;  %s3520_s27 = smov [#allocation9]  }
 0x2a7   : > { %s3521_s26 = smov 0  }
 0x2a8   : > { %3141 = sst [smem:[#allocation10]] (%p5900_p13), %s3515_s10 }
 0x2a9   : > { %3142 = sst [smem:[#allocation10 + $0x1]] (%p5900_p13), %s3516_s3  ;;  %s2828_s25 = scalar_lea.hbm %s5901_s14, %s3120_s17 }
 0x2aa   : > { %3143 = sst [smem:[#allocation10 + $0x2]] (%p5900_p13), %s3517_s12 }
 0x2ab   : > { %3144 = sst [smem:[#allocation10 + $0x3]] (%p5900_p13), %s3518_s18 }
 0x2ac   : > { %3145 = sst [smem:[#allocation10 + $0x4]] (%p5900_p13), %s3518_s18 }
 0x2ad   : > { %3146 = sst [smem:[#allocation10 + $0x5]] (%p5900_p13), %s3519_s19 }
 0x2ae   : > { %3147 = dma.general (%p5900_p13), %s2846_s0, 384, %s2828_s25, %s2811_s5, %s3520_s27, [#allocation10], %s3521_s26, 0  }
 0x2af PF: > { %s5902_s23 = sld [smem:[#allocation14_spill]]  ;;  %s5903_s30 = sld [smem:[#allocation20_spill]] }
 0x2b0   : > { %p3164_p2 = scmp.ge.s32.totalorder %s3481_s22, 2 }
 0x2b5   : > { %s2873_s11 = sand.u32 1, %s5902_s23   ;;  %p5904_p6 = scmp.ne.s32.totalorder %s5903_s30, 0 }
 0x2b6   : > { %s2874_s29 = scalar_lea.sflag [#allocation4], %s2873_s11 }
 0x2b7   : > { %p3160_p3 = pnand %p3164_p2, %p5904_p6 }
 0x2b9   : > { %3436 = dma.done.wait (!%p3160_p3), %s2874_s29, 384  }
 0x2ba   : > { %3438 = vsyncadd (!%p3160_p3), %s2874_s29, 4294966912  ;;  %s22_s22 = sadd.s32 1, %s3481_s22   ;;  %s5905_s28 = sld [smem:[#allocation15_spill]] }
 0x2bb   : > { %p19_p5 = scmp.ge.s32.totalorder %s22_s22, 6   ;;  %s5906_s14 = sld [smem:[#allocation21_spill]] }
 0x2bc   : > { %s5907_s4 = sld [smem:[#allocation16_spill]]  ;;  %s5908_s17 = sld [smem:[#allocation22_spill]] }
 0x2bd   : > { %s5909_s7 = sld [smem:[#allocation17_spill]]  ;;  %s5910_s5 = sld [smem:[#allocation18_spill]] }
 0x2be   : > { %s5911_s12 = smov %s3445_s13  ;;  %s5913_s15 = smov %s3457_s16 }
 0x2bf   : > { %s5915_s18 = smov %s3473_s20  ;;  %s5916_s19 = smov %s3477_s21 }
 0x2c0   : > { %s5912_s13 = smov %s5905_s28  ;;  %21 = sbr.rel (!%p19_p5) target bundleno = 15 (0xf), region = 176 }
 0x2c2   : > { %s5914_s16 = smov %s5907_s4 }
 0x2c3   : > { %s5917_s20 = smov %s5909_s7  ;;  %s5918_s21 = smov %s5910_s5 }
 0x2c7   :  { %2879 = vsyncpa [#allocation3], 1 }
 0x2c8   :  { %2881 = vsyncpa [#allocation3 + $0x1], 1 }
 0x2c9   :  { %2882 = vsyncpa [#allocation6], 1 }
 0x2ca   :  { %2884 = vsyncpa [#allocation6 + $0x1], 1 }
 0x2cb   :  { %2885 = vsyncpa [#allocation4], 1 }
 0x2cc   :  { %2887 = vsyncpa [#allocation4 + $0x1], 1 }

</bundles_post_ra>
